<compile_context>
chip_gen: v5e
topology: v5e:2x2
jax: 0.10.0
libtpu: 0.0.40
codegen_flags: <defaults>
</compile_context>

<pallas_src>
import functools

import jax
import jax.numpy as jnp
from jax import lax
from jax.experimental import pallas as pl
from jax.experimental.pallas import tpu as pltpu


def _default_vmem_limit():
    # Leave ~25% headroom below physical VMEM for compiler scratch and Pallas
    # double buffers: ~48 MiB on v7x (64 MiB phys), ~96 MiB on v5e/v6e (128 MiB).
    try:
        cap = getattr(pltpu.get_tpu_info(), "vmem_capacity_bytes", None)
        if cap:
            return int(cap) * 3 // 4
    except Exception:
        pass
    return 64 * 1024 * 1024


_VMEM_LIMIT = _default_vmem_limit()


def _row_tile(n):
    """Largest row tile from a fixed menu that divides n (keeps blocks aligned)."""
    for t in (512, 256, 128, 64, 32, 16, 8):
        if n >= t and n % t == 0:
            return t
    return n


# ----------------------------------------------------------------------------
# Pallas kernels
# ----------------------------------------------------------------------------

def _linear_kernel(x_ref, w_ref, b_ref, o_ref, *, activation):
    # bf16 MXU inputs, f32 accumulate.
    y = jnp.dot(x_ref[...].astype(jnp.bfloat16), w_ref[...],
                preferred_element_type=jnp.float32)
    y = y + b_ref[...]
    if activation == "gelu":
        # TODO(synk): HuggingFace BERT uses exact erf GELU; tanh approximation
        #             kept (erf has no guaranteed Mosaic lowering) -> small
        #             systematic numeric drift vs. the reference.
        y = 0.5 * y * (1.0 + jnp.tanh(0.7978845608028654 *
                                      (y + 0.044715 * y * y * y)))
    o_ref[...] = y.astype(o_ref.dtype)


def pallas_linear(x, w, b, activation="none", out_dtype=jnp.float32):
    """x: (N, D), w: (D, M) bf16, b: (M,) f32 -> (N, M) out_dtype. Row-tiled."""
    N, D = x.shape
    M = w.shape[1]
    tm = _row_tile(N)
    # TODO(synk): on v5e consider pipeline_mode=pl.Buffered(3) on the x/out
    #             specs and single-buffering the constant-index weight spec.
    return pl.pallas_call(
        functools.partial(_linear_kernel, activation=activation),
        grid=(N // tm,),
        in_specs=[pl.BlockSpec((tm, D), lambda i: (i, 0)),
                  pl.BlockSpec((D, M), lambda i: (0, 0)),
                  pl.BlockSpec((1, M), lambda i: (0, 0))],
        out_specs=pl.BlockSpec((tm, M), lambda i: (i, 0)),
        out_shape=jax.ShapeDtypeStruct((N, M), out_dtype),
        compiler_params=pltpu.CompilerParams(
            dimension_semantics=("parallel",),
            vmem_limit_bytes=_VMEM_LIMIT),
    )(x, w, b.reshape(1, M))


def _linear_add_ln_kernel(x_ref, w_ref, b_ref, r_ref, g_ref, be_ref, o_ref, *, eps):
    # y = LayerNorm(residual + x @ w + b)  -- bias, residual and LN fused.
    y = jnp.dot(x_ref[...].astype(jnp.bfloat16), w_ref[...],
                preferred_element_type=jnp.float32)
    y = y + b_ref[...] + r_ref[...]
    mu = jnp.mean(y, axis=-1, keepdims=True)
    var = jnp.mean((y - mu) ** 2, axis=-1, keepdims=True)
    o_ref[...] = ((y - mu) * lax.rsqrt(var + eps)) * g_ref[...] + be_ref[...]


def pallas_linear_add_ln(x, w, b, residual, gamma, beta, eps=1e-12):
    """LayerNorm(residual + x @ w + b). x: (N, D), w: (D, M), residual: (N, M) f32."""
    N, D = x.shape
    M = w.shape[1]
    tm = _row_tile(N)
    return pl.pallas_call(
        functools.partial(_linear_add_ln_kernel, eps=eps),
        grid=(N // tm,),
        in_specs=[pl.BlockSpec((tm, D), lambda i: (i, 0)),
                  pl.BlockSpec((D, M), lambda i: (0, 0)),
                  pl.BlockSpec((1, M), lambda i: (0, 0)),
                  pl.BlockSpec((tm, M), lambda i: (i, 0)),
                  pl.BlockSpec((1, M), lambda i: (0, 0)),
                  pl.BlockSpec((1, M), lambda i: (0, 0))],
        out_specs=pl.BlockSpec((tm, M), lambda i: (i, 0)),
        out_shape=jax.ShapeDtypeStruct((N, M), jnp.float32),
        compiler_params=pltpu.CompilerParams(
            dimension_semantics=("parallel",),
            vmem_limit_bytes=_VMEM_LIMIT),
    )(x, w, b.reshape(1, M), residual, gamma.reshape(1, M), beta.reshape(1, M))


def _layernorm_kernel(x_ref, g_ref, b_ref, o_ref, *, eps):
    x = x_ref[...]
    mu = jnp.mean(x, axis=-1, keepdims=True)
    var = jnp.mean((x - mu) ** 2, axis=-1, keepdims=True)
    o_ref[...] = ((x - mu) * lax.rsqrt(var + eps)) * g_ref[...] + b_ref[...]


def pallas_layernorm(x, gamma, beta, eps=1e-12):
    N, H = x.shape
    tm = _row_tile(N)
    return pl.pallas_call(
        functools.partial(_layernorm_kernel, eps=eps),
        grid=(N // tm,),
        in_specs=[pl.BlockSpec((tm, H), lambda i: (i, 0)),
                  pl.BlockSpec((1, H), lambda i: (0, 0)),
                  pl.BlockSpec((1, H), lambda i: (0, 0))],
        out_specs=pl.BlockSpec((tm, H), lambda i: (i, 0)),
        out_shape=jax.ShapeDtypeStruct((N, H), jnp.float32),
        compiler_params=pltpu.CompilerParams(
            dimension_semantics=("parallel",),
            vmem_limit_bytes=_VMEM_LIMIT),
    )(x, gamma.reshape(1, H), beta.reshape(1, H))


def _attn_head_kernel(q_ref, k_ref, v_ref, bias_ref, o_ref, *, scale):
    """One (batch, head) pair per grid step.  Head stripes are lane-aligned
    (head_dim multiple of 128) and the output is written straight into its
    lane stripe of the (B, S, H) layout."""
    # Fold 1/sqrt(dh) into q (S*dh elements) instead of the (S, S) scores.
    q = (q_ref[0].astype(jnp.float32) * scale).astype(jnp.bfloat16)   # (S, dh)
    k = k_ref[0].astype(jnp.bfloat16)                                 # (S, dh)
    v = v_ref[0].astype(jnp.bfloat16)                                 # (S, dh)
    s = lax.dot_general(q, k, (((1,), (1,)), ((), ())),
                        preferred_element_type=jnp.float32)           # (S, S)
    s = s + bias_ref[...]                                             # (1, S) key mask
    s = s - jnp.max(s, axis=-1, keepdims=True)
    p = jnp.exp(s)
    p = p * pl.reciprocal(jnp.sum(p, axis=-1, keepdims=True))         # exact recip
    # TODO(synk): for realistic S (>=256) switch to flash-style k/v blocking
    #             with online softmax instead of the full (S, S) score matrix.
    o_ref[0] = jnp.dot(p.astype(jnp.bfloat16), v,
                       preferred_element_type=jnp.float32).astype(o_ref.dtype)


def pallas_attention(qkv, mask_bias, *, n_heads, out_dtype=jnp.bfloat16):
    """qkv: (B, S, 3H) bf16, mask_bias: (B, 1, S) f32 -> (B, S, H) out_dtype."""
    B, S, H3 = qkv.shape
    H = H3 // 3
    dh = H // n_heads
    return pl.pallas_call(
        functools.partial(_attn_head_kernel, scale=1.0 / (dh ** 0.5)),
        grid=(B, n_heads),
        in_specs=[pl.BlockSpec((1, S, dh), lambda b, h: (b, 0, h)),
                  pl.BlockSpec((1, S, dh), lambda b, h: (b, 0, n_heads + h)),
                  pl.BlockSpec((1, S, dh), lambda b, h: (b, 0, 2 * n_heads + h)),
                  pl.BlockSpec((None, 1, S), lambda b, h: (b, 0, 0))],
        out_specs=pl.BlockSpec((1, S, dh), lambda b, h: (b, 0, h)),
        out_shape=jax.ShapeDtypeStruct((B, S, H), out_dtype),
        compiler_params=pltpu.CompilerParams(
            dimension_semantics=("parallel", "parallel"),
            vmem_limit_bytes=_VMEM_LIMIT),
    )(qkv, qkv, qkv, mask_bias)


def _lstm_gates_kernel(x_ref, w_ref, b_ref, o_ref):
    # Precomputed input-to-gate projection for ALL timesteps: removes the
    # D-wide half of the LSTM FLOPs from the sequential recurrence.
    o_ref[...] = (jnp.dot(x_ref[...].astype(jnp.bfloat16), w_ref[...],
                          preferred_element_type=jnp.float32)
                  + b_ref[...]).astype(o_ref.dtype)


def pallas_lstm_gates(x, w_ih, b):
    """x: (N, D) time-major rows, w_ih: (2, D, 4H) bf16, b: (2, 1, 4H) f32
    -> (2, N, 4H) bf16 gate pre-activations (both directions)."""
    N, D = x.shape
    G = w_ih.shape[2]
    tm = _row_tile(N)
    return pl.pallas_call(
        _lstm_gates_kernel,
        grid=(2, N // tm),
        in_specs=[pl.BlockSpec((tm, D), lambda d, i: (i, 0)),
                  pl.BlockSpec((None, D, G), lambda d, i: (d, 0, 0)),
                  pl.BlockSpec((None, 1, G), lambda d, i: (d, 0, 0))],
        out_specs=pl.BlockSpec((None, tm, G), lambda d, i: (d, i, 0)),
        out_shape=jax.ShapeDtypeStruct((2, N, G), jnp.bfloat16),
        compiler_params=pltpu.CompilerParams(
            dimension_semantics=("parallel", "parallel"),
            vmem_limit_bytes=_VMEM_LIMIT),
    )(x, w_ih, b)


def _bilstm_kernel(gx_ref, whh_ref, valid_ref, o_ref, h_sc, c_sc, *, chunk, hidden):
    """Grid = (direction, time-chunk).  The recurrence carries (h, c) in VMEM
    scratch across time-chunk grid steps; the backward direction walks chunks
    and in-chunk steps in reverse (no HBM reversal copies).  Gate inputs are
    precomputed, so only h @ W_hh + elementwise gates run per step."""
    d = pl.program_id(0)

    @pl.when(pl.program_id(1) == 0)
    def _():
        h_sc[...] = jnp.zeros_like(h_sc)
        c_sc[...] = jnp.zeros_like(c_sc)

    whh = whh_ref[...]                               # (Hl, 4Hl) bf16, VMEM-resident

    @pl.loop(0, chunk)
    def _(t):
        # d == 0 -> t ; d == 1 -> chunk - 1 - t   (scalar ALU only)
        t_loc = t + d * (chunk - 1 - 2 * t)
        gates = (gx_ref[t_loc].astype(jnp.float32)
                 + jnp.dot(h_sc[...].astype(jnp.bfloat16), whh,
                           preferred_element_type=jnp.float32))        # (B, 4Hl)
        # Gate stripes are 128-lane aligned (hidden is a multiple of 128).
        i_g = jax.nn.sigmoid(gates[:, 0 * hidden:1 * hidden])
        f_g = jax.nn.sigmoid(gates[:, 1 * hidden:2 * hidden])
        g_g = jnp.tanh(gates[:, 2 * hidden:3 * hidden])
        o_g = jax.nn.sigmoid(gates[:, 3 * hidden:4 * hidden])
        # pack_padded_sequence equivalent for trailing padding: state stays 0
        # (and output is 0) at padded positions, so the backward recurrence
        # effectively starts at the last valid token of each sequence.
        valid = valid_ref[t_loc]                                        # (B, 1)
        c = valid * (f_g * c_sc[...] + i_g * g_g)
        h = valid * (o_g * jnp.tanh(c))
        c_sc[...] = c
        h_sc[...] = h
        o_ref[t_loc] = h.astype(o_ref.dtype)


def pallas_bilstm(gate_x, w_hh, valid, *, time_chunk=64):
    """Fused bidirectional LSTM over precomputed gate inputs.
    gate_x: (2, S, B, 4H) bf16; w_hh: (2, H, 4H) bf16; valid: (S, B, 1) f32
    -> (2, S, B, H) bf16, [0]=forward, [1]=backward (forward time order)."""
    _, S, B, G = gate_x.shape
    Hl = w_hh.shape[1]
    # Largest divisor of S not exceeding time_chunk -> gate inputs / outputs
    # are streamed through VMEM chunk-by-chunk (never fully resident).
    ts = 1
    for t in range(1, min(S, time_chunk) + 1):
        if S % t == 0:
            ts = t
    nc = S // ts

    def rev(d, s):
        # forward: chunks 0..nc-1 ; backward: chunks nc-1..0
        return s + d * (nc - 1 - 2 * s)

    return pl.pallas_call(
        functools.partial(_bilstm_kernel, chunk=ts, hidden=Hl),
        grid=(2, nc),
        in_specs=[
            pl.BlockSpec((None, ts, B, G), lambda d, s: (d, rev(d, s), 0, 0)),
            pl.BlockSpec((None, Hl, G), lambda d, s: (d, 0, 0)),
            pl.BlockSpec((ts, B, 1), lambda d, s: (rev(d, s), 0, 0)),
        ],
        out_specs=pl.BlockSpec((None, ts, B, Hl), lambda d, s: (d, rev(d, s), 0, 0)),
        out_shape=jax.ShapeDtypeStruct((2, S, B, Hl), jnp.bfloat16),
        scratch_shapes=[pltpu.VMEM((B, Hl), jnp.float32),
                        pltpu.VMEM((B, Hl), jnp.float32)],
        compiler_params=pltpu.CompilerParams(
            dimension_semantics=("parallel", "arbitrary"),
            vmem_limit_bytes=_VMEM_LIMIT),
    )(gate_x, w_hh, valid)


def _head_kernel(x_ref, w_ref, b_ref, o_ref):
    # logits = [fwd, bwd] @ [[Wf],[Wb]] + b  -- computed as two dots, so the
    # BiLSTM directions never need to be concatenated in HBM.
    y = (jnp.dot(x_ref[0].astype(jnp.bfloat16), w_ref[0],
                 preferred_element_type=jnp.float32)
         + jnp.dot(x_ref[1].astype(jnp.bfloat16), w_ref[1],
                   preferred_element_type=jnp.float32)
         + b_ref[...])
    o_ref[...] = y


def pallas_bilstm_head(feats, w, b):
    """feats: (2, N, Hl) bf16, w: (2, Hl, Cpad) bf16, b: (Cpad,) -> (N, Cpad) f32."""
    _, N, Hl = feats.shape
    C = w.shape[2]
    tm = _row_tile(N)
    return pl.pallas_call(
        _head_kernel,
        grid=(N // tm,),
        in_specs=[pl.BlockSpec((2, tm, Hl), lambda i: (0, i, 0)),
                  pl.BlockSpec((2, Hl, C), lambda i: (0, 0, 0)),
                  pl.BlockSpec((1, C), lambda i: (0, 0))],
        out_specs=pl.BlockSpec((tm, C), lambda i: (i, 0)),
        out_shape=jax.ShapeDtypeStruct((N, C), jnp.float32),
        compiler_params=pltpu.CompilerParams(
            dimension_semantics=("parallel",),
            vmem_limit_bytes=_VMEM_LIMIT),
    )(feats, w, b.reshape(1, C))


# ----------------------------------------------------------------------------
# Parameter construction (deterministic, synthetic)
# ----------------------------------------------------------------------------

def make_params(key, *, vocab, max_pos, hidden, n_heads, n_layers, ffn,
                lstm_hidden, n_classes):
    def nrm(k, shape, scale=0.02, dtype=jnp.float32):
        return (scale * jax.random.normal(k, shape, jnp.float32)).astype(dtype)

    bf16 = jnp.bfloat16   # matmul weights stored bf16 (f32 accumulate in-kernel)
    keys = iter(jax.random.split(key, 256))
    p = {
        "word_emb": nrm(next(keys), (vocab, hidden)),
        "pos_emb": nrm(next(keys), (max_pos, hidden)),
        "emb_ln_g": jnp.ones((hidden,), jnp.float32),
        "emb_ln_b": jnp.zeros((hidden,), jnp.float32),
        "layers": [],
    }
    for _ in range(n_layers):
        lyr = {
            # fused QKV projection (heads laid out as consecutive dh stripes)
            "wqkv": nrm(next(keys), (hidden, 3 * hidden), dtype=bf16),
            "bqkv": jnp.zeros((3 * hidden,), jnp.float32),
            "wo": nrm(next(keys), (hidden, hidden), dtype=bf16),
            "bo": jnp.zeros((hidden,), jnp.float32),
            "ln1_g": jnp.ones((hidden,), jnp.float32),
            "ln1_b": jnp.zeros((hidden,), jnp.float32),
            "w1": nrm(next(keys), (hidden, ffn), dtype=bf16),
            "b1": jnp.zeros((ffn,), jnp.float32),
            "w2": nrm(next(keys), (ffn, hidden), dtype=bf16),
            "b2": jnp.zeros((hidden,), jnp.float32),
            "ln2_g": jnp.ones((hidden,), jnp.float32),
            "ln2_b": jnp.zeros((hidden,), jnp.float32),
        }
        p["layers"].append(lyr)

    # Bidirectional single-layer LSTM; lstm_hidden is a multiple of 128 so the
    # i/f/g/o gate stripes and the per-direction output are lane-aligned.
    p["lstm_wih"] = nrm(next(keys), (2, hidden, 4 * lstm_hidden), 0.1, bf16)
    p["lstm_whh"] = nrm(next(keys), (2, lstm_hidden, 4 * lstm_hidden), 0.1, bf16)
    p["lstm_b"] = jnp.zeros((2, 1, 4 * lstm_hidden), jnp.float32)   # b_ih + b_hh combined

    # hidden2tag head, stored split per direction and padded to 128 lanes.
    c_pad = ((n_classes + 127) // 128) * 128
    head_w = nrm(next(keys), (2, lstm_hidden, n_classes), 0.1)
    p["head_w"] = jnp.pad(head_w,
                          ((0, 0), (0, 0), (0, c_pad - n_classes))).astype(bf16)
    p["head_b"] = jnp.zeros((c_pad,), jnp.float32)
    return p


# ----------------------------------------------------------------------------
# Forward (mirrors BERT_LSTM.forward: bert -> bilstm -> emissions)
# ----------------------------------------------------------------------------

def bert_lstm_forward(params, sent, masks, *, n_heads, n_classes):
    B, S = sent.shape
    hidden = params["word_emb"].shape[1]

    # --- BERT embeddings (gather is XLA glue; layernorm in Pallas) ---
    h = params["word_emb"][sent] + params["pos_emb"][None, :S, :]
    h2d = h.reshape(B * S, hidden)
    h2d = pallas_layernorm(h2d, params["emb_ln_g"], params["emb_ln_b"])

    # additive key mask, computed once (not per head / per layer)
    mask_bias = ((1.0 - masks.astype(jnp.float32)) * (-1e9))[:, None, :]   # (B,1,S)

    # --- BERT transformer layers (bf16 intermediates, f32 residual stream) ---
    for lyr in params["layers"]:
        qkv = pallas_linear(h2d, lyr["wqkv"], lyr["bqkv"],
                            out_dtype=jnp.bfloat16)                    # (B*S, 3H)
        attn = pallas_attention(qkv.reshape(B, S, 3 * hidden), mask_bias,
                                n_heads=n_heads)                       # (B, S, H) bf16
        h2d = pallas_linear_add_ln(attn.reshape(B * S, hidden), lyr["wo"],
                                   lyr["bo"], h2d, lyr["ln1_g"], lyr["ln1_b"])
        ff = pallas_linear(h2d, lyr["w1"], lyr["b1"], activation="gelu",
                           out_dtype=jnp.bfloat16)                     # (B*S, FFN)
        h2d = pallas_linear_add_ln(ff, lyr["w2"], lyr["b2"],
                                   h2d, lyr["ln2_g"], lyr["ln2_b"])

    bert_out = h2d.reshape(B, S, hidden)

    # --- BiLSTM ---
    # One XLA transpose to time-major; gate precompute + recurrence then work
    # on time-major blocks (lane-dense, no per-step relayout).
    # TODO(synk): dropout_p is an inference no-op.
    x_tm = bert_out.transpose(1, 0, 2).reshape(S * B, hidden)          # (S*B, H)
    gate_x = pallas_lstm_gates(x_tm, params["lstm_wih"], params["lstm_b"])
    Hl = params["lstm_whh"].shape[1]
    gate_x = gate_x.reshape(2, S, B, 4 * Hl)
    valid = masks.T.astype(jnp.float32)[:, :, None]                    # (S, B, 1)
    lstm_out = pallas_bilstm(gate_x, params["lstm_whh"], valid)        # (2,S,B,Hl)

    # --- per-token tag head (hidden2tag for out_number + add classes) ---
    logits = pallas_bilstm_head(lstm_out.reshape(2, S * B, Hl),
                                params["head_w"], params["head_b"])    # (S*B, 128)
    logits = logits[:, :n_classes].reshape(S, B, n_classes).transpose(1, 0, 2)
    return logits                                                      # (B, S, C)


# ----------------------------------------------------------------------------
# Main
# ----------------------------------------------------------------------------

if __name__ == "__main__":
    # Small config consistent with the module: crf=True -> add=2,
    # out_number=5 -> 7 emission classes; bi_tag=True, num_layer=1.
    # Head dim / LSTM hidden chosen as 128 so all stripes are lane-aligned.
    B, S = 2, 8
    VOCAB, HIDDEN, N_HEADS, N_LAYERS, FFN = 100, 256, 2, 2, 512
    LSTM_HIDDEN, N_CLASSES = 128, 5 + 2

    key = jax.random.PRNGKey(0)
    k_params, k_sent = jax.random.split(key)
    params = make_params(k_params, vocab=VOCAB, max_pos=S, hidden=HIDDEN,
                         n_heads=N_HEADS, n_layers=N_LAYERS, ffn=FFN,
                         lstm_hidden=LSTM_HIDDEN, n_classes=N_CLASSES)

    sent = jax.random.randint(k_sent, (B, S), 0, VOCAB, dtype=jnp.int32)
    length = jnp.array([S, S - 2], dtype=jnp.int32)
    masks = (jnp.arange(S)[None, :] < length[:, None]).astype(jnp.int32)

    fwd = jax.jit(functools.partial(bert_lstm_forward, n_heads=N_HEADS,
                                    n_classes=N_CLASSES))
    out = fwd(params, sent, masks)
    out = jax.block_until_ready(out)

    assert out.shape == (B, S, N_CLASSES), out.shape
    assert jnp.all(jnp.isfinite(out))
    print("KERNEL_OK")
</pallas_src>

<mosaic_0001>
module attributes {stable_mosaic.version = 11 : i64} {
  func.func @_layernorm_kernel(%arg0: i32, %arg1: memref<16x256xf32, #tpu.memory_space<vmem>>, %arg2: memref<1x256xf32, #tpu.memory_space<vmem>>, %arg3: memref<1x256xf32, #tpu.memory_space<vmem>>, %arg4: memref<16x256xf32, #tpu.memory_space<vmem>>) attributes {dimension_semantics = [#tpu.dimension_semantics<parallel>], iteration_bounds = array<i64: 1>, scalar_prefetch = 0 : i64, scratch_operands = 0 : i64, tpu.core_type = #tpu.core_type<tc>, window_params = [{transform_indices = @transform_0, window_bounds = array<i64: 16, 256>}, {pipeline_mode = #tpu.pipeline_mode<synchronous>, transform_indices = @transform_1, window_bounds = array<i64: 1, 256>}, {pipeline_mode = #tpu.pipeline_mode<synchronous>, transform_indices = @transform_2, window_bounds = array<i64: 1, 256>}, {transform_indices = @transform_3, window_bounds = array<i64: 16, 256>}]} {
    %c0 = arith.constant 0 : index
    %c0_0 = arith.constant 0 : index
    %0 = vector.load %arg1[%c0, %c0_0] : memref<16x256xf32, #tpu.memory_space<vmem>>, vector<16x256xf32>
    %cst = arith.constant dense<0.000000e+00> : vector<16xf32>
    %1 = vector.multi_reduction <add>, %0, %cst [1] : vector<16x256xf32> to vector<16xf32>
    %2 = vector.shape_cast %1 : vector<16xf32> to vector<16x1xf32>
    %cst_1 = arith.constant 2.560000e+02 : f32
    %3 = vector.broadcast %cst_1 : f32 to vector<16x1xf32>
    %4 = arith.divf %2, %3 : vector<16x1xf32>
    %5 = vector.broadcast %4 : vector<16x1xf32> to vector<16x256xf32>
    %6 = arith.subf %0, %5 : vector<16x256xf32>
    %7 = arith.mulf %6, %6 : vector<16x256xf32>
    %cst_2 = arith.constant dense<0.000000e+00> : vector<16xf32>
    %8 = vector.multi_reduction <add>, %7, %cst_2 [1] : vector<16x256xf32> to vector<16xf32>
    %9 = vector.shape_cast %8 : vector<16xf32> to vector<16x1xf32>
    %cst_3 = arith.constant 2.560000e+02 : f32
    %10 = vector.broadcast %cst_3 : f32 to vector<16x1xf32>
    %11 = arith.divf %9, %10 : vector<16x1xf32>
    %12 = vector.broadcast %4 : vector<16x1xf32> to vector<16x256xf32>
    %13 = arith.subf %0, %12 : vector<16x256xf32>
    %cst_4 = arith.constant 9.99999996E-13 : f32
    %14 = vector.broadcast %cst_4 : f32 to vector<16x1xf32>
    %15 = arith.addf %11, %14 : vector<16x1xf32>
    %16 = math.rsqrt %15 : vector<16x1xf32>
    %17 = vector.broadcast %16 : vector<16x1xf32> to vector<16x256xf32>
    %18 = arith.mulf %13, %17 : vector<16x256xf32>
    %c0_5 = arith.constant 0 : index
    %c0_6 = arith.constant 0 : index
    %19 = vector.load %arg2[%c0_5, %c0_6] : memref<1x256xf32, #tpu.memory_space<vmem>>, vector<1x256xf32>
    %20 = vector.broadcast %19 : vector<1x256xf32> to vector<16x256xf32>
    %21 = arith.mulf %18, %20 : vector<16x256xf32>
    %c0_7 = arith.constant 0 : index
    %c0_8 = arith.constant 0 : index
    %22 = vector.load %arg3[%c0_7, %c0_8] : memref<1x256xf32, #tpu.memory_space<vmem>>, vector<1x256xf32>
    %23 = vector.broadcast %22 : vector<1x256xf32> to vector<16x256xf32>
    %24 = arith.addf %21, %23 : vector<16x256xf32>
    %c0_9 = arith.constant 0 : index
    %c0_10 = arith.constant 0 : index
    %25 = vector.load %arg4[%c0_9, %c0_10] : memref<16x256xf32, #tpu.memory_space<vmem>>, vector<16x256xf32>
    tpu.vector_store %arg4[%c0_9, %c0_10], %24 {strides = array<i32>} : memref<16x256xf32, #tpu.memory_space<vmem>>, vector<16x256xf32>,
    return
  }
  func.func @transform_0(%arg0: i32) -> (i32, i32) {
    %c0_i32 = arith.constant 0 : i32
    %c0_i32_0 = arith.constant 0 : i32
    return %arg0, %c0_i32 : i32, i32
  }
  func.func @transform_1(%arg0: i32) -> (i32, i32) {
    %c0_i32 = arith.constant 0 : i32
    %c0_i32_0 = arith.constant 0 : i32
    %c0_i32_1 = arith.constant 0 : i32
    return %c0_i32, %c0_i32_0 : i32, i32
  }
  func.func @transform_2(%arg0: i32) -> (i32, i32) {
    %c0_i32 = arith.constant 0 : i32
    %c0_i32_0 = arith.constant 0 : i32
    %c0_i32_1 = arith.constant 0 : i32
    return %c0_i32, %c0_i32_0 : i32, i32
  }
  func.func @transform_3(%arg0: i32) -> (i32, i32) {
    %c0_i32 = arith.constant 0 : i32
    %c0_i32_0 = arith.constant 0 : i32
    return %arg0, %c0_i32 : i32, i32
  }
}

module attributes {stable_mosaic.version = 11 : i64} {
  func.func @_attn_head_kernel(%arg0: i32, %arg1: i32, %arg2: memref<1x8x128xbf16, #tpu.memory_space<vmem>>, %arg3: memref<1x8x128xbf16, #tpu.memory_space<vmem>>, %arg4: memref<1x8x128xbf16, #tpu.memory_space<vmem>>, %arg5: memref<1x1x8xf32, #tpu.memory_space<vmem>>, %arg6: memref<1x8x128xbf16, #tpu.memory_space<vmem>>) attributes {dimension_semantics = [#tpu.dimension_semantics<parallel>, #tpu.dimension_semantics<parallel>], iteration_bounds = array<i64: 2, 2>, scalar_prefetch = 0 : i64, scratch_operands = 0 : i64, tpu.core_type = #tpu.core_type<tc>, window_params = [{transform_indices = @transform_0, window_bounds = array<i64: 1, 8, 128>}, {transform_indices = @transform_1, window_bounds = array<i64: 1, 8, 128>}, {transform_indices = @transform_2, window_bounds = array<i64: 1, 8, 128>}, {transform_indices = @transform_3, window_bounds = array<i64: 1, 1, 8>}, {transform_indices = @transform_4, window_bounds = array<i64: 1, 8, 128>}]} {
    %c0 = arith.constant 0 : index
    %c0_0 = arith.constant 0 : index
    %c0_1 = arith.constant 0 : index
    %0 = vector.load %arg2[%c0, %c0_0, %c0_1] : memref<1x8x128xbf16, #tpu.memory_space<vmem>>, vector<1x8x128xbf16>
    %1 = vector.shape_cast %0 : vector<1x8x128xbf16> to vector<8x128xbf16>
    %2 = arith.extf %1 : vector<8x128xbf16> to vector<8x128xf32>
    %cst = arith.constant 0.0883883461 : f32
    %3 = vector.broadcast %cst : f32 to vector<8x128xf32>
    %4 = arith.mulf %2, %3 : vector<8x128xf32>
    %5 = arith.truncf %4 : vector<8x128xf32> to vector<8x128xbf16>
    %c0_2 = arith.constant 0 : index
    %c0_3 = arith.constant 0 : index
    %c0_4 = arith.constant 0 : index
    %6 = vector.load %arg3[%c0_2, %c0_3, %c0_4] : memref<1x8x128xbf16, #tpu.memory_space<vmem>>, vector<1x8x128xbf16>
    %7 = vector.shape_cast %6 : vector<1x8x128xbf16> to vector<8x128xbf16>
    %c0_5 = arith.constant 0 : index
    %c0_6 = arith.constant 0 : index
    %c0_7 = arith.constant 0 : index
    %8 = vector.load %arg4[%c0_5, %c0_6, %c0_7] : memref<1x8x128xbf16, #tpu.memory_space<vmem>>, vector<1x8x128xbf16>
    %9 = vector.shape_cast %8 : vector<1x8x128xbf16> to vector<8x128xbf16>
    %cst_8 = arith.constant dense<0.000000e+00> : vector<8x8xf32>
    %10 = tpu.matmul %5, %7, %cst_8 {dimension_numbers = #tpu.dot_dimension_numbers<[1], [1], [0], [0], [0, 0, 1, 0], [], []>} : vector<8x128xbf16>, vector<8x128xbf16>, vector<8x8xf32> -> vector<8x8xf32>
    %c0_9 = arith.constant 0 : index
    %c0_10 = arith.constant 0 : index
    %c0_11 = arith.constant 0 : index
    %11 = vector.load %arg5[%c0_9, %c0_10, %c0_11] : memref<1x1x8xf32, #tpu.memory_space<vmem>>, vector<1x1x8xf32>
    %12 = vector.shape_cast %11 : vector<1x1x8xf32> to vector<1x8xf32>
    %13 = vector.broadcast %12 : vector<1x8xf32> to vector<8x8xf32>
    %14 = arith.addf %10, %13 : vector<8x8xf32>
    %cst_12 = arith.constant dense<0xFF800000> : vector<8xf32>
    %15 = vector.multi_reduction <maximumf>, %14, %cst_12 [1] : vector<8x8xf32> to vector<8xf32>
    %16 = vector.shape_cast %15 : vector<8xf32> to vector<8x1xf32>
    %17 = vector.broadcast %16 : vector<8x1xf32> to vector<8x8xf32>
    %18 = arith.subf %14, %17 : vector<8x8xf32>
    %19 = math.exp %18 : vector<8x8xf32>
    %cst_13 = arith.constant dense<0.000000e+00> : vector<8xf32>
    %20 = vector.multi_reduction <add>, %19, %cst_13 [1] : vector<8x8xf32> to vector<8xf32>
    %21 = vector.shape_cast %20 : vector<8xf32> to vector<8x1xf32>
    %22 = tpu.reciprocal %21 : vector<8x1xf32> -> vector<8x1xf32>
    %23 = vector.broadcast %22 : vector<8x1xf32> to vector<8x8xf32>
    %24 = arith.mulf %19, %23 : vector<8x8xf32>
    %25 = arith.truncf %24 : vector<8x8xf32> to vector<8x8xbf16>
    %cst_14 = arith.constant dense<0.000000e+00> : vector<8x128xf32>
    %26 = tpu.matmul %25, %9, %cst_14 {dimension_numbers = #tpu.dot_dimension_numbers<[1], [0], [0], [1], [0, 0, 1, 1], [], []>} : vector<8x8xbf16>, vector<8x128xbf16>, vector<8x128xf32> -> vector<8x128xf32>
    %27 = arith.truncf %26 : vector<8x128xf32> to vector<8x128xbf16>
    %c0_15 = arith.constant 0 : index
    %c0_16 = arith.constant 0 : index
    %c0_17 = arith.constant 0 : index
    %28 = vector.load %arg6[%c0_15, %c0_16, %c0_17] : memref<1x8x128xbf16, #tpu.memory_space<vmem>>, vector<1x8x128xbf16>
    %29 = vector.shape_cast %28 : vector<1x8x128xbf16> to vector<8x128xbf16>
    %30 = vector.shape_cast %27 : vector<8x128xbf16> to vector<1x8x128xbf16>
    tpu.vector_store %arg6[%c0_15, %c0_16, %c0_17], %30 {strides = array<i32>} : memref<1x8x128xbf16, #tpu.memory_space<vmem>>, vector<1x8x128xbf16>,
    return
  }
  func.func @transform_0(%arg0: i32, %arg1: i32) -> (i32, i32, i32) {
    %c0_i32 = arith.constant 0 : i32
    %c0_i32_0 = arith.constant 0 : i32
    return %arg0, %c0_i32, %arg1 : i32, i32, i32
  }
  func.func @transform_1(%arg0: i32, %arg1: i32) -> (i32, i32, i32) {
    %c2_i32 = arith.constant 2 : i32
    %0 = arith.addi %c2_i32, %arg1 : i32
    %c0_i32 = arith.constant 0 : i32
    %c0_i32_0 = arith.constant 0 : i32
    return %arg0, %c0_i32, %0 : i32, i32, i32
  }
  func.func @transform_2(%arg0: i32, %arg1: i32) -> (i32, i32, i32) {
    %c4_i32 = arith.constant 4 : i32
    %0 = arith.addi %c4_i32, %arg1 : i32
    %c0_i32 = arith.constant 0 : i32
    %c0_i32_0 = arith.constant 0 : i32
    return %arg0, %c0_i32, %0 : i32, i32, i32
  }
  func.func @transform_3(%arg0: i32, %arg1: i32) -> (i32, i32, i32) {
    %c0_i32 = arith.constant 0 : i32
    %c0_i32_0 = arith.constant 0 : i32
    %c0_i32_1 = arith.constant 0 : i32
    return %arg0, %c0_i32, %c0_i32_0 : i32, i32, i32
  }
  func.func @transform_4(%arg0: i32, %arg1: i32) -> (i32, i32, i32) {
    %c0_i32 = arith.constant 0 : i32
    %c0_i32_0 = arith.constant 0 : i32
    return %arg0, %c0_i32, %arg1 : i32, i32, i32
  }
}

module attributes {stable_mosaic.version = 11 : i64} {
  func.func @_linear_add_ln_kernel(%arg0: i32, %arg1: memref<16x256xbf16, #tpu.memory_space<vmem>>, %arg2: memref<256x256xbf16, #tpu.memory_space<vmem>>, %arg3: memref<1x256xf32, #tpu.memory_space<vmem>>, %arg4: memref<16x256xf32, #tpu.memory_space<vmem>>, %arg5: memref<1x256xf32, #tpu.memory_space<vmem>>, %arg6: memref<1x256xf32, #tpu.memory_space<vmem>>, %arg7: memref<16x256xf32, #tpu.memory_space<vmem>>) attributes {dimension_semantics = [#tpu.dimension_semantics<parallel>], iteration_bounds = array<i64: 1>, scalar_prefetch = 0 : i64, scratch_operands = 0 : i64, tpu.core_type = #tpu.core_type<tc>, window_params = [{transform_indices = @transform_0, window_bounds = array<i64: 16, 256>}, {pipeline_mode = #tpu.pipeline_mode<synchronous>, transform_indices = @transform_1, window_bounds = array<i64: 256, 256>}, {pipeline_mode = #tpu.pipeline_mode<synchronous>, transform_indices = @transform_2, window_bounds = array<i64: 1, 256>}, {transform_indices = @transform_3, window_bounds = array<i64: 16, 256>}, {pipeline_mode = #tpu.pipeline_mode<synchronous>, transform_indices = @transform_4, window_bounds = array<i64: 1, 256>}, {pipeline_mode = #tpu.pipeline_mode<synchronous>, transform_indices = @transform_5, window_bounds = array<i64: 1, 256>}, {transform_indices = @transform_6, window_bounds = array<i64: 16, 256>}]} {
    %c0 = arith.constant 0 : index
    %c0_0 = arith.constant 0 : index
    %0 = vector.load %arg1[%c0, %c0_0] : memref<16x256xbf16, #tpu.memory_space<vmem>>, vector<16x256xbf16>
    %c0_1 = arith.constant 0 : index
    %c0_2 = arith.constant 0 : index
    %1 = vector.load %arg2[%c0_1, %c0_2] : memref<256x256xbf16, #tpu.memory_space<vmem>>, vector<256x256xbf16>
    %cst = arith.constant dense<0.000000e+00> : vector<16x256xf32>
    %2 = tpu.matmul %0, %1, %cst {dimension_numbers = #tpu.dot_dimension_numbers<[1], [0], [0], [1], [0, 0, 1, 1], [], []>} : vector<16x256xbf16>, vector<256x256xbf16>, vector<16x256xf32> -> vector<16x256xf32>
    %c0_3 = arith.constant 0 : index
    %c0_4 = arith.constant 0 : index
    %3 = vector.load %arg3[%c0_3, %c0_4] : memref<1x256xf32, #tpu.memory_space<vmem>>, vector<1x256xf32>
    %4 = vector.broadcast %3 : vector<1x256xf32> to vector<16x256xf32>
    %5 = arith.addf %2, %4 : vector<16x256xf32>
    %c0_5 = arith.constant 0 : index
    %c0_6 = arith.constant 0 : index
    %6 = vector.load %arg4[%c0_5, %c0_6] : memref<16x256xf32, #tpu.memory_space<vmem>>, vector<16x256xf32>
    %7 = arith.addf %5, %6 : vector<16x256xf32>
    %cst_7 = arith.constant dense<0.000000e+00> : vector<16xf32>
    %8 = vector.multi_reduction <add>, %7, %cst_7 [1] : vector<16x256xf32> to vector<16xf32>
    %9 = vector.shape_cast %8 : vector<16xf32> to vector<16x1xf32>
    %cst_8 = arith.constant 2.560000e+02 : f32
    %10 = vector.broadcast %cst_8 : f32 to vector<16x1xf32>
    %11 = arith.divf %9, %10 : vector<16x1xf32>
    %12 = vector.broadcast %11 : vector<16x1xf32> to vector<16x256xf32>
    %13 = arith.subf %7, %12 : vector<16x256xf32>
    %14 = arith.mulf %13, %13 : vector<16x256xf32>
    %cst_9 = arith.constant dense<0.000000e+00> : vector<16xf32>
    %15 = vector.multi_reduction <add>, %14, %cst_9 [1] : vector<16x256xf32> to vector<16xf32>
    %16 = vector.shape_cast %15 : vector<16xf32> to vector<16x1xf32>
    %cst_10 = arith.constant 2.560000e+02 : f32
    %17 = vector.broadcast %cst_10 : f32 to vector<16x1xf32>
    %18 = arith.divf %16, %17 : vector<16x1xf32>
    %19 = vector.broadcast %11 : vector<16x1xf32> to vector<16x256xf32>
    %20 = arith.subf %7, %19 : vector<16x256xf32>
    %cst_11 = arith.constant 9.99999996E-13 : f32
    %21 = vector.broadcast %cst_11 : f32 to vector<16x1xf32>
    %22 = arith.addf %18, %21 : vector<16x1xf32>
    %23 = math.rsqrt %22 : vector<16x1xf32>
    %24 = vector.broadcast %23 : vector<16x1xf32> to vector<16x256xf32>
    %25 = arith.mulf %20, %24 : vector<16x256xf32>
    %c0_12 = arith.constant 0 : index
    %c0_13 = arith.constant 0 : index
    %26 = vector.load %arg5[%c0_12, %c0_13] : memref<1x256xf32, #tpu.memory_space<vmem>>, vector<1x256xf32>
    %27 = vector.broadcast %26 : vector<1x256xf32> to vector<16x256xf32>
    %28 = arith.mulf %25, %27 : vector<16x256xf32>
    %c0_14 = arith.constant 0 : index
    %c0_15 = arith.constant 0 : index
    %29 = vector.load %arg6[%c0_14, %c0_15] : memref<1x256xf32, #tpu.memory_space<vmem>>, vector<1x256xf32>
    %30 = vector.broadcast %29 : vector<1x256xf32> to vector<16x256xf32>
    %31 = arith.addf %28, %30 : vector<16x256xf32>
    %c0_16 = arith.constant 0 : index
    %c0_17 = arith.constant 0 : index
    %32 = vector.load %arg7[%c0_16, %c0_17] : memref<16x256xf32, #tpu.memory_space<vmem>>, vector<16x256xf32>
    tpu.vector_store %arg7[%c0_16, %c0_17], %31 {strides = array<i32>} : memref<16x256xf32, #tpu.memory_space<vmem>>, vector<16x256xf32>,
    return
  }
  func.func @transform_0(%arg0: i32) -> (i32, i32) {
    %c0_i32 = arith.constant 0 : i32
    %c0_i32_0 = arith.constant 0 : i32
    return %arg0, %c0_i32 : i32, i32
  }
  func.func @transform_1(%arg0: i32) -> (i32, i32) {
    %c0_i32 = arith.constant 0 : i32
    %c0_i32_0 = arith.constant 0 : i32
    %c0_i32_1 = arith.constant 0 : i32
    return %c0_i32, %c0_i32_0 : i32, i32
  }
  func.func @transform_2(%arg0: i32) -> (i32, i32) {
    %c0_i32 = arith.constant 0 : i32
    %c0_i32_0 = arith.constant 0 : i32
    %c0_i32_1 = arith.constant 0 : i32
    return %c0_i32, %c0_i32_0 : i32, i32
  }
  func.func @transform_3(%arg0: i32) -> (i32, i32) {
    %c0_i32 = arith.constant 0 : i32
    %c0_i32_0 = arith.constant 0 : i32
    return %arg0, %c0_i32 : i32, i32
  }
  func.func @transform_4(%arg0: i32) -> (i32, i32) {
    %c0_i32 = arith.constant 0 : i32
    %c0_i32_0 = arith.constant 0 : i32
    %c0_i32_1 = arith.constant 0 : i32
    return %c0_i32, %c0_i32_0 : i32, i32
  }
  func.func @transform_5(%arg0: i32) -> (i32, i32) {
    %c0_i32 = arith.constant 0 : i32
    %c0_i32_0 = arith.constant 0 : i32
    %c0_i32_1 = arith.constant 0 : i32
    return %c0_i32, %c0_i32_0 : i32, i32
  }
  func.func @transform_6(%arg0: i32) -> (i32, i32) {
    %c0_i32 = arith.constant 0 : i32
    %c0_i32_0 = arith.constant 0 : i32
    return %arg0, %c0_i32 : i32, i32
  }
}

module attributes {stable_mosaic.version = 11 : i64} {
  func.func @_linear_kernel(%arg0: i32, %arg1: memref<16x256xf32, #tpu.memory_space<vmem>>, %arg2: memref<256x768xbf16, #tpu.memory_space<vmem>>, %arg3: memref<1x768xf32, #tpu.memory_space<vmem>>, %arg4: memref<16x768xbf16, #tpu.memory_space<vmem>>) attributes {dimension_semantics = [#tpu.dimension_semantics<parallel>], iteration_bounds = array<i64: 1>, scalar_prefetch = 0 : i64, scratch_operands = 0 : i64, tpu.core_type = #tpu.core_type<tc>, window_params = [{transform_indices = @transform_0, window_bounds = array<i64: 16, 256>}, {pipeline_mode = #tpu.pipeline_mode<synchronous>, transform_indices = @transform_1, window_bounds = array<i64: 256, 768>}, {pipeline_mode = #tpu.pipeline_mode<synchronous>, transform_indices = @transform_2, window_bounds = array<i64: 1, 768>}, {transform_indices = @transform_3, window_bounds = array<i64: 16, 768>}]} {
    %c0 = arith.constant 0 : index
    %c0_0 = arith.constant 0 : index
    %0 = vector.load %arg1[%c0, %c0_0] : memref<16x256xf32, #tpu.memory_space<vmem>>, vector<16x256xf32>
    %1 = arith.truncf %0 : vector<16x256xf32> to vector<16x256xbf16>
    %c0_1 = arith.constant 0 : index
    %c0_2 = arith.constant 0 : index
    %2 = vector.load %arg2[%c0_1, %c0_2] : memref<256x768xbf16, #tpu.memory_space<vmem>>, vector<256x768xbf16>
    %cst = arith.constant dense<0.000000e+00> : vector<16x768xf32>
    %3 = tpu.matmul %1, %2, %cst {dimension_numbers = #tpu.dot_dimension_numbers<[1], [0], [0], [1], [0, 0, 1, 1], [], []>} : vector<16x256xbf16>, vector<256x768xbf16>, vector<16x768xf32> -> vector<16x768xf32>
    %c0_3 = arith.constant 0 : index
    %c0_4 = arith.constant 0 : index
    %4 = vector.load %arg3[%c0_3, %c0_4] : memref<1x768xf32, #tpu.memory_space<vmem>>, vector<1x768xf32>
    %5 = vector.broadcast %4 : vector<1x768xf32> to vector<16x768xf32>
    %6 = arith.addf %3, %5 : vector<16x768xf32>
    %7 = arith.truncf %6 : vector<16x768xf32> to vector<16x768xbf16>
    %c0_5 = arith.constant 0 : index
    %c0_6 = arith.constant 0 : index
    %8 = vector.load %arg4[%c0_5, %c0_6] : memref<16x768xbf16, #tpu.memory_space<vmem>>, vector<16x768xbf16>
    tpu.vector_store %arg4[%c0_5, %c0_6], %7 {strides = array<i32>} : memref<16x768xbf16, #tpu.memory_space<vmem>>, vector<16x768xbf16>,
    return
  }
  func.func @transform_0(%arg0: i32) -> (i32, i32) {
    %c0_i32 = arith.constant 0 : i32
    %c0_i32_0 = arith.constant 0 : i32
    return %arg0, %c0_i32 : i32, i32
  }
  func.func @transform_1(%arg0: i32) -> (i32, i32) {
    %c0_i32 = arith.constant 0 : i32
    %c0_i32_0 = arith.constant 0 : i32
    %c0_i32_1 = arith.constant 0 : i32
    return %c0_i32, %c0_i32_0 : i32, i32
  }
  func.func @transform_2(%arg0: i32) -> (i32, i32) {
    %c0_i32 = arith.constant 0 : i32
    %c0_i32_0 = arith.constant 0 : i32
    %c0_i32_1 = arith.constant 0 : i32
    return %c0_i32, %c0_i32_0 : i32, i32
  }
  func.func @transform_3(%arg0: i32) -> (i32, i32) {
    %c0_i32 = arith.constant 0 : i32
    %c0_i32_0 = arith.constant 0 : i32
    return %arg0, %c0_i32 : i32, i32
  }
}

module attributes {stable_mosaic.version = 11 : i64} {
  func.func @_linear_kernel(%arg0: i32, %arg1: memref<16x256xf32, #tpu.memory_space<vmem>>, %arg2: memref<256x512xbf16, #tpu.memory_space<vmem>>, %arg3: memref<1x512xf32, #tpu.memory_space<vmem>>, %arg4: memref<16x512xbf16, #tpu.memory_space<vmem>>) attributes {dimension_semantics = [#tpu.dimension_semantics<parallel>], iteration_bounds = array<i64: 1>, scalar_prefetch = 0 : i64, scratch_operands = 0 : i64, tpu.core_type = #tpu.core_type<tc>, window_params = [{transform_indices = @transform_0, window_bounds = array<i64: 16, 256>}, {pipeline_mode = #tpu.pipeline_mode<synchronous>, transform_indices = @transform_1, window_bounds = array<i64: 256, 512>}, {pipeline_mode = #tpu.pipeline_mode<synchronous>, transform_indices = @transform_2, window_bounds = array<i64: 1, 512>}, {transform_indices = @transform_3, window_bounds = array<i64: 16, 512>}]} {
    %c0 = arith.constant 0 : index
    %c0_0 = arith.constant 0 : index
    %0 = vector.load %arg1[%c0, %c0_0] : memref<16x256xf32, #tpu.memory_space<vmem>>, vector<16x256xf32>
    %1 = arith.truncf %0 : vector<16x256xf32> to vector<16x256xbf16>
    %c0_1 = arith.constant 0 : index
    %c0_2 = arith.constant 0 : index
    %2 = vector.load %arg2[%c0_1, %c0_2] : memref<256x512xbf16, #tpu.memory_space<vmem>>, vector<256x512xbf16>
    %cst = arith.constant dense<0.000000e+00> : vector<16x512xf32>
    %3 = tpu.matmul %1, %2, %cst {dimension_numbers = #tpu.dot_dimension_numbers<[1], [0], [0], [1], [0, 0, 1, 1], [], []>} : vector<16x256xbf16>, vector<256x512xbf16>, vector<16x512xf32> -> vector<16x512xf32>
    %c0_3 = arith.constant 0 : index
    %c0_4 = arith.constant 0 : index
    %4 = vector.load %arg3[%c0_3, %c0_4] : memref<1x512xf32, #tpu.memory_space<vmem>>, vector<1x512xf32>
    %5 = vector.broadcast %4 : vector<1x512xf32> to vector<16x512xf32>
    %6 = arith.addf %3, %5 : vector<16x512xf32>
    %cst_5 = arith.constant 5.000000e-01 : f32
    %7 = vector.broadcast %cst_5 : f32 to vector<16x512xf32>
    %8 = arith.mulf %7, %6 : vector<16x512xf32>
    %cst_6 = arith.constant 4.471500e-02 : f32
    %9 = vector.broadcast %cst_6 : f32 to vector<16x512xf32>
    %10 = arith.mulf %9, %6 : vector<16x512xf32>
    %11 = arith.mulf %10, %6 : vector<16x512xf32>
    %12 = arith.mulf %11, %6 : vector<16x512xf32>
    %13 = arith.addf %6, %12 : vector<16x512xf32>
    %cst_7 = arith.constant 0.797884583 : f32
    %14 = vector.broadcast %cst_7 : f32 to vector<16x512xf32>
    %15 = arith.mulf %14, %13 : vector<16x512xf32>
    %16 = math.tanh %15 : vector<16x512xf32>
    %cst_8 = arith.constant 1.000000e+00 : f32
    %17 = vector.broadcast %cst_8 : f32 to vector<16x512xf32>
    %18 = arith.addf %17, %16 : vector<16x512xf32>
    %19 = arith.mulf %8, %18 : vector<16x512xf32>
    %20 = arith.truncf %19 : vector<16x512xf32> to vector<16x512xbf16>
    %c0_9 = arith.constant 0 : index
    %c0_10 = arith.constant 0 : index
    %21 = vector.load %arg4[%c0_9, %c0_10] : memref<16x512xbf16, #tpu.memory_space<vmem>>, vector<16x512xbf16>
    tpu.vector_store %arg4[%c0_9, %c0_10], %20 {strides = array<i32>} : memref<16x512xbf16, #tpu.memory_space<vmem>>, vector<16x512xbf16>,
    return
  }
  func.func @transform_0(%arg0: i32) -> (i32, i32) {
    %c0_i32 = arith.constant 0 : i32
    %c0_i32_0 = arith.constant 0 : i32
    return %arg0, %c0_i32 : i32, i32
  }
  func.func @transform_1(%arg0: i32) -> (i32, i32) {
    %c0_i32 = arith.constant 0 : i32
    %c0_i32_0 = arith.constant 0 : i32
    %c0_i32_1 = arith.constant 0 : i32
    return %c0_i32, %c0_i32_0 : i32, i32
  }
  func.func @transform_2(%arg0: i32) -> (i32, i32) {
    %c0_i32 = arith.constant 0 : i32
    %c0_i32_0 = arith.constant 0 : i32
    %c0_i32_1 = arith.constant 0 : i32
    return %c0_i32, %c0_i32_0 : i32, i32
  }
  func.func @transform_3(%arg0: i32) -> (i32, i32) {
    %c0_i32 = arith.constant 0 : i32
    %c0_i32_0 = arith.constant 0 : i32
    return %arg0, %c0_i32 : i32, i32
  }
}

module attributes {stable_mosaic.version = 11 : i64} {
  func.func @_linear_add_ln_kernel(%arg0: i32, %arg1: memref<16x512xbf16, #tpu.memory_space<vmem>>, %arg2: memref<512x256xbf16, #tpu.memory_space<vmem>>, %arg3: memref<1x256xf32, #tpu.memory_space<vmem>>, %arg4: memref<16x256xf32, #tpu.memory_space<vmem>>, %arg5: memref<1x256xf32, #tpu.memory_space<vmem>>, %arg6: memref<1x256xf32, #tpu.memory_space<vmem>>, %arg7: memref<16x256xf32, #tpu.memory_space<vmem>>) attributes {dimension_semantics = [#tpu.dimension_semantics<parallel>], iteration_bounds = array<i64: 1>, scalar_prefetch = 0 : i64, scratch_operands = 0 : i64, tpu.core_type = #tpu.core_type<tc>, window_params = [{transform_indices = @transform_0, window_bounds = array<i64: 16, 512>}, {pipeline_mode = #tpu.pipeline_mode<synchronous>, transform_indices = @transform_1, window_bounds = array<i64: 512, 256>}, {pipeline_mode = #tpu.pipeline_mode<synchronous>, transform_indices = @transform_2, window_bounds = array<i64: 1, 256>}, {transform_indices = @transform_3, window_bounds = array<i64: 16, 256>}, {pipeline_mode = #tpu.pipeline_mode<synchronous>, transform_indices = @transform_4, window_bounds = array<i64: 1, 256>}, {pipeline_mode = #tpu.pipeline_mode<synchronous>, transform_indices = @transform_5, window_bounds = array<i64: 1, 256>}, {transform_indices = @transform_6, window_bounds = array<i64: 16, 256>}]} {
    %c0 = arith.constant 0 : index
    %c0_0 = arith.constant 0 : index
    %0 = vector.load %arg1[%c0, %c0_0] : memref<16x512xbf16, #tpu.memory_space<vmem>>, vector<16x512xbf16>
    %c0_1 = arith.constant 0 : index
    %c0_2 = arith.constant 0 : index
    %1 = vector.load %arg2[%c0_1, %c0_2] : memref<512x256xbf16, #tpu.memory_space<vmem>>, vector<512x256xbf16>
    %cst = arith.constant dense<0.000000e+00> : vector<16x256xf32>
    %2 = tpu.matmul %0, %1, %cst {dimension_numbers = #tpu.dot_dimension_numbers<[1], [0], [0], [1], [0, 0, 1, 1], [], []>} : vector<16x512xbf16>, vector<512x256xbf16>, vector<16x256xf32> -> vector<16x256xf32>
    %c0_3 = arith.constant 0 : index
    %c0_4 = arith.constant 0 : index
    %3 = vector.load %arg3[%c0_3, %c0_4] : memref<1x256xf32, #tpu.memory_space<vmem>>, vector<1x256xf32>
    %4 = vector.broadcast %3 : vector<1x256xf32> to vector<16x256xf32>
    %5 = arith.addf %2, %4 : vector<16x256xf32>
    %c0_5 = arith.constant 0 : index
    %c0_6 = arith.constant 0 : index
    %6 = vector.load %arg4[%c0_5, %c0_6] : memref<16x256xf32, #tpu.memory_space<vmem>>, vector<16x256xf32>
    %7 = arith.addf %5, %6 : vector<16x256xf32>
    %cst_7 = arith.constant dense<0.000000e+00> : vector<16xf32>
    %8 = vector.multi_reduction <add>, %7, %cst_7 [1] : vector<16x256xf32> to vector<16xf32>
    %9 = vector.shape_cast %8 : vector<16xf32> to vector<16x1xf32>
    %cst_8 = arith.constant 2.560000e+02 : f32
    %10 = vector.broadcast %cst_8 : f32 to vector<16x1xf32>
    %11 = arith.divf %9, %10 : vector<16x1xf32>
    %12 = vector.broadcast %11 : vector<16x1xf32> to vector<16x256xf32>
    %13 = arith.subf %7, %12 : vector<16x256xf32>
    %14 = arith.mulf %13, %13 : vector<16x256xf32>
    %cst_9 = arith.constant dense<0.000000e+00> : vector<16xf32>
    %15 = vector.multi_reduction <add>, %14, %cst_9 [1] : vector<16x256xf32> to vector<16xf32>
    %16 = vector.shape_cast %15 : vector<16xf32> to vector<16x1xf32>
    %cst_10 = arith.constant 2.560000e+02 : f32
    %17 = vector.broadcast %cst_10 : f32 to vector<16x1xf32>
    %18 = arith.divf %16, %17 : vector<16x1xf32>
    %19 = vector.broadcast %11 : vector<16x1xf32> to vector<16x256xf32>
    %20 = arith.subf %7, %19 : vector<16x256xf32>
    %cst_11 = arith.constant 9.99999996E-13 : f32
    %21 = vector.broadcast %cst_11 : f32 to vector<16x1xf32>
    %22 = arith.addf %18, %21 : vector<16x1xf32>
    %23 = math.rsqrt %22 : vector<16x1xf32>
    %24 = vector.broadcast %23 : vector<16x1xf32> to vector<16x256xf32>
    %25 = arith.mulf %20, %24 : vector<16x256xf32>
    %c0_12 = arith.constant 0 : index
    %c0_13 = arith.constant 0 : index
    %26 = vector.load %arg5[%c0_12, %c0_13] : memref<1x256xf32, #tpu.memory_space<vmem>>, vector<1x256xf32>
    %27 = vector.broadcast %26 : vector<1x256xf32> to vector<16x256xf32>
    %28 = arith.mulf %25, %27 : vector<16x256xf32>
    %c0_14 = arith.constant 0 : index
    %c0_15 = arith.constant 0 : index
    %29 = vector.load %arg6[%c0_14, %c0_15] : memref<1x256xf32, #tpu.memory_space<vmem>>, vector<1x256xf32>
    %30 = vector.broadcast %29 : vector<1x256xf32> to vector<16x256xf32>
    %31 = arith.addf %28, %30 : vector<16x256xf32>
    %c0_16 = arith.constant 0 : index
    %c0_17 = arith.constant 0 : index
    %32 = vector.load %arg7[%c0_16, %c0_17] : memref<16x256xf32, #tpu.memory_space<vmem>>, vector<16x256xf32>
    tpu.vector_store %arg7[%c0_16, %c0_17], %31 {strides = array<i32>} : memref<16x256xf32, #tpu.memory_space<vmem>>, vector<16x256xf32>,
    return
  }
  func.func @transform_0(%arg0: i32) -> (i32, i32) {
    %c0_i32 = arith.constant 0 : i32
    %c0_i32_0 = arith.constant 0 : i32
    return %arg0, %c0_i32 : i32, i32
  }
  func.func @transform_1(%arg0: i32) -> (i32, i32) {
    %c0_i32 = arith.constant 0 : i32
    %c0_i32_0 = arith.constant 0 : i32
    %c0_i32_1 = arith.constant 0 : i32
    return %c0_i32, %c0_i32_0 : i32, i32
  }
  func.func @transform_2(%arg0: i32) -> (i32, i32) {
    %c0_i32 = arith.constant 0 : i32
    %c0_i32_0 = arith.constant 0 : i32
    %c0_i32_1 = arith.constant 0 : i32
    return %c0_i32, %c0_i32_0 : i32, i32
  }
  func.func @transform_3(%arg0: i32) -> (i32, i32) {
    %c0_i32 = arith.constant 0 : i32
    %c0_i32_0 = arith.constant 0 : i32
    return %arg0, %c0_i32 : i32, i32
  }
  func.func @transform_4(%arg0: i32) -> (i32, i32) {
    %c0_i32 = arith.constant 0 : i32
    %c0_i32_0 = arith.constant 0 : i32
    %c0_i32_1 = arith.constant 0 : i32
    return %c0_i32, %c0_i32_0 : i32, i32
  }
  func.func @transform_5(%arg0: i32) -> (i32, i32) {
    %c0_i32 = arith.constant 0 : i32
    %c0_i32_0 = arith.constant 0 : i32
    %c0_i32_1 = arith.constant 0 : i32
    return %c0_i32, %c0_i32_0 : i32, i32
  }
  func.func @transform_6(%arg0: i32) -> (i32, i32) {
    %c0_i32 = arith.constant 0 : i32
    %c0_i32_0 = arith.constant 0 : i32
    return %arg0, %c0_i32 : i32, i32
  }
}

module attributes {stable_mosaic.version = 11 : i64} {
  func.func @_linear_add_ln_kernel(%arg0: i32, %arg1: memref<16x256xbf16, #tpu.memory_space<vmem>>, %arg2: memref<256x256xbf16, #tpu.memory_space<vmem>>, %arg3: memref<1x256xf32, #tpu.memory_space<vmem>>, %arg4: memref<16x256xf32, #tpu.memory_space<vmem>>, %arg5: memref<1x256xf32, #tpu.memory_space<vmem>>, %arg6: memref<1x256xf32, #tpu.memory_space<vmem>>, %arg7: memref<16x256xf32, #tpu.memory_space<vmem>>) attributes {dimension_semantics = [#tpu.dimension_semantics<parallel>], iteration_bounds = array<i64: 1>, scalar_prefetch = 0 : i64, scratch_operands = 0 : i64, tpu.core_type = #tpu.core_type<tc>, window_params = [{transform_indices = @transform_0, window_bounds = array<i64: 16, 256>}, {pipeline_mode = #tpu.pipeline_mode<synchronous>, transform_indices = @transform_1, window_bounds = array<i64: 256, 256>}, {pipeline_mode = #tpu.pipeline_mode<synchronous>, transform_indices = @transform_2, window_bounds = array<i64: 1, 256>}, {transform_indices = @transform_3, window_bounds = array<i64: 16, 256>}, {pipeline_mode = #tpu.pipeline_mode<synchronous>, transform_indices = @transform_4, window_bounds = array<i64: 1, 256>}, {pipeline_mode = #tpu.pipeline_mode<synchronous>, transform_indices = @transform_5, window_bounds = array<i64: 1, 256>}, {transform_indices = @transform_6, window_bounds = array<i64: 16, 256>}]} {
    %c0 = arith.constant 0 : index
    %c0_0 = arith.constant 0 : index
    %0 = vector.load %arg1[%c0, %c0_0] : memref<16x256xbf16, #tpu.memory_space<vmem>>, vector<16x256xbf16>
    %c0_1 = arith.constant 0 : index
    %c0_2 = arith.constant 0 : index
    %1 = vector.load %arg2[%c0_1, %c0_2] : memref<256x256xbf16, #tpu.memory_space<vmem>>, vector<256x256xbf16>
    %cst = arith.constant dense<0.000000e+00> : vector<16x256xf32>
    %2 = tpu.matmul %0, %1, %cst {dimension_numbers = #tpu.dot_dimension_numbers<[1], [0], [0], [1], [0, 0, 1, 1], [], []>} : vector<16x256xbf16>, vector<256x256xbf16>, vector<16x256xf32> -> vector<16x256xf32>
    %c0_3 = arith.constant 0 : index
    %c0_4 = arith.constant 0 : index
    %3 = vector.load %arg3[%c0_3, %c0_4] : memref<1x256xf32, #tpu.memory_space<vmem>>, vector<1x256xf32>
    %4 = vector.broadcast %3 : vector<1x256xf32> to vector<16x256xf32>
    %5 = arith.addf %2, %4 : vector<16x256xf32>
    %c0_5 = arith.constant 0 : index
    %c0_6 = arith.constant 0 : index
    %6 = vector.load %arg4[%c0_5, %c0_6] : memref<16x256xf32, #tpu.memory_space<vmem>>, vector<16x256xf32>
    %7 = arith.addf %5, %6 : vector<16x256xf32>
    %cst_7 = arith.constant dense<0.000000e+00> : vector<16xf32>
    %8 = vector.multi_reduction <add>, %7, %cst_7 [1] : vector<16x256xf32> to vector<16xf32>
    %9 = vector.shape_cast %8 : vector<16xf32> to vector<16x1xf32>
    %cst_8 = arith.constant 2.560000e+02 : f32
    %10 = vector.broadcast %cst_8 : f32 to vector<16x1xf32>
    %11 = arith.divf %9, %10 : vector<16x1xf32>
    %12 = vector.broadcast %11 : vector<16x1xf32> to vector<16x256xf32>
    %13 = arith.subf %7, %12 : vector<16x256xf32>
    %14 = arith.mulf %13, %13 : vector<16x256xf32>
    %cst_9 = arith.constant dense<0.000000e+00> : vector<16xf32>
    %15 = vector.multi_reduction <add>, %14, %cst_9 [1] : vector<16x256xf32> to vector<16xf32>
    %16 = vector.shape_cast %15 : vector<16xf32> to vector<16x1xf32>
    %cst_10 = arith.constant 2.560000e+02 : f32
    %17 = vector.broadcast %cst_10 : f32 to vector<16x1xf32>
    %18 = arith.divf %16, %17 : vector<16x1xf32>
    %19 = vector.broadcast %11 : vector<16x1xf32> to vector<16x256xf32>
    %20 = arith.subf %7, %19 : vector<16x256xf32>
    %cst_11 = arith.constant 9.99999996E-13 : f32
    %21 = vector.broadcast %cst_11 : f32 to vector<16x1xf32>
    %22 = arith.addf %18, %21 : vector<16x1xf32>
    %23 = math.rsqrt %22 : vector<16x1xf32>
    %24 = vector.broadcast %23 : vector<16x1xf32> to vector<16x256xf32>
    %25 = arith.mulf %20, %24 : vector<16x256xf32>
    %c0_12 = arith.constant 0 : index
    %c0_13 = arith.constant 0 : index
    %26 = vector.load %arg5[%c0_12, %c0_13] : memref<1x256xf32, #tpu.memory_space<vmem>>, vector<1x256xf32>
    %27 = vector.broadcast %26 : vector<1x256xf32> to vector<16x256xf32>
    %28 = arith.mulf %25, %27 : vector<16x256xf32>
    %c0_14 = arith.constant 0 : index
    %c0_15 = arith.constant 0 : index
    %29 = vector.load %arg6[%c0_14, %c0_15] : memref<1x256xf32, #tpu.memory_space<vmem>>, vector<1x256xf32>
    %30 = vector.broadcast %29 : vector<1x256xf32> to vector<16x256xf32>
    %31 = arith.addf %28, %30 : vector<16x256xf32>
    %c0_16 = arith.constant 0 : index
    %c0_17 = arith.constant 0 : index
    %32 = vector.load %arg7[%c0_16, %c0_17] : memref<16x256xf32, #tpu.memory_space<vmem>>, vector<16x256xf32>
    tpu.vector_store %arg7[%c0_16, %c0_17], %31 {strides = array<i32>} : memref<16x256xf32, #tpu.memory_space<vmem>>, vector<16x256xf32>,
    return
  }
  func.func @transform_0(%arg0: i32) -> (i32, i32) {
    %c0_i32 = arith.constant 0 : i32
    %c0_i32_0 = arith.constant 0 : i32
    return %arg0, %c0_i32 : i32, i32
  }
  func.func @transform_1(%arg0: i32) -> (i32, i32) {
    %c0_i32 = arith.constant 0 : i32
    %c0_i32_0 = arith.constant 0 : i32
    %c0_i32_1 = arith.constant 0 : i32
    return %c0_i32, %c0_i32_0 : i32, i32
  }
  func.func @transform_2(%arg0: i32) -> (i32, i32) {
    %c0_i32 = arith.constant 0 : i32
    %c0_i32_0 = arith.constant 0 : i32
    %c0_i32_1 = arith.constant 0 : i32
    return %c0_i32, %c0_i32_0 : i32, i32
  }
  func.func @transform_3(%arg0: i32) -> (i32, i32) {
    %c0_i32 = arith.constant 0 : i32
    %c0_i32_0 = arith.constant 0 : i32
    return %arg0, %c0_i32 : i32, i32
  }
  func.func @transform_4(%arg0: i32) -> (i32, i32) {
    %c0_i32 = arith.constant 0 : i32
    %c0_i32_0 = arith.constant 0 : i32
    %c0_i32_1 = arith.constant 0 : i32
    return %c0_i32, %c0_i32_0 : i32, i32
  }
  func.func @transform_5(%arg0: i32) -> (i32, i32) {
    %c0_i32 = arith.constant 0 : i32
    %c0_i32_0 = arith.constant 0 : i32
    %c0_i32_1 = arith.constant 0 : i32
    return %c0_i32, %c0_i32_0 : i32, i32
  }
  func.func @transform_6(%arg0: i32) -> (i32, i32) {
    %c0_i32 = arith.constant 0 : i32
    %c0_i32_0 = arith.constant 0 : i32
    return %arg0, %c0_i32 : i32, i32
  }
}

module attributes {stable_mosaic.version = 11 : i64} {
  func.func @_lstm_gates_kernel(%arg0: i32, %arg1: i32, %arg2: memref<16x256xf32, #tpu.memory_space<vmem>>, %arg3: memref<1x256x512xbf16, #tpu.memory_space<vmem>>, %arg4: memref<1x1x512xf32, #tpu.memory_space<vmem>>, %arg5: memref<1x16x512xbf16, #tpu.memory_space<vmem>>) attributes {dimension_semantics = [#tpu.dimension_semantics<parallel>, #tpu.dimension_semantics<parallel>], iteration_bounds = array<i64: 2, 1>, scalar_prefetch = 0 : i64, scratch_operands = 0 : i64, tpu.core_type = #tpu.core_type<tc>, window_params = [{transform_indices = @transform_0, window_bounds = array<i64: 16, 256>}, {transform_indices = @transform_1, window_bounds = array<i64: 1, 256, 512>}, {transform_indices = @transform_2, window_bounds = array<i64: 1, 1, 512>}, {transform_indices = @transform_3, window_bounds = array<i64: 1, 16, 512>}]} {
    %c0 = arith.constant 0 : index
    %c0_0 = arith.constant 0 : index
    %0 = vector.load %arg2[%c0, %c0_0] : memref<16x256xf32, #tpu.memory_space<vmem>>, vector<16x256xf32>
    %1 = arith.truncf %0 : vector<16x256xf32> to vector<16x256xbf16>
    %c0_1 = arith.constant 0 : index
    %c0_2 = arith.constant 0 : index
    %c0_3 = arith.constant 0 : index
    %2 = vector.load %arg3[%c0_1, %c0_2, %c0_3] : memref<1x256x512xbf16, #tpu.memory_space<vmem>>, vector<1x256x512xbf16>
    %3 = vector.shape_cast %2 : vector<1x256x512xbf16> to vector<256x512xbf16>
    %cst = arith.constant dense<0.000000e+00> : vector<16x512xf32>
    %4 = tpu.matmul %1, %3, %cst {dimension_numbers = #tpu.dot_dimension_numbers<[1], [0], [0], [1], [0, 0, 1, 1], [], []>} : vector<16x256xbf16>, vector<256x512xbf16>, vector<16x512xf32> -> vector<16x512xf32>
    %c0_4 = arith.constant 0 : index
    %c0_5 = arith.constant 0 : index
    %c0_6 = arith.constant 0 : index
    %5 = vector.load %arg4[%c0_4, %c0_5, %c0_6] : memref<1x1x512xf32, #tpu.memory_space<vmem>>, vector<1x1x512xf32>
    %6 = vector.shape_cast %5 : vector<1x1x512xf32> to vector<1x512xf32>
    %7 = vector.broadcast %6 : vector<1x512xf32> to vector<16x512xf32>
    %8 = arith.addf %4, %7 : vector<16x512xf32>
    %9 = arith.truncf %8 : vector<16x512xf32> to vector<16x512xbf16>
    %c0_7 = arith.constant 0 : index
    %c0_8 = arith.constant 0 : index
    %c0_9 = arith.constant 0 : index
    %10 = vector.load %arg5[%c0_7, %c0_8, %c0_9] : memref<1x16x512xbf16, #tpu.memory_space<vmem>>, vector<1x16x512xbf16>
    %11 = vector.shape_cast %10 : vector<1x16x512xbf16> to vector<16x512xbf16>
    %12 = vector.shape_cast %9 : vector<16x512xbf16> to vector<1x16x512xbf16>
    tpu.vector_store %arg5[%c0_7, %c0_8, %c0_9], %12 {strides = array<i32>} : memref<1x16x512xbf16, #tpu.memory_space<vmem>>, vector<1x16x512xbf16>,
    return
  }
  func.func @transform_0(%arg0: i32, %arg1: i32) -> (i32, i32) {
    %c0_i32 = arith.constant 0 : i32
    %c0_i32_0 = arith.constant 0 : i32
    return %arg1, %c0_i32 : i32, i32
  }
  func.func @transform_1(%arg0: i32, %arg1: i32) -> (i32, i32, i32) {
    %c0_i32 = arith.constant 0 : i32
    %c0_i32_0 = arith.constant 0 : i32
    %c0_i32_1 = arith.constant 0 : i32
    return %arg0, %c0_i32, %c0_i32_0 : i32, i32, i32
  }
  func.func @transform_2(%arg0: i32, %arg1: i32) -> (i32, i32, i32) {
    %c0_i32 = arith.constant 0 : i32
    %c0_i32_0 = arith.constant 0 : i32
    %c0_i32_1 = arith.constant 0 : i32
    return %arg0, %c0_i32, %c0_i32_0 : i32, i32, i32
  }
  func.func @transform_3(%arg0: i32, %arg1: i32) -> (i32, i32, i32) {
    %c0_i32 = arith.constant 0 : i32
    %c0_i32_0 = arith.constant 0 : i32
    return %arg0, %arg1, %c0_i32 : i32, i32, i32
  }
}

module attributes {stable_mosaic.version = 11 : i64} {
  func.func @_bilstm_kernel(%arg0: i32, %arg1: i32, %arg2: memref<1x8x2x512xbf16, #tpu.memory_space<vmem>>, %arg3: memref<1x128x512xbf16, #tpu.memory_space<vmem>>, %arg4: memref<8x2x1xf32, #tpu.memory_space<vmem>>, %arg5: memref<1x8x2x128xbf16, #tpu.memory_space<vmem>>, %arg6: memref<2x128xf32, #tpu.memory_space<vmem>>, %arg7: memref<2x128xf32, #tpu.memory_space<vmem>>) attributes {dimension_semantics = [#tpu.dimension_semantics<parallel>, #tpu.dimension_semantics<arbitrary>], iteration_bounds = array<i64: 2, 1>, scalar_prefetch = 0 : i64, scratch_operands = 2 : i64, tpu.core_type = #tpu.core_type<tc>, window_params = [{transform_indices = @transform_0, window_bounds = array<i64: 1, 8, 2, 512>}, {transform_indices = @transform_1, window_bounds = array<i64: 1, 128, 512>}, {transform_indices = @transform_2, window_bounds = array<i64: 8, 2, 1>}, {transform_indices = @transform_3, window_bounds = array<i64: 1, 8, 2, 128>}]} {
    %c0_i32 = arith.constant 0 : i32
    %0 = arith.cmpi eq, %arg1, %c0_i32 : i32
    %1 = arith.extui %0 : i1 to i32
    %c0_i32_0 = arith.constant 0 : i32
    %2 = arith.cmpi ne, %1, %c0_i32_0 : i32
    scf.if %2 {
      %cst = arith.constant 0.000000e+00 : f32
      %6 = vector.broadcast %cst : f32 to vector<2x128xf32>
      %c0_5 = arith.constant 0 : index
      %c0_6 = arith.constant 0 : index
      %7 = vector.load %arg6[%c0_5, %c0_6] : memref<2x128xf32, #tpu.memory_space<vmem>>, vector<2x128xf32>
      tpu.vector_store %arg6[%c0_5, %c0_6], %6 {strides = array<i32>} : memref<2x128xf32, #tpu.memory_space<vmem>>, vector<2x128xf32>,
      %cst_7 = arith.constant 0.000000e+00 : f32
      %8 = vector.broadcast %cst_7 : f32 to vector<2x128xf32>
      %c0_8 = arith.constant 0 : index
      %c0_9 = arith.constant 0 : index
      %9 = vector.load %arg7[%c0_8, %c0_9] : memref<2x128xf32, #tpu.memory_space<vmem>>, vector<2x128xf32>
      tpu.vector_store %arg7[%c0_8, %c0_9], %8 {strides = array<i32>} : memref<2x128xf32, #tpu.memory_space<vmem>>, vector<2x128xf32>,
    } else {
    }
    %c0 = arith.constant 0 : index
    %c0_1 = arith.constant 0 : index
    %c0_2 = arith.constant 0 : index
    %3 = vector.load %arg3[%c0, %c0_1, %c0_2] : memref<1x128x512xbf16, #tpu.memory_space<vmem>>, vector<1x128x512xbf16>
    %4 = vector.shape_cast %3 : vector<1x128x512xbf16> to vector<128x512xbf16>
    %c0_i32_3 = arith.constant 0 : i32
    %c8_i32 = arith.constant 8 : i32
    %5 = arith.addi %c0_i32_3, %c8_i32 : i32
    %c1_i32 = arith.constant 1 : i32
    scf.for %arg8 = %c0_i32_3 to %5 step %c1_i32  : i32 {
      %c1_i32_5 = arith.constant 1 : i32
      %6 = arith.muli %arg8, %c1_i32_5 : i32
      %c0_i32_6 = arith.constant 0 : i32
      %7 = arith.addi %c0_i32_6, %6 : i32
      %c2_i32 = arith.constant 2 : i32
      %8 = arith.muli %c2_i32, %7 : i32
      %c7_i32 = arith.constant 7 : i32
      %9 = arith.subi %c7_i32, %8 : i32
      %10 = arith.muli %arg0, %9 : i32
      %11 = arith.addi %7, %10 : i32
      %c0_7 = arith.constant 0 : index
      %12 = arith.index_cast %11 : i32 to index
      %c0_8 = arith.constant 0 : index
      %c0_9 = arith.constant 0 : index
      %13 = vector.load %arg2[%c0_7, %12, %c0_8, %c0_9] : memref<1x8x2x512xbf16, #tpu.memory_space<vmem>>, vector<1x1x2x512xbf16>
      %14 = vector.shape_cast %13 : vector<1x1x2x512xbf16> to vector<2x512xbf16>
      %15 = arith.extf %14 : vector<2x512xbf16> to vector<2x512xf32>
      %c0_10 = arith.constant 0 : index
      %c0_11 = arith.constant 0 : index
      %16 = vector.load %arg6[%c0_10, %c0_11] : memref<2x128xf32, #tpu.memory_space<vmem>>, vector<2x128xf32>
      %17 = arith.truncf %16 : vector<2x128xf32> to vector<2x128xbf16>
      %cst = arith.constant dense<0.000000e+00> : vector<2x512xf32>
      %18 = tpu.matmul %17, %4, %cst {dimension_numbers = #tpu.dot_dimension_numbers<[1], [0], [0], [1], [0, 0, 1, 1], [], []>} : vector<2x128xbf16>, vector<128x512xbf16>, vector<2x512xf32> -> vector<2x512xf32>
      %19 = arith.addf %15, %18 : vector<2x512xf32>
      %20 = vector.extract_strided_slice %19 {offsets = [0, 0], sizes = [2, 128], strides = [1, 1]} : vector<2x512xf32> to vector<2x128xf32>
      %21 = arith.negf %20 : vector<2x128xf32>
      %22 = math.exp %21 : vector<2x128xf32>
      %cst_12 = arith.constant 1.000000e+00 : f32
      %23 = vector.broadcast %cst_12 : f32 to vector<2x128xf32>
      %24 = arith.addf %23, %22 : vector<2x128xf32>
      %25 = arith.divf %23, %24 : vector<2x128xf32>
      %26 = vector.extract_strided_slice %19 {offsets = [0, 128], sizes = [2, 128], strides = [1, 1]} : vector<2x512xf32> to vector<2x128xf32>
      %27 = arith.negf %26 : vector<2x128xf32>
      %28 = math.exp %27 : vector<2x128xf32>
      %cst_13 = arith.constant 1.000000e+00 : f32
      %29 = vector.broadcast %cst_13 : f32 to vector<2x128xf32>
      %30 = arith.addf %29, %28 : vector<2x128xf32>
      %31 = arith.divf %29, %30 : vector<2x128xf32>
      %32 = vector.extract_strided_slice %19 {offsets = [0, 256], sizes = [2, 128], strides = [1, 1]} : vector<2x512xf32> to vector<2x128xf32>
      %33 = math.tanh %32 : vector<2x128xf32>
      %34 = vector.extract_strided_slice %19 {offsets = [0, 384], sizes = [2, 128], strides = [1, 1]} : vector<2x512xf32> to vector<2x128xf32>
      %35 = arith.negf %34 : vector<2x128xf32>
      %36 = math.exp %35 : vector<2x128xf32>
      %cst_14 = arith.constant 1.000000e+00 : f32
      %37 = vector.broadcast %cst_14 : f32 to vector<2x128xf32>
      %38 = arith.addf %37, %36 : vector<2x128xf32>
      %39 = arith.divf %37, %38 : vector<2x128xf32>
      %40 = arith.index_cast %11 : i32 to index
      %c0_15 = arith.constant 0 : index
      %c0_16 = arith.constant 0 : index
      %41 = vector.load %arg4[%40, %c0_15, %c0_16] : memref<8x2x1xf32, #tpu.memory_space<vmem>>, vector<1x2x1xf32>
      %42 = vector.shape_cast %41 : vector<1x2x1xf32> to vector<2x1xf32>
      %c0_17 = arith.constant 0 : index
      %c0_18 = arith.constant 0 : index
      %43 = vector.load %arg7[%c0_17, %c0_18] : memref<2x128xf32, #tpu.memory_space<vmem>>, vector<2x128xf32>
      %44 = arith.mulf %31, %43 : vector<2x128xf32>
      %45 = arith.mulf %25, %33 : vector<2x128xf32>
      %46 = arith.addf %44, %45 : vector<2x128xf32>
      %47 = vector.broadcast %42 : vector<2x1xf32> to vector<2x128xf32>
      %48 = arith.mulf %47, %46 : vector<2x128xf32>
      %49 = math.tanh %48 : vector<2x128xf32>
      %50 = arith.mulf %39, %49 : vector<2x128xf32>
      %51 = vector.broadcast %42 : vector<2x1xf32> to vector<2x128xf32>
      %52 = arith.mulf %51, %50 : vector<2x128xf32>
      %c0_19 = arith.constant 0 : index
      %c0_20 = arith.constant 0 : index
      %53 = vector.load %arg7[%c0_19, %c0_20] : memref<2x128xf32, #tpu.memory_space<vmem>>, vector<2x128xf32>
      tpu.vector_store %arg7[%c0_19, %c0_20], %48 {strides = array<i32>} : memref<2x128xf32, #tpu.memory_space<vmem>>, vector<2x128xf32>,
      %c0_21 = arith.constant 0 : index
      %c0_22 = arith.constant 0 : index
      %54 = vector.load %arg6[%c0_21, %c0_22] : memref<2x128xf32, #tpu.memory_space<vmem>>, vector<2x128xf32>
      tpu.vector_store %arg6[%c0_21, %c0_22], %52 {strides = array<i32>} : memref<2x128xf32, #tpu.memory_space<vmem>>, vector<2x128xf32>,
      %55 = arith.truncf %52 : vector<2x128xf32> to vector<2x128xbf16>
      %c0_23 = arith.constant 0 : index
      %56 = arith.index_cast %11 : i32 to index
      %c0_24 = arith.constant 0 : index
      %c0_25 = arith.constant 0 : index
      %57 = vector.load %arg5[%c0_23, %56, %c0_24, %c0_25] : memref<1x8x2x128xbf16, #tpu.memory_space<vmem>>, vector<1x1x2x128xbf16>
      %58 = vector.shape_cast %57 : vector<1x1x2x128xbf16> to vector<2x128xbf16>
      %59 = vector.shape_cast %55 : vector<2x128xbf16> to vector<1x1x2x128xbf16>
      tpu.vector_store %arg5[%c0_23, %56, %c0_24, %c0_25], %59 {strides = array<i32>} : memref<1x8x2x128xbf16, #tpu.memory_space<vmem>>, vector<1x1x2x128xbf16>,
    }
    %c8_i32_4 = arith.constant 8 : i32
    return
  }
  func.func @transform_0(%arg0: i32, %arg1: i32) -> (i32, i32, i32, i32) {
    %c2_i32 = arith.constant 2 : i32
    %0 = arith.muli %c2_i32, %arg1 : i32
    %c0_i32 = arith.constant 0 : i32
    %1 = arith.subi %c0_i32, %0 : i32
    %2 = arith.muli %arg0, %1 : i32
    %3 = arith.addi %arg1, %2 : i32
    %c0_i32_0 = arith.constant 0 : i32
    %c0_i32_1 = arith.constant 0 : i32
    %c0_i32_2 = arith.constant 0 : i32
    return %arg0, %3, %c0_i32_0, %c0_i32_1 : i32, i32, i32, i32
  }
  func.func @transform_1(%arg0: i32, %arg1: i32) -> (i32, i32, i32) {
    %c0_i32 = arith.constant 0 : i32
    %c0_i32_0 = arith.constant 0 : i32
    %c0_i32_1 = arith.constant 0 : i32
    return %arg0, %c0_i32, %c0_i32_0 : i32, i32, i32
  }
  func.func @transform_2(%arg0: i32, %arg1: i32) -> (i32, i32, i32) {
    %c2_i32 = arith.constant 2 : i32
    %0 = arith.muli %c2_i32, %arg1 : i32
    %c0_i32 = arith.constant 0 : i32
    %1 = arith.subi %c0_i32, %0 : i32
    %2 = arith.muli %arg0, %1 : i32
    %3 = arith.addi %arg1, %2 : i32
    %c0_i32_0 = arith.constant 0 : i32
    %c0_i32_1 = arith.constant 0 : i32
    %c0_i32_2 = arith.constant 0 : i32
    return %3, %c0_i32_0, %c0_i32_1 : i32, i32, i32
  }
  func.func @transform_3(%arg0: i32, %arg1: i32) -> (i32, i32, i32, i32) {
    %c2_i32 = arith.constant 2 : i32
    %0 = arith.muli %c2_i32, %arg1 : i32
    %c0_i32 = arith.constant 0 : i32
    %1 = arith.subi %c0_i32, %0 : i32
    %2 = arith.muli %arg0, %1 : i32
    %3 = arith.addi %arg1, %2 : i32
    %c0_i32_0 = arith.constant 0 : i32
    %c0_i32_1 = arith.constant 0 : i32
    %c0_i32_2 = arith.constant 0 : i32
    return %arg0, %3, %c0_i32_0, %c0_i32_1 : i32, i32, i32, i32
  }
}

module attributes {stable_mosaic.version = 11 : i64} {
  func.func @_head_kernel(%arg0: i32, %arg1: memref<2x16x128xbf16, #tpu.memory_space<vmem>>, %arg2: memref<2x128x128xbf16, #tpu.memory_space<vmem>>, %arg3: memref<1x128xf32, #tpu.memory_space<vmem>>, %arg4: memref<16x128xf32, #tpu.memory_space<vmem>>) attributes {dimension_semantics = [#tpu.dimension_semantics<parallel>], iteration_bounds = array<i64: 1>, scalar_prefetch = 0 : i64, scratch_operands = 0 : i64, tpu.core_type = #tpu.core_type<tc>, window_params = [{transform_indices = @transform_0, window_bounds = array<i64: 2, 16, 128>}, {pipeline_mode = #tpu.pipeline_mode<synchronous>, transform_indices = @transform_1, window_bounds = array<i64: 2, 128, 128>}, {pipeline_mode = #tpu.pipeline_mode<synchronous>, transform_indices = @transform_2, window_bounds = array<i64: 1, 128>}, {transform_indices = @transform_3, window_bounds = array<i64: 16, 128>}]} {
    %c0 = arith.constant 0 : index
    %c0_0 = arith.constant 0 : index
    %c0_1 = arith.constant 0 : index
    %0 = vector.load %arg1[%c0, %c0_0, %c0_1] : memref<2x16x128xbf16, #tpu.memory_space<vmem>>, vector<1x16x128xbf16>
    %1 = vector.shape_cast %0 : vector<1x16x128xbf16> to vector<16x128xbf16>
    %c0_2 = arith.constant 0 : index
    %c0_3 = arith.constant 0 : index
    %c0_4 = arith.constant 0 : index
    %2 = vector.load %arg2[%c0_2, %c0_3, %c0_4] : memref<2x128x128xbf16, #tpu.memory_space<vmem>>, vector<1x128x128xbf16>
    %3 = vector.shape_cast %2 : vector<1x128x128xbf16> to vector<128x128xbf16>
    %cst = arith.constant dense<0.000000e+00> : vector<16x128xf32>
    %4 = tpu.matmul %1, %3, %cst {dimension_numbers = #tpu.dot_dimension_numbers<[1], [0], [0], [1], [0, 0, 1, 1], [], []>} : vector<16x128xbf16>, vector<128x128xbf16>, vector<16x128xf32> -> vector<16x128xf32>
    %c1 = arith.constant 1 : index
    %c0_5 = arith.constant 0 : index
    %c0_6 = arith.constant 0 : index
    %5 = vector.load %arg1[%c1, %c0_5, %c0_6] : memref<2x16x128xbf16, #tpu.memory_space<vmem>>, vector<1x16x128xbf16>
    %6 = vector.shape_cast %5 : vector<1x16x128xbf16> to vector<16x128xbf16>
    %c1_7 = arith.constant 1 : index
    %c0_8 = arith.constant 0 : index
    %c0_9 = arith.constant 0 : index
    %7 = vector.load %arg2[%c1_7, %c0_8, %c0_9] : memref<2x128x128xbf16, #tpu.memory_space<vmem>>, vector<1x128x128xbf16>
    %8 = vector.shape_cast %7 : vector<1x128x128xbf16> to vector<128x128xbf16>
    %cst_10 = arith.constant dense<0.000000e+00> : vector<16x128xf32>
    %9 = tpu.matmul %6, %8, %cst_10 {dimension_numbers = #tpu.dot_dimension_numbers<[1], [0], [0], [1], [0, 0, 1, 1], [], []>} : vector<16x128xbf16>, vector<128x128xbf16>, vector<16x128xf32> -> vector<16x128xf32>
    %10 = arith.addf %4, %9 : vector<16x128xf32>
    %c0_11 = arith.constant 0 : index
    %c0_12 = arith.constant 0 : index
    %11 = vector.load %arg3[%c0_11, %c0_12] : memref<1x128xf32, #tpu.memory_space<vmem>>, vector<1x128xf32>
    %12 = vector.broadcast %11 : vector<1x128xf32> to vector<16x128xf32>
    %13 = arith.addf %10, %12 : vector<16x128xf32>
    %c0_13 = arith.constant 0 : index
    %c0_14 = arith.constant 0 : index
    %14 = vector.load %arg4[%c0_13, %c0_14] : memref<16x128xf32, #tpu.memory_space<vmem>>, vector<16x128xf32>
    tpu.vector_store %arg4[%c0_13, %c0_14], %13 {strides = array<i32>} : memref<16x128xf32, #tpu.memory_space<vmem>>, vector<16x128xf32>,
    return
  }
  func.func @transform_0(%arg0: i32) -> (i32, i32, i32) {
    %c0_i32 = arith.constant 0 : i32
    %c0_i32_0 = arith.constant 0 : i32
    %c0_i32_1 = arith.constant 0 : i32
    return %c0_i32, %arg0, %c0_i32_0 : i32, i32, i32
  }
  func.func @transform_1(%arg0: i32) -> (i32, i32, i32) {
    %c0_i32 = arith.constant 0 : i32
    %c0_i32_0 = arith.constant 0 : i32
    %c0_i32_1 = arith.constant 0 : i32
    %c0_i32_2 = arith.constant 0 : i32
    return %c0_i32, %c0_i32_0, %c0_i32_1 : i32, i32, i32
  }
  func.func @transform_2(%arg0: i32) -> (i32, i32) {
    %c0_i32 = arith.constant 0 : i32
    %c0_i32_0 = arith.constant 0 : i32
    %c0_i32_1 = arith.constant 0 : i32
    return %c0_i32, %c0_i32_0 : i32, i32
  }
  func.func @transform_3(%arg0: i32) -> (i32, i32) {
    %c0_i32 = arith.constant 0 : i32
    %c0_i32_0 = arith.constant 0 : i32
    return %arg0, %c0_i32 : i32, i32
  }
}

</mosaic_0001>

<bundles_post_ra>
// kernel: bert_lstm_forward.14
= control target key start
LH: loop header
LB: loop body
LE: loop exit
PB: predicated region body
PF: predicated region fallthrough
CT: control target
= control target key end

     0   :  { %v110_v6 = vmov 256.0   ;;  %s161_s0 = inlined_call_operand.vmem [shape: f32[16,256], index: 0, kind: input, shape index: {}]   ;;  %s162_s1 = inlined_call_operand.vmem [shape: f32[1,256], index: 1, kind: input, shape index: {}]   ;;  %s163_s2 = inlined_call_operand.vmem [shape: f32[1,256], index: 2, kind: input, shape index: {}]   ;;  %s164_s3 = inlined_call_operand.vmem [shape: f32[16,256], index: 3, kind: output, shape index: {}]  }
   0x1   :  { %v14_v0 = vld [vmem:[%s161_s0] sm:$0xff]  ;;  %v15_v1 = vld [vmem:[%s161_s0 + $0x8] sm:$0xff]  ;;  %v16_v3 = vld [vmem:[%s161_s0 + $0x10] sm:$0xff]  ;;  %104 = vrcp.f32 %v110_v6 }
   0x2   :  { %v18_v2 = vadd.f32 %v15_v1, %v14_v0  ;;  %v17_v4 = vld [vmem:[%s161_s0 + $0x18] sm:$0xff]  ;;  %v75_v37 = vld [vmem:[%s162_s1] sm:$0x3] }
   0x3   :  { %v21_v5 = vadd.f32 %v17_v4, %v16_v3  ;;  %v85_v40 = vld [vmem:[%s163_s2] sm:$0x3]  ;;  %v77_v43 = vperm.slane %v75_v37, 0  ;;  %v78_v44 = vperm.slane %v75_v37, 1 }
   0x4   :  { %19 = vadd.xlane.f32.xlu0 %v18_v2  ;;  %v87_v47 = vperm.slane %v85_v40, 0  ;;  %v88_v48 = vperm.slane %v85_v40, 1 }
   0x7   :  { %v105_v7 = vpop.eup %104 }
   0x8   :  { %v25_v8 = vmul.f32 256.0, %v105_v7  ;;  %vm29_vm0 = vweird.f32 %v105_v7 }
   0xa   :  { %v26_v9 = vsub.f32 1.0, %v25_v8 }
   0xc   :  { %22 = vadd.xlane.f32.xlu0 %v21_v5  ;;  %v27_v10 = vmul.f32 %v105_v7, %v26_v9 }
   0xe   :  { %v28_v11 = vadd.f32 %v105_v7, %v27_v10 }
  0x10   :  { %v30_v12 = vsel %vm29_vm0, %v105_v7, %v28_v11 }
  0x77   :  { %v20_v13 = vpop.xlane.xlu0 %19 }
  0x78   :  { %v31_v14 = vmul.f32 %v30_v12, %v20_v13 }
  0x7a   :  { %v33_v15 = vsub.f32 %v14_v0, %v31_v14  ;;  %v34_v16 = vsub.f32 %v15_v1, %v31_v14 }
  0x7c   :  { %v37_v17 = vmul.f32 %v33_v15, %v33_v15  ;;  %v38_v18 = vmul.f32 %v34_v16, %v34_v16 }
  0x7e   :  { %v41_v19 = vadd.f32 %v38_v18, %v37_v17 }
  0x7f   :  { %v23_v20 = vpop.xlane.xlu0 %22 }
  0x80   :  { %v32_v21 = vmul.f32 %v30_v12, %v23_v20  ;;  %42 = vadd.xlane.f32.xlu1 %v41_v19 }
  0x82   :  { %v35_v22 = vsub.f32 %v16_v3, %v32_v21  ;;  %v36_v23 = vsub.f32 %v17_v4, %v32_v21 }
  0x84   :  { %v39_v24 = vmul.f32 %v35_v22, %v35_v22  ;;  %v40_v25 = vmul.f32 %v36_v23, %v36_v23 }
  0x86   :  { %v44_v26 = vadd.f32 %v40_v25, %v39_v24 }
  0x88   :  { %45 = vadd.xlane.f32.xlu1 %v44_v26 }
  0xf3   :  { %v43_v27 = vpop.xlane.xlu1 %42 }
  0xf4   :  { %v47_v28 = vmul.f32 %v43_v27, %v30_v12 }
  0xf6   :  { %v49_v29 = vadd.f32 1e-12, %v47_v28 }
  0xf8   :  { %106 = vrsqrt.f32 %v49_v29  ;;  %vm57_vm2 = vweird.f32 %v49_v29 }
  0xfb   :  { %v46_v30 = vpop.xlane.xlu1 %45 }
  0xfc   :  { %v48_v31 = vmul.f32 %v46_v30, %v30_v12 }
  0xfe   :  { %v107_v32 = vpop.eup %106  ;;  %v50_v33 = vadd.f32 1e-12, %v48_v31 }
  0xff   :  { %v52_v34 = vmul.f32 %v107_v32, %v49_v29  ;;  %vm58_vm1 = vweird.f32 %v107_v32 }
 0x100   :  { %108 = vrsqrt.f32 %v50_v33  ;;  %vm59_vm3 = vmor %vm57_vm2, %vm58_vm1  ;;  %vm67_vm5 = vweird.f32 %v50_v33 }
 0x101   :  { %v53_v35 = vmul.f32 %v107_v32, %v52_v34 }
 0x103   :  { %v54_v36 = vmul.f32 0.5, %v53_v35 }
 0x105   :  { %v55_v38 = vsub.f32 1.5, %v54_v36 }
 0x106   :  { %v109_v39 = vpop.eup %108 }
 0x107   :  { %v56_v41 = vmul.f32 %v107_v32, %v55_v38  ;;  %v62_v42 = vmul.f32 %v109_v39, %v50_v33  ;;  %vm68_vm4 = vweird.f32 %v109_v39 }
 0x108   :  { %vm69_vm6 = vmor %vm67_vm5, %vm68_vm4 }
 0x109   :  { %v60_v45 = vsel %vm59_vm3, %v107_v32, %v56_v41  ;;  %v63_v46 = vmul.f32 %v109_v39, %v62_v42 }
 0x10a   :  { %v71_v49 = vmul.f32 %v60_v45, %v33_v15  ;;  %v72_v50 = vmul.f32 %v60_v45, %v34_v16 }
 0x10b   :  { %v64_v51 = vmul.f32 0.5, %v63_v46 }
 0x10c   :  { %v81_v52 = vmul.f32 %v77_v43, %v71_v49  ;;  %v82_v53 = vmul.f32 %v78_v44, %v72_v50 }
 0x10d   :  { %v65_v54 = vsub.f32 1.5, %v64_v51 }
 0x10e   :  { %v91_v55 = vadd.f32 %v87_v47, %v81_v52  ;;  %v92_v56 = vadd.f32 %v88_v48, %v82_v53 }
 0x10f   :  { %v66_v57 = vmul.f32 %v109_v39, %v65_v54 }
 0x110   :  { %95 = vst [vmem:[%s164_s3] sm:$0xff] %v91_v55 }
 0x111   :  { %96 = vst [vmem:[%s164_s3 + $0x8] sm:$0xff] %v92_v56  ;;  %v70_v58 = vsel %vm69_vm6, %v109_v39, %v66_v57 }
 0x112   :  { %v73_v59 = vmul.f32 %v70_v58, %v35_v22  ;;  %v74_v60 = vmul.f32 %v70_v58, %v36_v23 }
 0x114   :  { %v83_v61 = vmul.f32 %v77_v43, %v73_v59  ;;  %v84_v62 = vmul.f32 %v78_v44, %v74_v60 }
 0x116   :  { %v93_v63 = vadd.f32 %v87_v47, %v83_v61  ;;  %v94_v0 = vadd.f32 %v88_v48, %v84_v62 }
 0x118   :  { %97 = vst [vmem:[%s164_s3 + $0x10] sm:$0xff] %v93_v63 }
 0x119   :  { %98 = vst [vmem:[%s164_s3 + $0x18] sm:$0xff] %v94_v0 }

// kernel: bert_lstm_forward.16
= control target key start
LH: loop header
LB: loop body
LE: loop exit
PB: predicated region body
PF: predicated region fallthrough
CT: control target
= control target key end

     0   :  { %s646_s15 = smov 0   ;;  %s648_s16 = smov 0   ;;  %s727_s0 = inlined_call_operand.vmem [shape: bf16[2,8,768], index: 0, kind: input, shape index: {}, may-alias: {0,1,2}]   ;;  %s728_s1 = inlined_call_operand.vmem [shape: bf16[2,8,768], index: 1, kind: input, shape index: {}, may-alias: {0,1,2}]   ;;  %s729_s2 = inlined_call_operand.vmem [shape: bf16[2,8,768], index: 2, kind: input, shape index: {}, may-alias: {0,1,2}]   ;;  %s730_s3 = inlined_call_operand.vmem [shape: f32[2,1,8], index: 3, kind: input, shape index: {}]   ;;  %s731_s4 = inlined_call_operand.vmem [shape: bf16[2,8,256], index: 4, kind: output, shape index: {}]  }
   0x1   :  { %s650_s17 = smov 0   ;;  %s652_s18 = smov 0  }
   0x2   :  { %s654_s19 = smov 0  }
   0x3 LB: > { %s23_s20 = sadd.s32 1, %s611_s17  ;;  %s26_s21 = sadd.s32 1, %s615_s18  ;;  %s619_s19 = sphi %s654_s19, %s14_s19   ;;  %s615_s18 = sphi %s652_s18, %s735_s18   ;;  %s611_s17 = sphi %s650_s17, %s734_s17   ;;  %s607_s16 = sphi %s648_s16, %s733_s16   ;;  %s603_s15 = sphi %s646_s15, %s732_s15  }
   0x4   : > { %p24_p0 = scmp.ge.s32.totalorder %s23_s20, 2  ;;  %p526_p1 = scmp.ge.s32.totalorder %s619_s19, 1 }
   0x5   : > { %p227_p2 = scmp.lt.s32.totalorder %s619_s19, 5 }
   0x6   : > { %s737_s20 = smov (%p24_p0, %s23_s20), 0  ;;  %s739_s21 = smov (!%p24_p0, %s26_s21), %s615_s18 }
   0x7   : > { %p228_p3 = pnand %p526_p1, %p227_p2  ;;  %p28_p4 = scmp.ge.s32.totalorder %s739_s21, 2 }
   0x8   : > { %p280_p5 = scmp.lt.s32.totalorder (!%p228_p3), %s607_s16, 1  ;;  %s288_s22 = sadd.s32 (!%p228_p3), 2, %s603_s15 }
   0x9   : > { %s741_s21 = smov (%p28_p4, %s739_s21), 0  ;;  %231 = sbr.rel (%p228_p3) target bundleno = 556 (0x22c), region = 36 }
   0xa   : > { %p291_p6 = scmp.lt.s32.totalorder (!%p228_p3), %s288_s22, 5  ;;  %p282_p7 = scmp.lt.s32.totalorder (!%p228_p3), %s603_s15, 5 }
   0xb   : > { %s298_s12 = sadd.s32 (!%p228_p3), 4, %s603_s15  ;;  %p313_p9 = scmp.lt.s32.totalorder (!%p228_p3), %s603_s15, 1 }
   0xc   : > { %p301_p8 = scmp.lt.s32.totalorder (!%p228_p3), %s298_s12, 5 }
   0xe   : > { %s743_s16 = smov (!%p280_p5, %s607_s16), 1  ;;  %s745_s22 = smov (!%p291_p6, %s288_s22), 5  ;;  %vm343_vm0 = vcmask 64512   ;;  %vm372_vm1 = vcmask 1043456  }
   0xf   : > { %s683_s23 = smul.u32 6, %s743_s16  ;;  %s310_s26 = scalar_lea.vmem %s730_s3, %s743_s16 }
  0x10   : > { %s283_s27 = scalar_select %p282_p7, %s603_s15, 5  ;;  %v576_v5 = vld [vmem:[%s310_s26] ss:$0 sm:$0xff] }
  0x11   : > { %s294_s28 = sadd.s32 %s683_s23, %s745_s22  ;;  %s747_s12 = smov (!%p301_p8, %s298_s12), 5 }
  0x12   : > { %s528_s29 = sshll.u32 %s294_s28, 2  ;;  %s285_s30 = sadd.s32 %s683_s23, %s283_s27 }
  0x13   : > { %s296_s7 = scalar_lea.vmem %s728_s1, %s528_s29  ;;  %s527_s8 = sshll.u32 %s285_s30, 2 }
  0x14   : > { %v324_v0 = vld [vmem:[%s296_s7] sm:$0xf]  ;;  %s287_s11 = scalar_lea.vmem %s727_s0, %s527_s8  ;;  %s304_s13 = sadd.s32 %s683_s23, %s747_s12 }
  0x15   : > { %337 = vmatpush.bf16.xpose.msra.mxu0 %v324_v0  ;;  %v320_v1 = vld [vmem:[%s287_s11] sm:$0xf]  ;;  %s529_s14 = sshll.u32 %s304_s13, 2  ;;  %s749_s15 = smov (!%p313_p9, %s603_s15), 1 }
  0x16   : > { %v321_v2 = vunpack.c.l.bf16 %v320_v1  ;;  %s306_s25 = scalar_lea.vmem %s729_s2, %s529_s14  ;;  %s530_s23 = sshll.u32 %s743_s16, 1 }
  0x17   : > { %v325_v15 = vld [vmem:[%s306_s25] sm:$0xf]  ;;  %s316_s26 = sadd.s32 %s530_s23, %s749_s15 }
  0x18   : > { %v322_v3 = vmul.f32 0.088388346, %v321_v2  ;;  %v374_v16 = vsel %vm372_vm1, %v325_v15, 0  ;;  %s531_s27 = sshll.u32 %s316_s26, 2 }
  0x19   : > { %383 = vmatpush.bf16.msra.mxu1 %v374_v16  ;;  %s318_s30 = scalar_lea.vmem %s731_s4, %s531_s27 }
  0x1a   : > { %v323_v4 = vpack.c.bf16 %v322_v3, %v322_v3 }
  0x1c   : > { %338 = vmatmul.bf16.vlgmr.msra.gmra.mxu0 %v323_v4 }
  0x99   : > { %v339_v6 = vpop.f32.mrf.mxu0 }
  0x9a   : > { %v340_v7 = vadd.f32 %v576_v5, %v339_v6 }
  0x9c   : > { %v344_v8 = vsel %vm343_vm0, %v340_v7, -inf }
  0x9d   : > { %345 = vmax.xlane.f32.xlu0 %v344_v8 }
  0xa1   : > { %v341_v9 = vpop.f32.mrf.mxu0 }
 0x110   : > { %v346_v10 = vpop.xlane.xlu0 %345 }
 0x111   : > { %v347_v11 = vsub.f32 %v340_v7, %v346_v10 }
 0x113   : > { %v348_v12 = vmul.f32 1.442695, %v347_v11 }
 0x115   : > { %577 = vpow2.f32 %v348_v12 }
 0x11b   : > { %v578_v13 = vpop.eup %577 }
 0x11c   : > { %v350_v14 = vsel %vm343_vm0, %v578_v13, 0.0 }
 0x11d   : > { %351 = vadd.xlane.f32.xlu0 %v350_v14 }
 0x190   : > { %v352_v17 = vpop.xlane.xlu0 %351 }
 0x191   : > { %579 = vrcp.f32 %v352_v17  ;;  %v364_v21 = vand.u32 2147483648, %v352_v17  ;;  %v362_v23 = vand.u32 2147483647, %v352_v17  ;;  %vm358_vm3 = vweird.f32 %v352_v17 }
 0x193   : > { %v365_v25 = vor.u32 1.1754944e-38, %v364_v21  ;;  %vm363_vm5 = vcmp.eq.f32.partialorder %v362_v23, 8.507059e+37 }
 0x197   : > { %v580_v18 = vpop.eup %579 }
 0x198   : > { %v354_v19 = vmul.f32 %v580_v18, %v352_v17  ;;  %vm359_vm2 = vweird.f32 %v580_v18 }
 0x199   : > { %vm360_vm4 = vmor %vm358_vm3, %vm359_vm2 }
 0x19a   : > { %v355_v20 = vsub.f32 1.0, %v354_v19 }
 0x19c   : > { %v356_v22 = vmul.f32 %v580_v18, %v355_v20 }
 0x19e   : > { %v357_v24 = vadd.f32 %v580_v18, %v356_v22 }
 0x1a0   : > { %v361_v26 = vsel %vm360_vm4, %v580_v18, %v357_v24 }
 0x1a1   : > { %v366_v27 = vsel %vm363_vm5, %v365_v25, %v361_v26 }
 0x1a2   : > { %v367_v28 = vmul.f32 %v578_v13, %v366_v27 }
 0x1a4   : > { %v368_v29 = vpack.c.bf16 %v367_v28, %v367_v28 }
 0x1a6   : > { %532 = vmatmul.msk.bf16.vlgmr.msra.gmra.mxu1 %vm343_vm0, %v368_v29 }
 0x223   : > { %v385_v30 = vpop.f32.mrf.mxu1 }
 0x224   : > { %v389_v31 = vpack.c.bf16 %v385_v30, %v385_v30 }
 0x226   : > { %390 = vst [vmem:[%s318_s30] sm:$0xf] %v389_v31 }
 0x22b   : > { %v387_v32 = vpop.f32.mrf.mxu1 }
 0x22c PF: > { %s14_s19 = sadd.s32 1, %s619_s19   ;;  %s732_s15 = smov %s611_s17 }
 0x22d   : > { %p11_p10 = scmp.ge.s32.totalorder %s14_s19, 6   ;;  %s733_s16 = smov %s615_s18 }
 0x22e   : > { %s734_s17 = smov %s737_s20  ;;  %s735_s18 = smov %s741_s21 }
 0x22f   :  { %13 = sbr.rel (!%p11_p10) target bundleno = 3 (0x3), region = 75 }

// kernel: bert_lstm_forward.17
= control target key start
LH: loop header
LB: loop body
LE: loop exit
PB: predicated region body
PF: predicated region fallthrough
CT: control target
= control target key end

     0   :  { %s832_s1 = inlined_call_operand.vmem [shape: bf16[256,256], index: 1, kind: input, shape index: {}]   ;;  %s833_s0 = inlined_call_operand.vmem [shape: bf16[16,256], index: 0, kind: input, shape index: {}]   ;;  %s834_s2 = inlined_call_operand.vmem [shape: f32[1,256], index: 2, kind: input, shape index: {}]   ;;  %s835_s3 = inlined_call_operand.vmem [shape: f32[16,256], index: 3, kind: input, shape index: {}]   ;;  %s836_s4 = inlined_call_operand.vmem [shape: f32[1,256], index: 4, kind: input, shape index: {}]   ;;  %s837_s5 = inlined_call_operand.vmem [shape: f32[1,256], index: 5, kind: input, shape index: {}]   ;;  %s838_s6 = inlined_call_operand.vmem [shape: f32[16,256], index: 6, kind: output, shape index: {}]  }
   0x1   :  { %v448_v0 = vld [vmem:[%s832_s1 + $0x70] sm:$0xf]  ;;  %v535_v1 = vld [vmem:[%s832_s1 + $0x74] sm:$0xf0]  ;;  %v534_v5 = vld [vmem:[%s832_s1 + $0x74] sm:$0xf] }
   0x2   :  { %v512_v2 = vld [vmem:[%s832_s1 + $0xf0] sm:$0xf]  ;;  %v449_v3 = vor.u32 %v535_v1, %v448_v0  ;;  %v551_v4 = vld [vmem:[%s832_s1 + $0xf4] sm:$0xf0]  ;;  %v450_v6 = vld [vmem:[%s832_s1 + $0x78] sm:$0xf0] }
   0x3   :  { %v513_v7 = vor.u32 %v551_v4, %v512_v2  ;;  %v453_v8 = vor.u32 %v534_v5, %v450_v6  ;;  %v550_v9 = vld [vmem:[%s832_s1 + $0xf4] sm:$0xf]  ;;  %v514_v10 = vld [vmem:[%s832_s1 + $0xf8] sm:$0xf0]  ;;  %v440_v11 = vld [vmem:[%s832_s1 + $0x60] sm:$0xf] }
   0x4   :  { %233 = vmatpush.bf16.msra.mxu0 %v449_v3  ;;  %v517_v12 = vor.u32 %v550_v9, %v514_v10  ;;  %v533_v13 = vld [vmem:[%s832_s1 + $0x64] sm:$0xf0]  ;;  %v504_v14 = vld [vmem:[%s832_s1 + $0xe0] sm:$0xf]  ;;  %v532_v18 = vld [vmem:[%s832_s1 + $0x64] sm:$0xf] }
   0x5   :  { %v549_v15 = vld [vmem:[%s832_s1 + $0xe4] sm:$0xf0]  ;;  %247 = vmatpush.bf16.msra.mxu1 %v513_v7  ;;  %261 = vmatpush.bf16.msra.mxu2 %v453_v8  ;;  %v441_v16 = vor.u32 %v533_v13, %v440_v11  ;;  %v442_v19 = vld [vmem:[%s832_s1 + $0x68] sm:$0xf0]  ;;  %v548_v20 = vld [vmem:[%s832_s1 + $0xe4] sm:$0xf] }
   0x6   :  { %v505_v17 = vor.u32 %v549_v15, %v504_v14  ;;  %275 = vmatpush.bf16.msra.mxu3 %v517_v12  ;;  %v445_v21 = vor.u32 %v532_v18, %v442_v19  ;;  %v506_v22 = vld [vmem:[%s832_s1 + $0xe8] sm:$0xf0]  ;;  %v432_v23 = vld [vmem:[%s832_s1 + $0x50] sm:$0xf]  ;;  %v531_v24 = vld [vmem:[%s832_s1 + $0x54] sm:$0xf0] }
   0x7   :  { %v509_v25 = vor.u32 %v548_v20, %v506_v22  ;;  %v496_v26 = vld [vmem:[%s832_s1 + $0xd0] sm:$0xf]  ;;  %v547_v27 = vld [vmem:[%s832_s1 + $0xd4] sm:$0xf0]  ;;  %v530_v28 = vld [vmem:[%s832_s1 + $0x54] sm:$0xf]  ;;  %v433_v29 = vor.u32 %v531_v24, %v432_v23 }
   0x8   :  { %234 = vmatpush.bf16.msra.mxu0 %v441_v16  ;;  %v434_v30 = vld [vmem:[%s832_s1 + $0x58] sm:$0xf0]  ;;  %v546_v31 = vld [vmem:[%s832_s1 + $0xd4] sm:$0xf]  ;;  %v497_v33 = vor.u32 %v547_v27, %v496_v26  ;;  %v424_v35 = vld [vmem:[%s832_s1 + $0x40] sm:$0xf] }
   0x9   :  { %v498_v32 = vld [vmem:[%s832_s1 + $0xd8] sm:$0xf0]  ;;  %248 = vmatpush.bf16.msra.mxu1 %v505_v17  ;;  %262 = vmatpush.bf16.msra.mxu2 %v445_v21  ;;  %v437_v34 = vor.u32 %v530_v28, %v434_v30  ;;  %v529_v36 = vld [vmem:[%s832_s1 + $0x44] sm:$0xf0]  ;;  %v488_v37 = vld [vmem:[%s832_s1 + $0xc0] sm:$0xf] }
   0xa   :  { %276 = vmatpush.bf16.msra.mxu3 %v509_v25  ;;  %v501_v38 = vor.u32 %v546_v31, %v498_v32  ;;  %v545_v39 = vld [vmem:[%s832_s1 + $0xc4] sm:$0xf0]  ;;  %v528_v40 = vld [vmem:[%s832_s1 + $0x44] sm:$0xf]  ;;  %v426_v41 = vld [vmem:[%s832_s1 + $0x48] sm:$0xf0]  ;;  %v425_v44 = vor.u32 %v529_v36, %v424_v35 }
   0xb   :  { %v544_v42 = vld [vmem:[%s832_s1 + $0xc4] sm:$0xf]  ;;  %v490_v43 = vld [vmem:[%s832_s1 + $0xc8] sm:$0xf0]  ;;  %v489_v45 = vor.u32 %v545_v39, %v488_v37  ;;  %v429_v46 = vor.u32 %v528_v40, %v426_v41  ;;  %v416_v47 = vld [vmem:[%s832_s1 + $0x30] sm:$0xf] }
   0xc   :  { %235 = vmatpush.bf16.msra.mxu0 %v433_v29  ;;  %v527_v48 = vld [vmem:[%s832_s1 + $0x34] sm:$0xf0]  ;;  %v480_v49 = vld [vmem:[%s832_s1 + $0xb0] sm:$0xf]  ;;  %v493_v50 = vor.u32 %v544_v42, %v490_v43  ;;  %v526_v52 = vld [vmem:[%s832_s1 + $0x34] sm:$0xf] }
   0xd   :  { %249 = vmatpush.bf16.msra.mxu1 %v497_v33  ;;  %263 = vmatpush.bf16.msra.mxu2 %v437_v34  ;;  %v543_v51 = vld [vmem:[%s832_s1 + $0xb4] sm:$0xf0]  ;;  %v418_v53 = vld [vmem:[%s832_s1 + $0x38] sm:$0xf0]  ;;  %v542_v54 = vld [vmem:[%s832_s1 + $0xb4] sm:$0xf]  ;;  %v417_v56 = vor.u32 %v527_v48, %v416_v47 }
   0xe   :  { %277 = vmatpush.bf16.msra.mxu3 %v501_v38  ;;  %v482_v55 = vld [vmem:[%s832_s1 + $0xb8] sm:$0xf0]  ;;  %v481_v57 = vor.u32 %v543_v51, %v480_v49  ;;  %v421_v58 = vor.u32 %v526_v52, %v418_v53  ;;  %v408_v59 = vld [vmem:[%s832_s1 + $0x20] sm:$0xf]  ;;  %v525_v60 = vld [vmem:[%s832_s1 + $0x24] sm:$0xf0] }
   0xf   :  { %v472_v61 = vld [vmem:[%s832_s1 + $0xa0] sm:$0xf]  ;;  %v485_v62 = vor.u32 %v542_v54, %v482_v55  ;;  %v541_v63 = vld [vmem:[%s832_s1 + $0xa4] sm:$0xf0]  ;;  %v524_v0 = vld [vmem:[%s832_s1 + $0x24] sm:$0xf]  ;;  %v409_v4 = vor.u32 %v525_v60, %v408_v59 }
  0x10   :  { %236 = vmatpush.bf16.msra.mxu0 %v425_v44  ;;  %v410_v1 = vld [vmem:[%s832_s1 + $0x28] sm:$0xf0]  ;;  %v540_v2 = vld [vmem:[%s832_s1 + $0xa4] sm:$0xf]  ;;  %v473_v5 = vor.u32 %v541_v63, %v472_v61  ;;  %v400_v7 = vld [vmem:[%s832_s1 + $0x10] sm:$0xf] }
  0x11   :  { %250 = vmatpush.bf16.msra.mxu1 %v489_v45  ;;  %264 = vmatpush.bf16.msra.mxu2 %v429_v46  ;;  %v474_v3 = vld [vmem:[%s832_s1 + $0xa8] sm:$0xf0]  ;;  %v413_v6 = vor.u32 %v524_v0, %v410_v1  ;;  %v523_v8 = vld [vmem:[%s832_s1 + $0x14] sm:$0xf0]  ;;  %v464_v9 = vld [vmem:[%s832_s1 + $0x90] sm:$0xf] }
  0x12   :  { %278 = vmatpush.bf16.msra.mxu3 %v493_v50  ;;  %v477_v10 = vor.u32 %v540_v2, %v474_v3  ;;  %v539_v11 = vld [vmem:[%s832_s1 + $0x94] sm:$0xf0]  ;;  %v522_v12 = vld [vmem:[%s832_s1 + $0x14] sm:$0xf]  ;;  %v402_v13 = vld [vmem:[%s832_s1 + $0x18] sm:$0xf0]  ;;  %v401_v16 = vor.u32 %v523_v8, %v400_v7 }
  0x13   :  { %v538_v14 = vld [vmem:[%s832_s1 + $0x94] sm:$0xf]  ;;  %v466_v15 = vld [vmem:[%s832_s1 + $0x98] sm:$0xf0]  ;;  %v465_v17 = vor.u32 %v539_v11, %v464_v9  ;;  %v405_v18 = vor.u32 %v522_v12, %v402_v13  ;;  %v392_v19 = vld [vmem:[%s832_s1] sm:$0xf] }
  0x14   :  { %237 = vmatpush.bf16.msra.mxu0 %v417_v56  ;;  %v521_v20 = vld [vmem:[%s832_s1 + $0x4] sm:$0xf0]  ;;  %v456_v21 = vld [vmem:[%s832_s1 + $0x80] sm:$0xf]  ;;  %v469_v22 = vor.u32 %v538_v14, %v466_v15  ;;  %v520_v24 = vld [vmem:[%s832_s1 + $0x4] sm:$0xf] }
  0x15   :  { %251 = vmatpush.bf16.msra.mxu1 %v481_v57  ;;  %265 = vmatpush.bf16.msra.mxu2 %v421_v58  ;;  %v537_v23 = vld [vmem:[%s832_s1 + $0x84] sm:$0xf0]  ;;  %v394_v25 = vld [vmem:[%s832_s1 + $0x8] sm:$0xf0]  ;;  %v536_v26 = vld [vmem:[%s832_s1 + $0x84] sm:$0xf]  ;;  %v393_v28 = vor.u32 %v521_v20, %v392_v19 }
  0x16   :  { %279 = vmatpush.bf16.msra.mxu3 %v485_v62  ;;  %v458_v27 = vld [vmem:[%s832_s1 + $0x88] sm:$0xf0]  ;;  %v384_v29 = vld [vmem:[%s833_s0] sm:$0xf]  ;;  %v519_v30 = vld [vmem:[%s833_s0 + $0x4] sm:$0xf0]  ;;  %v457_v31 = vor.u32 %v537_v23, %v456_v21  ;;  %v397_v32 = vor.u32 %v520_v24, %v394_v25 }
  0x17   :  { %v518_v33 = vld [vmem:[%s833_s0 + $0x4] sm:$0xf]  ;;  %v386_v34 = vld [vmem:[%s833_s0 + $0x8] sm:$0xf0]  ;;  %v461_v35 = vor.u32 %v536_v26, %v458_v27  ;;  %v385_v36 = vor.u32 %v519_v30, %v384_v29  ;;  %v57_v38 = vld [vmem:[%s834_s2] sm:$0x3] }
  0x18   :  { %238 = vmatpush.bf16.msra.mxu0 %v409_v4  ;;  %v389_v37 = vor.u32 %v518_v33, %v386_v34  ;;  %v59_v39 = vperm.slane %v57_v38, 0  ;;  %v60_v42 = vperm.slane %v57_v38, 1  ;;  %v289_v46 = vld [vmem:[%s835_s3] sm:$0xff]  ;;  %v290_v50 = vld [vmem:[%s835_s3 + $0x8] sm:$0xff]  ;;  %v291_v60 = vld [vmem:[%s835_s3 + $0x10] sm:$0xff]  ;;  %v559_v3 = vmov 256.0  }
  0x19   :  { %252 = vmatpush.bf16.msra.mxu1 %v473_v5  ;;  %266 = vmatpush.bf16.msra.mxu2 %v413_v6  ;;  %v292_v62 = vld [vmem:[%s835_s3 + $0x18] sm:$0xff]  ;;  %553 = vrcp.f32 %v559_v3  ;;  %v354_v34 = vld [vmem:[%s836_s4] sm:$0x3] }
  0x1a   :  { %280 = vmatpush.bf16.msra.mxu3 %v477_v10 }
  0x1c   :  { %239 = vmatpush.bf16.msra.mxu0 %v401_v16 }
  0x1d   :  { %253 = vmatpush.bf16.msra.mxu1 %v465_v17  ;;  %267 = vmatpush.bf16.msra.mxu2 %v405_v18 }
  0x1e   :  { %281 = vmatpush.bf16.msra.mxu3 %v469_v22 }
  0x1f   :  { %v554_v4 = vpop.eup %553 }
  0x20   :  { %240 = vmatpush.bf16.msra.mxu0 %v393_v28  ;;  %v304_v5 = vmul.f32 256.0, %v554_v4  ;;  %vm308_vm0 = vweird.f32 %v554_v4 }
  0x21   :  { %254 = vmatpush.bf16.msra.mxu1 %v457_v31  ;;  %268 = vmatpush.bf16.msra.mxu2 %v397_v32 }
  0x22   :  { %282 = vmatpush.bf16.msra.mxu3 %v461_v35  ;;  %v305_v6 = vsub.f32 1.0, %v304_v5 }
  0x23   :  { %241 = vmatmul.bf16.vlgmr.msra.gmra.mxu0 %v385_v36 }
  0x24   :  { %255 = vmatmul.bf16.vlgmr.msra.gmra.mxu1 %v389_v37  ;;  %269 = vmatmul.bf16.vlgmr.msra.gmra.mxu2 %v385_v36  ;;  %v306_v7 = vmul.f32 %v554_v4, %v305_v6 }
  0x25   :  { %283 = vmatmul.bf16.vlgmr.msra.gmra.mxu3 %v389_v37  ;;  %v364_v37 = vld [vmem:[%s837_s5] sm:$0x3] }
  0x26   :  { %v307_v8 = vadd.f32 %v554_v4, %v306_v7 }
  0x28   :  { %v309_v9 = vsel %vm308_vm0, %v554_v4, %v307_v8 }
  0xa0   :  { %v242_v40 = vpop.f32.mrf.mxu0 }
  0xa1   :  { %v243_v41 = vadd.f32 %v242_v40, %v59_v39  ;;  %v256_v43 = vpop.f32.mrf.mxu1  ;;  %v356_v40 = vperm.slane %v354_v34, 0 }
  0xa3   :  { %v257_v44 = vadd.f32 %v256_v43, %v243_v41  ;;  %v357_v41 = vperm.slane %v354_v34, 1 }
  0xa5   :  { %v293_v52 = vadd.f32 %v289_v46, %v257_v44  ;;  %v366_v44 = vperm.slane %v364_v37, 0 }
  0xa7   :  { %v270_v45 = vpop.f32.mrf.mxu2 }
  0xa8   :  { %v271_v47 = vadd.f32 %v270_v45, %v60_v42  ;;  %v284_v48 = vpop.f32.mrf.mxu3  ;;  %v244_v49 = vpop.f32.mrf.mxu0  ;;  %v367_v45 = vperm.slane %v364_v37, 1 }
  0xa9   :  { %v245_v53 = vadd.f32 %v244_v49, %v59_v39  ;;  %v258_v56 = vpop.f32.mrf.mxu1 }
  0xaa   :  { %v285_v51 = vadd.f32 %v284_v48, %v271_v47 }
  0xab   :  { %v259_v58 = vadd.f32 %v258_v56, %v245_v53 }
  0xac   :  { %v294_v54 = vadd.f32 %v290_v50, %v285_v51 }
  0xad   :  { %v295_v0 = vadd.f32 %v291_v60, %v259_v58 }
  0xae   :  { %v297_v55 = vadd.f32 %v294_v54, %v293_v52 }
  0xaf   :  { %v272_v57 = vpop.f32.mrf.mxu2 }
  0xb0   :  { %v273_v59 = vadd.f32 %v272_v57, %v60_v42  ;;  %298 = vadd.xlane.f32.xlu0 %v297_v55  ;;  %v286_v61 = vpop.f32.mrf.mxu3 }
  0xb2   :  { %v287_v63 = vadd.f32 %v286_v61, %v273_v59 }
  0xb4   :  { %v296_v1 = vadd.f32 %v292_v62, %v287_v63 }
  0xb6   :  { %v300_v2 = vadd.f32 %v296_v1, %v295_v0 }
  0xb8   :  { %301 = vadd.xlane.f32.xlu0 %v300_v2 }
 0x123   :  { %v299_v10 = vpop.xlane.xlu0 %298 }
 0x124   :  { %v310_v11 = vmul.f32 %v309_v9, %v299_v10 }
 0x126   :  { %v312_v12 = vsub.f32 %v293_v52, %v310_v11  ;;  %v313_v13 = vsub.f32 %v294_v54, %v310_v11 }
 0x128   :  { %v316_v14 = vmul.f32 %v312_v12, %v312_v12  ;;  %v317_v15 = vmul.f32 %v313_v13, %v313_v13 }
 0x12a   :  { %v320_v16 = vadd.f32 %v317_v15, %v316_v14 }
 0x12b   :  { %v302_v17 = vpop.xlane.xlu0 %301 }
 0x12c   :  { %v311_v18 = vmul.f32 %v309_v9, %v302_v17  ;;  %321 = vadd.xlane.f32.xlu1 %v320_v16 }
 0x12e   :  { %v314_v19 = vsub.f32 %v295_v0, %v311_v18  ;;  %v315_v20 = vsub.f32 %v296_v1, %v311_v18 }
 0x130   :  { %v318_v21 = vmul.f32 %v314_v19, %v314_v19  ;;  %v319_v22 = vmul.f32 %v315_v20, %v315_v20 }
 0x132   :  { %v323_v23 = vadd.f32 %v319_v22, %v318_v21 }
 0x134   :  { %324 = vadd.xlane.f32.xlu1 %v323_v23 }
 0x19f   :  { %v322_v24 = vpop.xlane.xlu1 %321 }
 0x1a0   :  { %v326_v25 = vmul.f32 %v322_v24, %v309_v9 }
 0x1a2   :  { %v328_v26 = vadd.f32 1e-12, %v326_v25 }
 0x1a4   :  { %555 = vrsqrt.f32 %v328_v26  ;;  %vm336_vm2 = vweird.f32 %v328_v26 }
 0x1a7   :  { %v325_v27 = vpop.xlane.xlu1 %324 }
 0x1a8   :  { %v327_v28 = vmul.f32 %v325_v27, %v309_v9 }
 0x1aa   :  { %v556_v29 = vpop.eup %555  ;;  %v329_v30 = vadd.f32 1e-12, %v327_v28 }
 0x1ab   :  { %v331_v31 = vmul.f32 %v556_v29, %v328_v26  ;;  %vm337_vm1 = vweird.f32 %v556_v29 }
 0x1ac   :  { %557 = vrsqrt.f32 %v329_v30  ;;  %vm338_vm3 = vmor %vm336_vm2, %vm337_vm1  ;;  %vm346_vm5 = vweird.f32 %v329_v30 }
 0x1ad   :  { %v332_v32 = vmul.f32 %v556_v29, %v331_v31 }
 0x1af   :  { %v333_v33 = vmul.f32 0.5, %v332_v32 }
 0x1b1   :  { %v334_v35 = vsub.f32 1.5, %v333_v33 }
 0x1b2   :  { %v558_v36 = vpop.eup %557 }
 0x1b3   :  { %v335_v38 = vmul.f32 %v556_v29, %v334_v35  ;;  %v341_v39 = vmul.f32 %v558_v36, %v329_v30  ;;  %vm347_vm4 = vweird.f32 %v558_v36 }
 0x1b4   :  { %vm348_vm6 = vmor %vm346_vm5, %vm347_vm4 }
 0x1b5   :  { %v339_v42 = vsel %vm338_vm3, %v556_v29, %v335_v38  ;;  %v342_v43 = vmul.f32 %v558_v36, %v341_v39 }
 0x1b6   :  { %v350_v46 = vmul.f32 %v339_v42, %v312_v12  ;;  %v351_v47 = vmul.f32 %v339_v42, %v313_v13 }
 0x1b7   :  { %v343_v48 = vmul.f32 0.5, %v342_v43 }
 0x1b8   :  { %v360_v49 = vmul.f32 %v356_v40, %v350_v46  ;;  %v361_v50 = vmul.f32 %v357_v41, %v351_v47 }
 0x1b9   :  { %v344_v51 = vsub.f32 1.5, %v343_v48 }
 0x1ba   :  { %v370_v52 = vadd.f32 %v366_v44, %v360_v49  ;;  %v371_v53 = vadd.f32 %v367_v45, %v361_v50 }
 0x1bb   :  { %v345_v54 = vmul.f32 %v558_v36, %v344_v51 }
 0x1bc   :  { %374 = vst [vmem:[%s838_s6] sm:$0xff] %v370_v52 }
 0x1bd   :  { %375 = vst [vmem:[%s838_s6 + $0x8] sm:$0xff] %v371_v53  ;;  %v349_v55 = vsel %vm348_vm6, %v558_v36, %v345_v54 }
 0x1be   :  { %v352_v56 = vmul.f32 %v349_v55, %v314_v19  ;;  %v353_v57 = vmul.f32 %v349_v55, %v315_v20 }
 0x1c0   :  { %v362_v58 = vmul.f32 %v356_v40, %v352_v56  ;;  %v363_v59 = vmul.f32 %v357_v41, %v353_v57 }
 0x1c2   :  { %v372_v60 = vadd.f32 %v366_v44, %v362_v58  ;;  %v373_v61 = vadd.f32 %v367_v45, %v363_v59 }
 0x1c4   :  { %376 = vst [vmem:[%s838_s6 + $0x10] sm:$0xff] %v372_v60 }
 0x1c5   :  { %377 = vst [vmem:[%s838_s6 + $0x18] sm:$0xff] %v373_v61 }

// kernel: bert_lstm_forward.18
= control target key start
LH: loop header
LB: loop body
LE: loop exit
PB: predicated region body
PF: predicated region fallthrough
CT: control target
= control target key end

     0   :  { %8 = vsyncpa [#allocation3], 0  ;;  %s992_s15 = smov [#allocation2]   ;;  %s993_s17 = smov 256   ;;  %s1063_s0 = inlined_call_operand.vmem [shape: f32[16,256], index: 0, kind: input, shape index: {}]   ;;  %s1064_s1 = inlined_call_operand.hbm [shape: bf16[256,512], index: 1, kind: input, shape index: {}]   ;;  %s1065_s2 = inlined_call_operand.vmem [shape: f32[1,512], index: 2, kind: input, shape index: {}]   ;;  %s1066_s3 = inlined_call_operand.vmem [shape: bf16[16,512], index: 3, kind: output, shape index: {}]  }
   0x1   :  { %s15_s14 = sshll.u32 %s1064_s1, 4  ;;  %s17_s16 = sshll.u32 %s992_s15, 4  ;;  %s16_s14 = int_to_ptr.hbm [resolvable:$true] %s15_s14  ;;  %s18_s16 = int_to_ptr.vmem [resolvable:$true] %s17_s16 }
   0x2   :  { %s994_s18 = smov 16  }
   0x3   :  { %23 = dma.hbm_to_vmem [thread:$0]  %s16_s14, 8192, %s18_s16, [#allocation3], %s993_s17, %s993_s17, %s994_s18  }
   0x4   :  { %990 = dma.done.wait [#allocation3], 8192  }
   0x5   :  { %991 = vsyncadd [#allocation3], 4294959104  ;;  %v741_v0 = vld [vmem:[#allocation2 + $0xe0] sm:$0xf]  ;;  %v913_v1 = vld [vmem:[#allocation2 + $0xec] sm:$0xf0] }
   0x6   :  { %v869_v2 = vld [vmem:[#allocation2 + $0x1e0] sm:$0xf]  ;;  %v742_v3 = vor.u32 %v913_v1, %v741_v0  ;;  %v945_v4 = vld [vmem:[#allocation2 + $0x1ec] sm:$0xf0]  ;;  %v911_v5 = vld [vmem:[#allocation2 + $0xe4] sm:$0xf] }
   0x7   :  { %v743_v6 = vld [vmem:[#allocation2 + $0xf0] sm:$0xf0]  ;;  %v870_v7 = vor.u32 %v945_v4, %v869_v2  ;;  %v943_v9 = vld [vmem:[#allocation2 + $0x1e4] sm:$0xf]  ;;  %v725_v11 = vld [vmem:[#allocation2 + $0xc0] sm:$0xf] }
   0x8   :  { %v746_v8 = vor.u32 %v911_v5, %v743_v6  ;;  %v871_v10 = vld [vmem:[#allocation2 + $0x1f0] sm:$0xf0]  ;;  %430 = vmatpush.bf16.msra.mxu0 %v742_v3  ;;  %v909_v13 = vld [vmem:[#allocation2 + $0xcc] sm:$0xf0]  ;;  %v853_v14 = vld [vmem:[#allocation2 + $0x1c0] sm:$0xf] }
   0x9   :  { %v874_v12 = vor.u32 %v943_v9, %v871_v10  ;;  %v941_v15 = vld [vmem:[#allocation2 + $0x1cc] sm:$0xf0]  ;;  %444 = vmatpush.bf16.msra.mxu1 %v870_v7  ;;  %v726_v16 = vor.u32 %v909_v13, %v725_v11  ;;  %v907_v18 = vld [vmem:[#allocation2 + $0xc4] sm:$0xf]  ;;  %v727_v19 = vld [vmem:[#allocation2 + $0xd0] sm:$0xf0] }
   0xa   :  { %458 = vmatpush.bf16.msra.mxu2 %v746_v8  ;;  %v854_v17 = vor.u32 %v941_v15, %v853_v14  ;;  %v939_v20 = vld [vmem:[#allocation2 + $0x1c4] sm:$0xf]  ;;  %v730_v21 = vor.u32 %v907_v18, %v727_v19  ;;  %v855_v22 = vld [vmem:[#allocation2 + $0x1d0] sm:$0xf0]  ;;  %v709_v23 = vld [vmem:[#allocation2 + $0xa0] sm:$0xf] }
   0xb   :  { %472 = vmatpush.bf16.msra.mxu3 %v874_v12  ;;  %v905_v24 = vld [vmem:[#allocation2 + $0xac] sm:$0xf0]  ;;  %v858_v25 = vor.u32 %v939_v20, %v855_v22  ;;  %v837_v26 = vld [vmem:[#allocation2 + $0x1a0] sm:$0xf]  ;;  %v903_v28 = vld [vmem:[#allocation2 + $0xa4] sm:$0xf] }
   0xc   :  { %v937_v27 = vld [vmem:[#allocation2 + $0x1ac] sm:$0xf0]  ;;  %431 = vmatpush.bf16.msra.mxu0 %v726_v16  ;;  %v710_v29 = vor.u32 %v905_v24, %v709_v23  ;;  %v711_v30 = vld [vmem:[#allocation2 + $0xb0] sm:$0xf0]  ;;  %v935_v31 = vld [vmem:[#allocation2 + $0x1a4] sm:$0xf] }
   0xd   :  { %v839_v32 = vld [vmem:[#allocation2 + $0x1b0] sm:$0xf0]  ;;  %445 = vmatpush.bf16.msra.mxu1 %v854_v17  ;;  %v838_v33 = vor.u32 %v937_v27, %v837_v26  ;;  %v714_v34 = vor.u32 %v903_v28, %v711_v30  ;;  %v693_v35 = vld [vmem:[#allocation2 + $0x80] sm:$0xf]  ;;  %v901_v36 = vld [vmem:[#allocation2 + $0x8c] sm:$0xf0] }
   0xe   :  { %459 = vmatpush.bf16.msra.mxu2 %v730_v21  ;;  %v821_v37 = vld [vmem:[#allocation2 + $0x180] sm:$0xf]  ;;  %v842_v38 = vor.u32 %v935_v31, %v839_v32  ;;  %v933_v39 = vld [vmem:[#allocation2 + $0x18c] sm:$0xf0]  ;;  %v899_v40 = vld [vmem:[#allocation2 + $0x84] sm:$0xf]  ;;  %v694_v44 = vor.u32 %v901_v36, %v693_v35 }
   0xf   :  { %473 = vmatpush.bf16.msra.mxu3 %v858_v25  ;;  %v695_v41 = vld [vmem:[#allocation2 + $0x90] sm:$0xf0]  ;;  %v931_v42 = vld [vmem:[#allocation2 + $0x184] sm:$0xf]  ;;  %v822_v45 = vor.u32 %v933_v39, %v821_v37  ;;  %v677_v47 = vld [vmem:[#allocation2 + $0x60] sm:$0xf] }
  0x10   :  { %v823_v43 = vld [vmem:[#allocation2 + $0x190] sm:$0xf0]  ;;  %432 = vmatpush.bf16.msra.mxu0 %v710_v29  ;;  %v698_v46 = vor.u32 %v899_v40, %v695_v41  ;;  %v897_v48 = vld [vmem:[#allocation2 + $0x6c] sm:$0xf0]  ;;  %v805_v49 = vld [vmem:[#allocation2 + $0x160] sm:$0xf] }
  0x11   :  { %446 = vmatpush.bf16.msra.mxu1 %v838_v33  ;;  %v826_v50 = vor.u32 %v931_v42, %v823_v43  ;;  %v929_v51 = vld [vmem:[#allocation2 + $0x16c] sm:$0xf0]  ;;  %v895_v52 = vld [vmem:[#allocation2 + $0x64] sm:$0xf]  ;;  %v679_v53 = vld [vmem:[#allocation2 + $0x70] sm:$0xf0]  ;;  %v678_v56 = vor.u32 %v897_v48, %v677_v47 }
  0x12   :  { %460 = vmatpush.bf16.msra.mxu2 %v714_v34  ;;  %v927_v54 = vld [vmem:[#allocation2 + $0x164] sm:$0xf]  ;;  %v807_v55 = vld [vmem:[#allocation2 + $0x170] sm:$0xf0]  ;;  %v806_v57 = vor.u32 %v929_v51, %v805_v49  ;;  %v682_v58 = vor.u32 %v895_v52, %v679_v53  ;;  %v661_v59 = vld [vmem:[#allocation2 + $0x40] sm:$0xf] }
  0x13   :  { %474 = vmatpush.bf16.msra.mxu3 %v842_v38  ;;  %v893_v60 = vld [vmem:[#allocation2 + $0x4c] sm:$0xf0]  ;;  %v789_v61 = vld [vmem:[#allocation2 + $0x140] sm:$0xf]  ;;  %v810_v62 = vor.u32 %v927_v54, %v807_v55  ;;  %v891_v0 = vld [vmem:[#allocation2 + $0x44] sm:$0xf] }
  0x14   :  { %433 = vmatpush.bf16.msra.mxu0 %v694_v44  ;;  %v925_v63 = vld [vmem:[#allocation2 + $0x14c] sm:$0xf0]  ;;  %v663_v1 = vld [vmem:[#allocation2 + $0x50] sm:$0xf0]  ;;  %v923_v2 = vld [vmem:[#allocation2 + $0x144] sm:$0xf]  ;;  %v662_v4 = vor.u32 %v893_v60, %v661_v59 }
  0x15   :  { %447 = vmatpush.bf16.msra.mxu1 %v822_v45  ;;  %v791_v3 = vld [vmem:[#allocation2 + $0x150] sm:$0xf0]  ;;  %v790_v5 = vor.u32 %v925_v63, %v789_v61  ;;  %v666_v6 = vor.u32 %v891_v0, %v663_v1  ;;  %v645_v7 = vld [vmem:[#allocation2 + $0x20] sm:$0xf]  ;;  %v889_v8 = vld [vmem:[#allocation2 + $0x2c] sm:$0xf0] }
  0x16   :  { %461 = vmatpush.bf16.msra.mxu2 %v698_v46  ;;  %v773_v9 = vld [vmem:[#allocation2 + $0x120] sm:$0xf]  ;;  %v794_v10 = vor.u32 %v923_v2, %v791_v3  ;;  %v921_v11 = vld [vmem:[#allocation2 + $0x12c] sm:$0xf0]  ;;  %v887_v12 = vld [vmem:[#allocation2 + $0x24] sm:$0xf]  ;;  %v646_v16 = vor.u32 %v889_v8, %v645_v7 }
  0x17   :  { %475 = vmatpush.bf16.msra.mxu3 %v826_v50  ;;  %v647_v13 = vld [vmem:[#allocation2 + $0x30] sm:$0xf0]  ;;  %v919_v14 = vld [vmem:[#allocation2 + $0x124] sm:$0xf]  ;;  %v629_v17 = vld [vmem:[#allocation2] sm:$0xf]  ;;  %v774_v20 = vor.u32 %v921_v11, %v773_v9 }
  0x18   :  { %434 = vmatpush.bf16.msra.mxu0 %v678_v56  ;;  %v775_v15 = vld [vmem:[#allocation2 + $0x130] sm:$0xf0]  ;;  %v885_v18 = vld [vmem:[#allocation2 + $0xc] sm:$0xf0]  ;;  %v757_v19 = vld [vmem:[#allocation2 + $0x100] sm:$0xf]  ;;  %v650_v21 = vor.u32 %v887_v12, %v647_v13 }
  0x19   :  { %448 = vmatpush.bf16.msra.mxu1 %v806_v57  ;;  %v917_v22 = vld [vmem:[#allocation2 + $0x10c] sm:$0xf0]  ;;  %v883_v23 = vld [vmem:[#allocation2 + $0x4] sm:$0xf]  ;;  %v631_v24 = vld [vmem:[#allocation2 + $0x10] sm:$0xf0]  ;;  %v778_v25 = vor.u32 %v919_v14, %v775_v15  ;;  %v630_v32 = vor.u32 %v885_v18, %v629_v17 }
  0x1a   :  { %462 = vmatpush.bf16.msra.mxu2 %v682_v58  ;;  %v915_v26 = vld [vmem:[#allocation2 + $0x104] sm:$0xf]  ;;  %v759_v27 = vld [vmem:[#allocation2 + $0x110] sm:$0xf0]  ;;  %v749_v28 = vld [vmem:[#allocation2 + $0xe8] sm:$0xf]  ;;  %v758_v36 = vor.u32 %v917_v22, %v757_v19  ;;  %v634_v37 = vor.u32 %v883_v23, %v631_v24 }
  0x1b   :  { %476 = vmatpush.bf16.msra.mxu3 %v810_v62  ;;  %v914_v29 = vld [vmem:[#allocation2 + $0xf4] sm:$0xf0]  ;;  %v877_v30 = vld [vmem:[#allocation2 + $0x1e8] sm:$0xf]  ;;  %v912_v33 = vld [vmem:[#allocation2 + $0xec] sm:$0xf]  ;;  %v762_v41 = vor.u32 %v915_v26, %v759_v27 }
  0x1c   :  { %435 = vmatpush.bf16.msra.mxu0 %v662_v4  ;;  %v946_v31 = vld [vmem:[#allocation2 + $0x1f4] sm:$0xf0]  ;;  %v751_v34 = vld [vmem:[#allocation2 + $0xf8] sm:$0xf0]  ;;  %v944_v35 = vld [vmem:[#allocation2 + $0x1ec] sm:$0xf]  ;;  %v750_v42 = vor.u32 %v914_v29, %v749_v28 }
  0x1d   :  { %449 = vmatpush.bf16.msra.mxu1 %v790_v5  ;;  %v879_v38 = vld [vmem:[#allocation2 + $0x1f8] sm:$0xf0]  ;;  %v30_v39 = vld [vmem:[%s1063_s0] sm:$0xff]  ;;  %v32_v40 = vld [vmem:[%s1063_s0 + $0x10] sm:$0xff]  ;;  %v878_v45 = vor.u32 %v946_v31, %v877_v30  ;;  %v754_v46 = vor.u32 %v912_v33, %v751_v34 }
  0x1e   :  { %463 = vmatpush.bf16.msra.mxu2 %v666_v6  ;;  %v31_v43 = vld [vmem:[%s1063_s0 + $0x8] sm:$0xff]  ;;  %v33_v44 = vld [vmem:[%s1063_s0 + $0x18] sm:$0xff]  ;;  %v882_v50 = vor.u32 %v944_v35, %v879_v38  ;;  %v1030_v51 = vpack.c.bf16 %v32_v40, %v30_v39 }
  0x1f   :  { %477 = vmatpush.bf16.msra.mxu3 %v794_v10  ;;  %v733_v47 = vld [vmem:[#allocation2 + $0xc8] sm:$0xf]  ;;  %v910_v48 = vld [vmem:[#allocation2 + $0xd4] sm:$0xf0]  ;;  %v908_v53 = vld [vmem:[#allocation2 + $0xcc] sm:$0xf]  ;;  %v1032_v55 = vpack.c.bf16 %v33_v44, %v31_v43 }
  0x20   :  { %436 = vmatpush.bf16.msra.mxu0 %v646_v16  ;;  %v861_v49 = vld [vmem:[#allocation2 + $0x1c8] sm:$0xf]  ;;  %v942_v52 = vld [vmem:[#allocation2 + $0x1d4] sm:$0xf0]  ;;  %v735_v54 = vld [vmem:[#allocation2 + $0xd8] sm:$0xf0]  ;;  %v734_v58 = vor.u32 %v910_v48, %v733_v47 }
  0x21   :  { %450 = vmatpush.bf16.msra.mxu1 %v774_v20  ;;  %v940_v56 = vld [vmem:[#allocation2 + $0x1cc] sm:$0xf]  ;;  %v863_v57 = vld [vmem:[#allocation2 + $0x1d8] sm:$0xf0]  ;;  %v862_v59 = vor.u32 %v942_v52, %v861_v49  ;;  %v738_v60 = vor.u32 %v908_v53, %v735_v54  ;;  %v717_v61 = vld [vmem:[#allocation2 + $0xa8] sm:$0xf] }
  0x22   :  { %464 = vmatpush.bf16.msra.mxu2 %v650_v21  ;;  %v906_v62 = vld [vmem:[#allocation2 + $0xb4] sm:$0xf0]  ;;  %v845_v63 = vld [vmem:[#allocation2 + $0x1a8] sm:$0xf]  ;;  %v866_v0 = vor.u32 %v940_v56, %v863_v57  ;;  %v904_v2 = vld [vmem:[#allocation2 + $0xac] sm:$0xf] }
  0x23   :  { %478 = vmatpush.bf16.msra.mxu3 %v778_v25  ;;  %v938_v1 = vld [vmem:[#allocation2 + $0x1b4] sm:$0xf0]  ;;  %v719_v3 = vld [vmem:[#allocation2 + $0xb8] sm:$0xf0]  ;;  %v936_v4 = vld [vmem:[#allocation2 + $0x1ac] sm:$0xf]  ;;  %v718_v6 = vor.u32 %v906_v62, %v717_v61 }
  0x24   :  { %437 = vmatpush.bf16.msra.mxu0 %v630_v32  ;;  %v847_v5 = vld [vmem:[#allocation2 + $0x1b8] sm:$0xf0]  ;;  %v846_v7 = vor.u32 %v938_v1, %v845_v63  ;;  %v722_v8 = vor.u32 %v904_v2, %v719_v3  ;;  %v701_v9 = vld [vmem:[#allocation2 + $0x88] sm:$0xf]  ;;  %v902_v10 = vld [vmem:[#allocation2 + $0x94] sm:$0xf0] }
  0x25   :  { %451 = vmatpush.bf16.msra.mxu1 %v758_v36  ;;  %v829_v11 = vld [vmem:[#allocation2 + $0x188] sm:$0xf]  ;;  %v850_v12 = vor.u32 %v936_v4, %v847_v5  ;;  %v934_v13 = vld [vmem:[#allocation2 + $0x194] sm:$0xf0]  ;;  %v900_v14 = vld [vmem:[#allocation2 + $0x8c] sm:$0xf]  ;;  %v702_v18 = vor.u32 %v902_v10, %v701_v9 }
  0x26   :  { %465 = vmatpush.bf16.msra.mxu2 %v634_v37  ;;  %v703_v15 = vld [vmem:[#allocation2 + $0x98] sm:$0xf0]  ;;  %v932_v16 = vld [vmem:[#allocation2 + $0x18c] sm:$0xf]  ;;  %v830_v19 = vor.u32 %v934_v13, %v829_v11  ;;  %v685_v21 = vld [vmem:[#allocation2 + $0x68] sm:$0xf] }
  0x27   :  { %479 = vmatpush.bf16.msra.mxu3 %v762_v41  ;;  %438 = vmatmul.bf16.vlgmr.msra.gmra.mxu0 %v1030_v51  ;;  %v831_v17 = vld [vmem:[#allocation2 + $0x198] sm:$0xf0]  ;;  %v706_v20 = vor.u32 %v900_v14, %v703_v15  ;;  %v898_v22 = vld [vmem:[#allocation2 + $0x74] sm:$0xf0]  ;;  %v813_v23 = vld [vmem:[#allocation2 + $0x168] sm:$0xf] }
  0x28   :  { %486 = vmatpush.bf16.msrb.mxu0 %v750_v42  ;;  %452 = vmatmul.bf16.vlgmr.msra.gmra.mxu1 %v1032_v55  ;;  %v834_v24 = vor.u32 %v932_v16, %v831_v17  ;;  %v930_v25 = vld [vmem:[#allocation2 + $0x174] sm:$0xf0]  ;;  %v896_v26 = vld [vmem:[#allocation2 + $0x6c] sm:$0xf]  ;;  %v687_v27 = vld [vmem:[#allocation2 + $0x78] sm:$0xf0]  ;;  %v686_v30 = vor.u32 %v898_v22, %v685_v21 }
  0x29   :  { %500 = vmatpush.bf16.msrb.mxu1 %v878_v45  ;;  %466 = vmatmul.bf16.vlgmr.msra.gmra.mxu2 %v1030_v51  ;;  %v928_v28 = vld [vmem:[#allocation2 + $0x16c] sm:$0xf]  ;;  %v815_v29 = vld [vmem:[#allocation2 + $0x178] sm:$0xf0]  ;;  %v814_v31 = vor.u32 %v930_v25, %v813_v23  ;;  %v690_v32 = vor.u32 %v896_v26, %v687_v27  ;;  %v669_v33 = vld [vmem:[#allocation2 + $0x48] sm:$0xf] }
  0x2a   :  { %514 = vmatpush.bf16.msrb.mxu2 %v754_v46  ;;  %480 = vmatmul.bf16.vlgmr.msra.gmra.mxu3 %v1032_v55  ;;  %v894_v34 = vld [vmem:[#allocation2 + $0x54] sm:$0xf0]  ;;  %v797_v35 = vld [vmem:[#allocation2 + $0x148] sm:$0xf]  ;;  %v818_v36 = vor.u32 %v928_v28, %v815_v29  ;;  %v892_v38 = vld [vmem:[#allocation2 + $0x4c] sm:$0xf] }
  0x2b   :  { %528 = vmatpush.bf16.msrb.mxu3 %v882_v50  ;;  %v926_v37 = vld [vmem:[#allocation2 + $0x154] sm:$0xf0]  ;;  %v671_v39 = vld [vmem:[#allocation2 + $0x58] sm:$0xf0]  ;;  %v924_v40 = vld [vmem:[#allocation2 + $0x14c] sm:$0xf]  ;;  %v670_v42 = vor.u32 %v894_v34, %v669_v33 }
  0x2c   :  { %487 = vmatpush.bf16.msrb.mxu0 %v734_v58  ;;  %v799_v41 = vld [vmem:[#allocation2 + $0x158] sm:$0xf0]  ;;  %v798_v43 = vor.u32 %v926_v37, %v797_v35  ;;  %v674_v44 = vor.u32 %v892_v38, %v671_v39  ;;  %v653_v45 = vld [vmem:[#allocation2 + $0x28] sm:$0xf]  ;;  %v890_v46 = vld [vmem:[#allocation2 + $0x34] sm:$0xf0] }
  0x2d   :  { %501 = vmatpush.bf16.msrb.mxu1 %v862_v59  ;;  %v781_v47 = vld [vmem:[#allocation2 + $0x128] sm:$0xf]  ;;  %v802_v48 = vor.u32 %v924_v40, %v799_v41  ;;  %v922_v49 = vld [vmem:[#allocation2 + $0x134] sm:$0xf0]  ;;  %v888_v50 = vld [vmem:[#allocation2 + $0x2c] sm:$0xf]  ;;  %v654_v56 = vor.u32 %v890_v46, %v653_v45 }
  0x2e   :  { %515 = vmatpush.bf16.msrb.mxu2 %v738_v60  ;;  %v655_v52 = vld [vmem:[#allocation2 + $0x38] sm:$0xf0]  ;;  %v920_v53 = vld [vmem:[#allocation2 + $0x12c] sm:$0xf]  ;;  %v782_v57 = vor.u32 %v922_v49, %v781_v47  ;;  %v637_v59 = vld [vmem:[#allocation2 + $0x8] sm:$0xf] }
  0x2f   :  { %529 = vmatpush.bf16.msrb.mxu3 %v866_v0  ;;  %v783_v54 = vld [vmem:[#allocation2 + $0x138] sm:$0xf0]  ;;  %v658_v58 = vor.u32 %v888_v50, %v655_v52  ;;  %v886_v60 = vld [vmem:[#allocation2 + $0x14] sm:$0xf0]  ;;  %v765_v61 = vld [vmem:[#allocation2 + $0x108] sm:$0xf] }
  0x30   :  { %488 = vmatpush.bf16.msrb.mxu0 %v718_v6  ;;  %v786_v62 = vor.u32 %v920_v53, %v783_v54  ;;  %v918_v63 = vld [vmem:[#allocation2 + $0x114] sm:$0xf0]  ;;  %v884_v0 = vld [vmem:[#allocation2 + $0xc] sm:$0xf]  ;;  %v639_v1 = vld [vmem:[#allocation2 + $0x18] sm:$0xf0]  ;;  %v638_v4 = vor.u32 %v886_v60, %v637_v59 }
  0x31   :  { %502 = vmatpush.bf16.msrb.mxu1 %v846_v7  ;;  %v916_v2 = vld [vmem:[#allocation2 + $0x10c] sm:$0xf]  ;;  %v767_v3 = vld [vmem:[#allocation2 + $0x118] sm:$0xf0]  ;;  %v766_v5 = vor.u32 %v918_v63, %v765_v61  ;;  %v642_v6 = vor.u32 %v884_v0, %v639_v1 }
  0x32   :  { %516 = vmatpush.bf16.msrb.mxu2 %v722_v8  ;;  %v770_v7 = vor.u32 %v916_v2, %v767_v3  ;;  %v1045_v8 = vld [vmem:[%s1065_s2] sm:$0xf] }
  0x33   :  { %530 = vmatpush.bf16.msrb.mxu3 %v850_v12  ;;  %v102_v9 = vperm.slane %v1045_v8, 0  ;;  %v103_v14 = vperm.slane %v1045_v8, 1  ;;  %v104_v45 = vperm.slane %v1045_v8, 2 }
  0x34   :  { %489 = vmatpush.bf16.msrb.mxu0 %v702_v18 }
  0x35   :  { %503 = vmatpush.bf16.msrb.mxu1 %v830_v19 }
  0x36   :  { %517 = vmatpush.bf16.msrb.mxu2 %v706_v20 }
  0x37   :  { %531 = vmatpush.bf16.msrb.mxu3 %v834_v24 }
  0x38   :  { %490 = vmatpush.bf16.msrb.mxu0 %v686_v30 }
  0x39   :  { %504 = vmatpush.bf16.msrb.mxu1 %v814_v31 }
  0x3a   :  { %518 = vmatpush.bf16.msrb.mxu2 %v690_v32 }
  0x3b   :  { %532 = vmatpush.bf16.msrb.mxu3 %v818_v36 }
  0x3c   :  { %491 = vmatpush.bf16.msrb.mxu0 %v670_v42 }
  0x3d   :  { %505 = vmatpush.bf16.msrb.mxu1 %v798_v43 }
  0x3e   :  { %519 = vmatpush.bf16.msrb.mxu2 %v674_v44 }
  0x3f   :  { %533 = vmatpush.bf16.msrb.mxu3 %v802_v48 }
  0x40   :  { %492 = vmatpush.bf16.msrb.mxu0 %v654_v56 }
  0x41   :  { %506 = vmatpush.bf16.msrb.mxu1 %v782_v57 }
  0x42   :  { %520 = vmatpush.bf16.msrb.mxu2 %v658_v58 }
  0x43   :  { %534 = vmatpush.bf16.msrb.mxu3 %v786_v62  ;;  %v105_v62 = vperm.slane %v1045_v8, 3 }
  0x44   :  { %493 = vmatpush.bf16.msrb.mxu0 %v638_v4 }
  0x45   :  { %507 = vmatpush.bf16.msrb.mxu1 %v766_v5 }
  0x46   :  { %521 = vmatpush.bf16.msrb.mxu2 %v642_v6 }
  0x47   :  { %535 = vmatpush.bf16.msrb.mxu3 %v770_v7  ;;  %494 = vmatmul.bf16.vlgmr.msrb.gmra.mxu0 %v1030_v51 }
  0x48   :  { %508 = vmatmul.bf16.vlgmr.msrb.gmra.mxu1 %v1032_v55 }
  0x49   :  { %522 = vmatmul.bf16.vlgmr.msrb.gmra.mxu2 %v1030_v51 }
  0x4a   :  { %536 = vmatmul.bf16.vlgmr.msrb.gmra.mxu3 %v1032_v55 }
  0xa4   :  { %v439_v10 = vpop.f32.mrf.mxu0 }
  0xa5   :  { %v440_v11 = vadd.f32 %v439_v10, %v102_v9  ;;  %v453_v12 = vpop.f32.mrf.mxu1 }
  0xa7   :  { %v454_v13 = vadd.f32 %v453_v12, %v440_v11 }
  0xa9   :  { %v550_v15 = vmul.f32 0.044715, %v454_v13  ;;  %v542_v46 = vmul.f32 0.5, %v454_v13 }
  0xab   :  { %v558_v16 = vmul.f32 %v550_v15, %v454_v13 }
  0xac   :  { %v467_v17 = vpop.f32.mrf.mxu2  ;;  %v441_v51 = vpop.f32.mrf.mxu0 }
  0xad   :  { %v468_v18 = vadd.f32 %v467_v17, %v103_v14  ;;  %v481_v19 = vpop.f32.mrf.mxu3  ;;  %v566_v55 = vmul.f32 %v558_v16, %v454_v13  ;;  %v442_v20 = vadd.f32 %v441_v51, %v102_v9  ;;  %v455_v21 = vpop.f32.mrf.mxu1 }
  0xaf   :  { %v482_v22 = vadd.f32 %v481_v19, %v468_v18  ;;  %v574_v23 = vadd.f32 %v566_v55, %v454_v13  ;;  %v456_v24 = vadd.f32 %v455_v21, %v442_v20 }
  0xb1   :  { %v551_v25 = vmul.f32 0.044715, %v482_v22  ;;  %v554_v26 = vmul.f32 0.044715, %v456_v24  ;;  %v582_v27 = vmul.f32 0.7978846, %v574_v23 }
  0xb2   :  { %v543_v50 = vmul.f32 0.5, %v482_v22  ;;  %v546_v4 = vmul.f32 0.5, %v456_v24 }
  0xb3   :  { %v559_v28 = vmul.f32 %v551_v25, %v482_v22  ;;  %v562_v29 = vmul.f32 %v554_v26, %v456_v24  ;;  %950 = vtanh.f32 %v582_v27 }
  0xb4   :  { %v469_v30 = vpop.f32.mrf.mxu2 }
  0xb5   :  { %v567_v31 = vmul.f32 %v559_v28, %v482_v22  ;;  %v470_v32 = vadd.f32 %v469_v30, %v103_v14  ;;  %v483_v33 = vpop.f32.mrf.mxu3  ;;  %v570_v34 = vmul.f32 %v562_v29, %v456_v24 }
  0xb7   :  { %v575_v35 = vadd.f32 %v567_v31, %v482_v22  ;;  %v484_v36 = vadd.f32 %v483_v33, %v470_v32  ;;  %v578_v37 = vadd.f32 %v570_v34, %v456_v24 }
  0xb9   :  { %v583_v38 = vmul.f32 0.7978846, %v575_v35  ;;  %v555_v39 = vmul.f32 0.044715, %v484_v36  ;;  %v586_v40 = vmul.f32 0.7978846, %v578_v37  ;;  %v951_v42 = vpop.eup %950 }
  0xba   :  { %v598_v47 = vadd.f32 1.0, %v951_v42  ;;  %v547_v5 = vmul.f32 0.5, %v484_v36 }
  0xbb   :  { %952 = vtanh.f32 %v583_v38  ;;  %v563_v41 = vmul.f32 %v555_v39, %v484_v36 }
  0xbc   :  { %954 = vtanh.f32 %v586_v40  ;;  %v606_v57 = vmul.f32 %v598_v47, %v542_v46 }
  0xbd   :  { %v571_v43 = vmul.f32 %v563_v41, %v484_v36 }
  0xbf   :  { %v579_v44 = vadd.f32 %v571_v43, %v484_v36 }
  0xc1   :  { %v953_v48 = vpop.eup %952  ;;  %v587_v49 = vmul.f32 0.7978846, %v579_v44 }
  0xc2   :  { %v599_v52 = vadd.f32 1.0, %v953_v48  ;;  %v955_v59 = vpop.eup %954 }
  0xc3   :  { %956 = vtanh.f32 %v587_v49  ;;  %v602_v0 = vadd.f32 1.0, %v955_v59 }
  0xc4   :  { %v495_v53 = vpop.f32.mrf.mxu0  ;;  %v607_v58 = vmul.f32 %v599_v52, %v543_v50 }
  0xc5   :  { %v496_v54 = vadd.f32 %v495_v53, %v104_v45  ;;  %v509_v56 = vpop.f32.mrf.mxu1  ;;  %v610_v13 = vmul.f32 %v602_v0, %v546_v4 }
  0xc6   :  { %v614_v61 = vpack.c.bf16 %v607_v58, %v606_v57 }
  0xc7   :  { %v510_v60 = vadd.f32 %v509_v56, %v496_v54 }
  0xc8   :  { %618 = vst [vmem:[%s1066_s3] sm:$0xff] %v614_v61 }
  0xc9   :  { %v552_v63 = vmul.f32 0.044715, %v510_v60  ;;  %v957_v1 = vpop.eup %956  ;;  %v544_v40 = vmul.f32 0.5, %v510_v60 }
  0xca   :  { %v603_v6 = vadd.f32 1.0, %v957_v1 }
  0xcb   :  { %v560_v2 = vmul.f32 %v552_v63, %v510_v60 }
  0xcc   :  { %v523_v3 = vpop.f32.mrf.mxu2  ;;  %v497_v10 = vpop.f32.mrf.mxu0  ;;  %v611_v14 = vmul.f32 %v603_v6, %v547_v5 }
  0xcd   :  { %v524_v7 = vadd.f32 %v523_v3, %v105_v62  ;;  %v537_v9 = vpop.f32.mrf.mxu3  ;;  %v568_v11 = vmul.f32 %v560_v2, %v510_v60  ;;  %v498_v12 = vadd.f32 %v497_v10, %v104_v45  ;;  %v511_v15 = vpop.f32.mrf.mxu1 }
  0xce   :  { %v616_v18 = vpack.c.bf16 %v611_v14, %v610_v13 }
  0xcf   :  { %v538_v8 = vadd.f32 %v537_v9, %v524_v7  ;;  %v576_v16 = vadd.f32 %v568_v11, %v510_v60  ;;  %v512_v17 = vadd.f32 %v511_v15, %v498_v12 }
  0xd0   :  { %620 = vst [vmem:[%s1066_s3 + $0x10] sm:$0xff] %v616_v18 }
  0xd1   :  { %v553_v51 = vmul.f32 0.044715, %v538_v8  ;;  %v556_v19 = vmul.f32 0.044715, %v512_v17  ;;  %v584_v55 = vmul.f32 0.7978846, %v576_v16 }
  0xd2   :  { %v545_v41 = vmul.f32 0.5, %v538_v8  ;;  %v548_v49 = vmul.f32 0.5, %v512_v17 }
  0xd3   :  { %v561_v20 = vmul.f32 %v553_v51, %v538_v8  ;;  %v564_v21 = vmul.f32 %v556_v19, %v512_v17  ;;  %958 = vtanh.f32 %v584_v55 }
  0xd4   :  { %v525_v22 = vpop.f32.mrf.mxu2 }
  0xd5   :  { %v569_v23 = vmul.f32 %v561_v20, %v538_v8  ;;  %v526_v24 = vadd.f32 %v525_v22, %v105_v62  ;;  %v572_v25 = vmul.f32 %v564_v21, %v512_v17  ;;  %v539_v26 = vpop.f32.mrf.mxu3 }
  0xd7   :  { %v577_v27 = vadd.f32 %v569_v23, %v538_v8  ;;  %v540_v28 = vadd.f32 %v539_v26, %v526_v24  ;;  %v580_v29 = vadd.f32 %v572_v25, %v512_v17 }
  0xd9   :  { %v585_v30 = vmul.f32 0.7978846, %v577_v27  ;;  %v557_v31 = vmul.f32 0.044715, %v540_v28  ;;  %v588_v32 = vmul.f32 0.7978846, %v580_v29  ;;  %v959_v34 = vpop.eup %958 }
  0xda   :  { %v600_v37 = vadd.f32 1.0, %v959_v34  ;;  %v549_v50 = vmul.f32 0.5, %v540_v28 }
  0xdb   :  { %960 = vtanh.f32 %v585_v30  ;;  %v565_v33 = vmul.f32 %v557_v31, %v540_v28 }
  0xdc   :  { %962 = vtanh.f32 %v588_v32  ;;  %v608_v43 = vmul.f32 %v600_v37, %v544_v40 }
  0xdd   :  { %v573_v35 = vmul.f32 %v565_v33, %v540_v28 }
  0xdf   :  { %v581_v36 = vadd.f32 %v573_v35, %v540_v28 }
  0xe1   :  { %v961_v38 = vpop.eup %960  ;;  %v589_v39 = vmul.f32 0.7978846, %v581_v36 }
  0xe2   :  { %v601_v42 = vadd.f32 1.0, %v961_v38  ;;  %v963_v45 = vpop.eup %962 }
  0xe3   :  { %964 = vtanh.f32 %v589_v39  ;;  %v604_v47 = vadd.f32 1.0, %v963_v45 }
  0xe4   :  { %v609_v44 = vmul.f32 %v601_v42, %v545_v41 }
  0xe5   :  { %v612_v53 = vmul.f32 %v604_v47, %v548_v49 }
  0xe6   :  { %v615_v46 = vpack.c.bf16 %v609_v44, %v608_v43 }
  0xe8   :  { %619 = vst [vmem:[%s1066_s3 + $0x8] sm:$0xff] %v615_v46 }
  0xe9   :  { %v965_v48 = vpop.eup %964 }
  0xea   :  { %v605_v52 = vadd.f32 1.0, %v965_v48 }
  0xec   :  { %v613_v54 = vmul.f32 %v605_v52, %v549_v50 }
  0xee   :  { %v617_v56 = vpack.c.bf16 %v613_v54, %v612_v53 }
  0xf0   :  { %621 = vst [vmem:[%s1066_s3 + $0x18] sm:$0xff] %v617_v56 }
  0xf1   :  { %626 = vsyncpa [#allocation3], 1 }

// kernel: bert_lstm_forward.15
= control target key start
LH: loop header
LB: loop body
LE: loop exit
PB: predicated region body
PF: predicated region fallthrough
CT: control target
= control target key end

     0   :  { %8 = vsyncpa [#allocation3], 0  ;;  %s1320_s15 = smov [#allocation2]   ;;  %s1321_s17 = smov 384   ;;  %s1395_s0 = inlined_call_operand.vmem [shape: f32[16,256], index: 0, kind: input, shape index: {}]   ;;  %s1396_s1 = inlined_call_operand.hbm [shape: bf16[256,768], index: 1, kind: input, shape index: {}]   ;;  %s1397_s2 = inlined_call_operand.vmem [shape: f32[1,768], index: 2, kind: input, shape index: {}]   ;;  %s1398_s3 = inlined_call_operand.vmem [shape: bf16[16,768], index: 3, kind: output, shape index: {}]  }
   0x1   :  { %s15_s14 = sshll.u32 %s1396_s1, 4  ;;  %s17_s16 = sshll.u32 %s1320_s15, 4  ;;  %s16_s14 = int_to_ptr.hbm [resolvable:$true] %s15_s14  ;;  %s18_s16 = int_to_ptr.vmem [resolvable:$true] %s17_s16 }
   0x2   :  { %s1322_s18 = smov 24  }
   0x3   :  { %23 = dma.hbm_to_vmem [thread:$0]  %s16_s14, 12288, %s18_s16, [#allocation3], %s1321_s17, %s1321_s17, %s1322_s18  }
   0x4   :  { %1318 = dma.done.wait [#allocation3], 12288  }
   0x5   :  { %1319 = vsyncadd [#allocation3], 4294955008  ;;  %v981_v0 = vld [vmem:[#allocation2 + $0x150] sm:$0xf]  ;;  %v1240_v1 = vld [vmem:[#allocation2 + $0x164] sm:$0xf0] }
   0x6   :  { %v1173_v2 = vld [vmem:[#allocation2 + $0x2d0] sm:$0xf]  ;;  %v982_v3 = vor.u32 %v1240_v1, %v981_v0  ;;  %v1288_v4 = vld [vmem:[#allocation2 + $0x2e4] sm:$0xf0]  ;;  %v1237_v5 = vld [vmem:[#allocation2 + $0x154] sm:$0xf] }
   0x7   :  { %v983_v6 = vld [vmem:[#allocation2 + $0x168] sm:$0xf0]  ;;  %v1174_v7 = vor.u32 %v1288_v4, %v1173_v2  ;;  %v1285_v9 = vld [vmem:[#allocation2 + $0x2d4] sm:$0xf]  ;;  %v957_v11 = vld [vmem:[#allocation2 + $0x120] sm:$0xf] }
   0x8   :  { %v986_v8 = vor.u32 %v1237_v5, %v983_v6  ;;  %v1175_v10 = vld [vmem:[#allocation2 + $0x2e8] sm:$0xf0]  ;;  %626 = vmatpush.bf16.msra.mxu0 %v982_v3  ;;  %v1234_v13 = vld [vmem:[#allocation2 + $0x134] sm:$0xf0]  ;;  %v1149_v14 = vld [vmem:[#allocation2 + $0x2a0] sm:$0xf] }
   0x9   :  { %v1178_v12 = vor.u32 %v1285_v9, %v1175_v10  ;;  %v1282_v15 = vld [vmem:[#allocation2 + $0x2b4] sm:$0xf0]  ;;  %640 = vmatpush.bf16.msra.mxu1 %v1174_v7  ;;  %v958_v16 = vor.u32 %v1234_v13, %v957_v11  ;;  %v1231_v18 = vld [vmem:[#allocation2 + $0x124] sm:$0xf]  ;;  %v959_v19 = vld [vmem:[#allocation2 + $0x138] sm:$0xf0] }
   0xa   :  { %654 = vmatpush.bf16.msra.mxu2 %v986_v8  ;;  %v1150_v17 = vor.u32 %v1282_v15, %v1149_v14  ;;  %v1279_v20 = vld [vmem:[#allocation2 + $0x2a4] sm:$0xf]  ;;  %v962_v21 = vor.u32 %v1231_v18, %v959_v19  ;;  %v1151_v22 = vld [vmem:[#allocation2 + $0x2b8] sm:$0xf0]  ;;  %v933_v23 = vld [vmem:[#allocation2 + $0xf0] sm:$0xf] }
   0xb   :  { %668 = vmatpush.bf16.msra.mxu3 %v1178_v12  ;;  %v1228_v24 = vld [vmem:[#allocation2 + $0x104] sm:$0xf0]  ;;  %v1154_v25 = vor.u32 %v1279_v20, %v1151_v22  ;;  %v1125_v26 = vld [vmem:[#allocation2 + $0x270] sm:$0xf]  ;;  %v1225_v28 = vld [vmem:[#allocation2 + $0xf4] sm:$0xf] }
   0xc   :  { %v1276_v27 = vld [vmem:[#allocation2 + $0x284] sm:$0xf0]  ;;  %627 = vmatpush.bf16.msra.mxu0 %v958_v16  ;;  %v934_v29 = vor.u32 %v1228_v24, %v933_v23  ;;  %v935_v30 = vld [vmem:[#allocation2 + $0x108] sm:$0xf0]  ;;  %v1273_v31 = vld [vmem:[#allocation2 + $0x274] sm:$0xf] }
   0xd   :  { %v1127_v32 = vld [vmem:[#allocation2 + $0x288] sm:$0xf0]  ;;  %641 = vmatpush.bf16.msra.mxu1 %v1150_v17  ;;  %v1126_v33 = vor.u32 %v1276_v27, %v1125_v26  ;;  %v938_v34 = vor.u32 %v1225_v28, %v935_v30  ;;  %v909_v35 = vld [vmem:[#allocation2 + $0xc0] sm:$0xf]  ;;  %v1222_v36 = vld [vmem:[#allocation2 + $0xd4] sm:$0xf0] }
   0xe   :  { %655 = vmatpush.bf16.msra.mxu2 %v962_v21  ;;  %v1101_v37 = vld [vmem:[#allocation2 + $0x240] sm:$0xf]  ;;  %v1130_v38 = vor.u32 %v1273_v31, %v1127_v32  ;;  %v1270_v39 = vld [vmem:[#allocation2 + $0x254] sm:$0xf0]  ;;  %v1219_v40 = vld [vmem:[#allocation2 + $0xc4] sm:$0xf]  ;;  %v910_v44 = vor.u32 %v1222_v36, %v909_v35 }
   0xf   :  { %669 = vmatpush.bf16.msra.mxu3 %v1154_v25  ;;  %v911_v41 = vld [vmem:[#allocation2 + $0xd8] sm:$0xf0]  ;;  %v1267_v42 = vld [vmem:[#allocation2 + $0x244] sm:$0xf]  ;;  %v1102_v45 = vor.u32 %v1270_v39, %v1101_v37  ;;  %v885_v47 = vld [vmem:[#allocation2 + $0x90] sm:$0xf] }
  0x10   :  { %v1103_v43 = vld [vmem:[#allocation2 + $0x258] sm:$0xf0]  ;;  %628 = vmatpush.bf16.msra.mxu0 %v934_v29  ;;  %v914_v46 = vor.u32 %v1219_v40, %v911_v41  ;;  %v1216_v48 = vld [vmem:[#allocation2 + $0xa4] sm:$0xf0]  ;;  %v1077_v49 = vld [vmem:[#allocation2 + $0x210] sm:$0xf] }
  0x11   :  { %642 = vmatpush.bf16.msra.mxu1 %v1126_v33  ;;  %v1106_v50 = vor.u32 %v1267_v42, %v1103_v43  ;;  %v1264_v51 = vld [vmem:[#allocation2 + $0x224] sm:$0xf0]  ;;  %v1213_v52 = vld [vmem:[#allocation2 + $0x94] sm:$0xf]  ;;  %v887_v53 = vld [vmem:[#allocation2 + $0xa8] sm:$0xf0]  ;;  %v886_v56 = vor.u32 %v1216_v48, %v885_v47 }
  0x12   :  { %656 = vmatpush.bf16.msra.mxu2 %v938_v34  ;;  %v1261_v54 = vld [vmem:[#allocation2 + $0x214] sm:$0xf]  ;;  %v1079_v55 = vld [vmem:[#allocation2 + $0x228] sm:$0xf0]  ;;  %v1078_v57 = vor.u32 %v1264_v51, %v1077_v49  ;;  %v890_v58 = vor.u32 %v1213_v52, %v887_v53  ;;  %v861_v59 = vld [vmem:[#allocation2 + $0x60] sm:$0xf] }
  0x13   :  { %670 = vmatpush.bf16.msra.mxu3 %v1130_v38  ;;  %v1210_v60 = vld [vmem:[#allocation2 + $0x74] sm:$0xf0]  ;;  %v1053_v61 = vld [vmem:[#allocation2 + $0x1e0] sm:$0xf]  ;;  %v1082_v62 = vor.u32 %v1261_v54, %v1079_v55  ;;  %v1207_v0 = vld [vmem:[#allocation2 + $0x64] sm:$0xf] }
  0x14   :  { %629 = vmatpush.bf16.msra.mxu0 %v910_v44  ;;  %v1258_v63 = vld [vmem:[#allocation2 + $0x1f4] sm:$0xf0]  ;;  %v863_v1 = vld [vmem:[#allocation2 + $0x78] sm:$0xf0]  ;;  %v1255_v2 = vld [vmem:[#allocation2 + $0x1e4] sm:$0xf]  ;;  %v862_v4 = vor.u32 %v1210_v60, %v861_v59 }
  0x15   :  { %643 = vmatpush.bf16.msra.mxu1 %v1102_v45  ;;  %v1055_v3 = vld [vmem:[#allocation2 + $0x1f8] sm:$0xf0]  ;;  %v1054_v5 = vor.u32 %v1258_v63, %v1053_v61  ;;  %v866_v6 = vor.u32 %v1207_v0, %v863_v1  ;;  %v837_v7 = vld [vmem:[#allocation2 + $0x30] sm:$0xf]  ;;  %v1204_v8 = vld [vmem:[#allocation2 + $0x44] sm:$0xf0] }
  0x16   :  { %657 = vmatpush.bf16.msra.mxu2 %v914_v46  ;;  %v1029_v9 = vld [vmem:[#allocation2 + $0x1b0] sm:$0xf]  ;;  %v1058_v10 = vor.u32 %v1255_v2, %v1055_v3  ;;  %v1252_v11 = vld [vmem:[#allocation2 + $0x1c4] sm:$0xf0]  ;;  %v1201_v12 = vld [vmem:[#allocation2 + $0x34] sm:$0xf]  ;;  %v838_v16 = vor.u32 %v1204_v8, %v837_v7 }
  0x17   :  { %671 = vmatpush.bf16.msra.mxu3 %v1106_v50  ;;  %v839_v13 = vld [vmem:[#allocation2 + $0x48] sm:$0xf0]  ;;  %v1249_v14 = vld [vmem:[#allocation2 + $0x1b4] sm:$0xf]  ;;  %v813_v17 = vld [vmem:[#allocation2] sm:$0xf]  ;;  %v1030_v19 = vor.u32 %v1252_v11, %v1029_v9 }
  0x18   :  { %630 = vmatpush.bf16.msra.mxu0 %v886_v56  ;;  %v1031_v15 = vld [vmem:[#allocation2 + $0x1c8] sm:$0xf0]  ;;  %v1198_v18 = vld [vmem:[#allocation2 + $0x14] sm:$0xf0]  ;;  %v842_v20 = vor.u32 %v1201_v12, %v839_v13  ;;  %v1005_v21 = vld [vmem:[#allocation2 + $0x180] sm:$0xf] }
  0x19   :  { %644 = vmatpush.bf16.msra.mxu1 %v1078_v57  ;;  %v1246_v22 = vld [vmem:[#allocation2 + $0x194] sm:$0xf0]  ;;  %v1195_v23 = vld [vmem:[#allocation2 + $0x4] sm:$0xf]  ;;  %v1034_v24 = vor.u32 %v1249_v14, %v1031_v15  ;;  %v815_v25 = vld [vmem:[#allocation2 + $0x18] sm:$0xf0]  ;;  %v814_v31 = vor.u32 %v1198_v18, %v813_v17 }
  0x1a   :  { %658 = vmatpush.bf16.msra.mxu2 %v890_v58  ;;  %v1243_v26 = vld [vmem:[#allocation2 + $0x184] sm:$0xf]  ;;  %v1007_v27 = vld [vmem:[#allocation2 + $0x198] sm:$0xf0]  ;;  %v989_v28 = vld [vmem:[#allocation2 + $0x158] sm:$0xf]  ;;  %v1006_v35 = vor.u32 %v1246_v22, %v1005_v21  ;;  %v818_v36 = vor.u32 %v1195_v23, %v815_v25 }
  0x1b   :  { %672 = vmatpush.bf16.msra.mxu3 %v1082_v62  ;;  %v1241_v29 = vld [vmem:[#allocation2 + $0x16c] sm:$0xf0]  ;;  %v1181_v30 = vld [vmem:[#allocation2 + $0x2d8] sm:$0xf]  ;;  %v1238_v33 = vld [vmem:[#allocation2 + $0x15c] sm:$0xf]  ;;  %v1010_v39 = vor.u32 %v1243_v26, %v1007_v27 }
  0x1c   :  { %631 = vmatpush.bf16.msra.mxu0 %v862_v4  ;;  %v1289_v32 = vld [vmem:[#allocation2 + $0x2ec] sm:$0xf0]  ;;  %v991_v34 = vld [vmem:[#allocation2 + $0x170] sm:$0xf0]  ;;  %v1286_v37 = vld [vmem:[#allocation2 + $0x2dc] sm:$0xf]  ;;  %v990_v40 = vor.u32 %v1241_v29, %v989_v28 }
  0x1d   :  { %645 = vmatpush.bf16.msra.mxu1 %v1054_v5  ;;  %v1183_v38 = vld [vmem:[#allocation2 + $0x2f0] sm:$0xf0]  ;;  %v1182_v41 = vor.u32 %v1289_v32, %v1181_v30  ;;  %v994_v42 = vor.u32 %v1238_v33, %v991_v34  ;;  %v965_v43 = vld [vmem:[#allocation2 + $0x128] sm:$0xf]  ;;  %v1235_v44 = vld [vmem:[#allocation2 + $0x13c] sm:$0xf0] }
  0x1e   :  { %659 = vmatpush.bf16.msra.mxu2 %v866_v6  ;;  %v1157_v45 = vld [vmem:[#allocation2 + $0x2a8] sm:$0xf]  ;;  %v1186_v46 = vor.u32 %v1286_v37, %v1183_v38  ;;  %v1283_v47 = vld [vmem:[#allocation2 + $0x2bc] sm:$0xf0]  ;;  %v1232_v48 = vld [vmem:[#allocation2 + $0x12c] sm:$0xf]  ;;  %v966_v52 = vor.u32 %v1235_v44, %v965_v43 }
  0x1f   :  { %673 = vmatpush.bf16.msra.mxu3 %v1058_v10  ;;  %v967_v49 = vld [vmem:[#allocation2 + $0x140] sm:$0xf0]  ;;  %v1280_v50 = vld [vmem:[#allocation2 + $0x2ac] sm:$0xf]  ;;  %v941_v53 = vld [vmem:[#allocation2 + $0xf8] sm:$0xf]  ;;  %v1158_v55 = vor.u32 %v1283_v47, %v1157_v45 }
  0x20   :  { %632 = vmatpush.bf16.msra.mxu0 %v838_v16  ;;  %v1159_v51 = vld [vmem:[#allocation2 + $0x2c0] sm:$0xf0]  ;;  %v1229_v54 = vld [vmem:[#allocation2 + $0x10c] sm:$0xf0]  ;;  %v970_v56 = vor.u32 %v1232_v48, %v967_v49  ;;  %v1133_v57 = vld [vmem:[#allocation2 + $0x278] sm:$0xf] }
  0x21   :  { %646 = vmatpush.bf16.msra.mxu1 %v1030_v19  ;;  %v1277_v58 = vld [vmem:[#allocation2 + $0x28c] sm:$0xf0]  ;;  %v30_v59 = vld [vmem:[%s1395_s0] sm:$0xff]  ;;  %v1162_v60 = vor.u32 %v1280_v50, %v1159_v51  ;;  %v1226_v61 = vld [vmem:[#allocation2 + $0xfc] sm:$0xf]  ;;  %v942_v3 = vor.u32 %v1229_v54, %v941_v53 }
  0x22   :  { %660 = vmatpush.bf16.msra.mxu2 %v842_v20  ;;  %v943_v62 = vld [vmem:[#allocation2 + $0x110] sm:$0xf0]  ;;  %v1274_v0 = vld [vmem:[#allocation2 + $0x27c] sm:$0xf]  ;;  %v917_v4 = vld [vmem:[#allocation2 + $0xc8] sm:$0xf]  ;;  %v1134_v6 = vor.u32 %v1277_v58, %v1133_v57 }
  0x23   :  { %674 = vmatpush.bf16.msra.mxu3 %v1034_v24  ;;  %v32_v63 = vld [vmem:[%s1395_s0 + $0x10] sm:$0xff]  ;;  %v1223_v5 = vld [vmem:[#allocation2 + $0xdc] sm:$0xf0]  ;;  %v946_v7 = vor.u32 %v1226_v61, %v943_v62  ;;  %v1109_v8 = vld [vmem:[#allocation2 + $0x248] sm:$0xf] }
  0x24   :  { %633 = vmatpush.bf16.msra.mxu0 %v814_v31  ;;  %v1135_v1 = vld [vmem:[#allocation2 + $0x290] sm:$0xf0]  ;;  %v1352_v2 = vpack.c.bf16 %v32_v63, %v30_v59  ;;  %v31_v9 = vld [vmem:[%s1395_s0 + $0x8] sm:$0xff]  ;;  %v33_v10 = vld [vmem:[%s1395_s0 + $0x18] sm:$0xff]  ;;  %v918_v18 = vor.u32 %v1223_v5, %v917_v4 }
  0x25   :  { %647 = vmatpush.bf16.msra.mxu1 %v1006_v35  ;;  %v1138_v11 = vor.u32 %v1274_v0, %v1135_v1  ;;  %v1271_v12 = vld [vmem:[#allocation2 + $0x25c] sm:$0xf0]  ;;  %v1220_v13 = vld [vmem:[#allocation2 + $0xcc] sm:$0xf]  ;;  %v919_v14 = vld [vmem:[#allocation2 + $0xe0] sm:$0xf0]  ;;  %v1361_v15 = vpack.c.bf16 %v33_v10, %v31_v9 }
  0x26   :  { %661 = vmatpush.bf16.msra.mxu2 %v818_v36  ;;  %v1268_v16 = vld [vmem:[#allocation2 + $0x24c] sm:$0xf]  ;;  %v1111_v17 = vld [vmem:[#allocation2 + $0x260] sm:$0xf0]  ;;  %v1110_v19 = vor.u32 %v1271_v12, %v1109_v8  ;;  %v922_v20 = vor.u32 %v1220_v13, %v919_v14  ;;  %v893_v21 = vld [vmem:[#allocation2 + $0x98] sm:$0xf] }
  0x27   :  { %675 = vmatpush.bf16.msra.mxu3 %v1010_v39  ;;  %634 = vmatmul.bf16.vlgmr.msra.gmra.mxu0 %v1352_v2  ;;  %v1217_v22 = vld [vmem:[#allocation2 + $0xac] sm:$0xf0]  ;;  %v1085_v23 = vld [vmem:[#allocation2 + $0x218] sm:$0xf]  ;;  %v1114_v24 = vor.u32 %v1268_v16, %v1111_v17  ;;  %v1214_v26 = vld [vmem:[#allocation2 + $0x9c] sm:$0xf] }
  0x28   :  { %682 = vmatpush.bf16.msrb.mxu0 %v990_v40  ;;  %v1265_v25 = vld [vmem:[#allocation2 + $0x22c] sm:$0xf0]  ;;  %v895_v27 = vld [vmem:[#allocation2 + $0xb0] sm:$0xf0]  ;;  %648 = vmatmul.bf16.vlgmr.msra.gmra.mxu1 %v1361_v15  ;;  %v1262_v28 = vld [vmem:[#allocation2 + $0x21c] sm:$0xf]  ;;  %v894_v30 = vor.u32 %v1217_v22, %v893_v21 }
  0x29   :  { %696 = vmatpush.bf16.msrb.mxu1 %v1182_v41  ;;  %662 = vmatmul.bf16.vlgmr.msra.gmra.mxu2 %v1352_v2  ;;  %v1087_v29 = vld [vmem:[#allocation2 + $0x230] sm:$0xf0]  ;;  %v1086_v31 = vor.u32 %v1265_v25, %v1085_v23  ;;  %v898_v32 = vor.u32 %v1214_v26, %v895_v27  ;;  %v869_v33 = vld [vmem:[#allocation2 + $0x68] sm:$0xf]  ;;  %v1211_v34 = vld [vmem:[#allocation2 + $0x7c] sm:$0xf0] }
  0x2a   :  { %710 = vmatpush.bf16.msrb.mxu2 %v994_v42  ;;  %676 = vmatmul.bf16.vlgmr.msra.gmra.mxu3 %v1361_v15  ;;  %v1061_v35 = vld [vmem:[#allocation2 + $0x1e8] sm:$0xf]  ;;  %v1090_v36 = vor.u32 %v1262_v28, %v1087_v29  ;;  %v1259_v37 = vld [vmem:[#allocation2 + $0x1fc] sm:$0xf0]  ;;  %v1208_v38 = vld [vmem:[#allocation2 + $0x6c] sm:$0xf]  ;;  %v870_v42 = vor.u32 %v1211_v34, %v869_v33 }
  0x2b   :  { %724 = vmatpush.bf16.msrb.mxu3 %v1186_v46  ;;  %v871_v39 = vld [vmem:[#allocation2 + $0x80] sm:$0xf0]  ;;  %v1256_v40 = vld [vmem:[#allocation2 + $0x1ec] sm:$0xf]  ;;  %v1062_v43 = vor.u32 %v1259_v37, %v1061_v35  ;;  %v845_v45 = vld [vmem:[#allocation2 + $0x38] sm:$0xf] }
  0x2c   :  { %683 = vmatpush.bf16.msrb.mxu0 %v966_v52  ;;  %v1063_v41 = vld [vmem:[#allocation2 + $0x200] sm:$0xf0]  ;;  %v874_v44 = vor.u32 %v1208_v38, %v871_v39  ;;  %v1205_v46 = vld [vmem:[#allocation2 + $0x4c] sm:$0xf0]  ;;  %v1037_v47 = vld [vmem:[#allocation2 + $0x1b8] sm:$0xf] }
  0x2d   :  { %697 = vmatpush.bf16.msrb.mxu1 %v1158_v55  ;;  %v1066_v48 = vor.u32 %v1256_v40, %v1063_v41  ;;  %v1253_v49 = vld [vmem:[#allocation2 + $0x1cc] sm:$0xf0]  ;;  %v1202_v50 = vld [vmem:[#allocation2 + $0x3c] sm:$0xf]  ;;  %v847_v51 = vld [vmem:[#allocation2 + $0x50] sm:$0xf0]  ;;  %v846_v54 = vor.u32 %v1205_v46, %v845_v45 }
  0x2e   :  { %711 = vmatpush.bf16.msrb.mxu2 %v970_v56  ;;  %v1250_v52 = vld [vmem:[#allocation2 + $0x1bc] sm:$0xf]  ;;  %v1039_v53 = vld [vmem:[#allocation2 + $0x1d0] sm:$0xf0]  ;;  %v821_v55 = vld [vmem:[#allocation2 + $0x8] sm:$0xf]  ;;  %v1038_v57 = vor.u32 %v1253_v49, %v1037_v47  ;;  %v850_v58 = vor.u32 %v1202_v50, %v847_v51 }
  0x2f   :  { %725 = vmatpush.bf16.msrb.mxu3 %v1162_v60  ;;  %v1199_v56 = vld [vmem:[#allocation2 + $0x1c] sm:$0xf0]  ;;  %v1013_v59 = vld [vmem:[#allocation2 + $0x188] sm:$0xf]  ;;  %v1196_v61 = vld [vmem:[#allocation2 + $0xc] sm:$0xf]  ;;  %v1042_v62 = vor.u32 %v1250_v52, %v1039_v53 }
  0x30   :  { %684 = vmatpush.bf16.msrb.mxu0 %v942_v3  ;;  %v1247_v60 = vld [vmem:[#allocation2 + $0x19c] sm:$0xf0]  ;;  %v823_v63 = vld [vmem:[#allocation2 + $0x20] sm:$0xf0]  ;;  %v1244_v0 = vld [vmem:[#allocation2 + $0x18c] sm:$0xf] }
  0x31   :  { %698 = vmatpush.bf16.msrb.mxu1 %v1134_v6  ;;  %v1015_v1 = vld [vmem:[#allocation2 + $0x1a0] sm:$0xf0]  ;;  %v997_v3 = vld [vmem:[#allocation2 + $0x160] sm:$0xf]  ;;  %v1242_v4 = vld [vmem:[#allocation2 + $0x174] sm:$0xf0]  ;;  %v822_v6 = vor.u32 %v1199_v56, %v821_v55  ;;  %v1014_v10 = vor.u32 %v1247_v60, %v1013_v59 }
  0x32   :  { %712 = vmatpush.bf16.msrb.mxu2 %v946_v7  ;;  %v1189_v5 = vld [vmem:[#allocation2 + $0x2e0] sm:$0xf]  ;;  %v1290_v7 = vld [vmem:[#allocation2 + $0x2f4] sm:$0xf0]  ;;  %v1239_v8 = vld [vmem:[#allocation2 + $0x164] sm:$0xf]  ;;  %v1018_v14 = vor.u32 %v1244_v0, %v1015_v1  ;;  %v998_v16 = vor.u32 %v1242_v4, %v997_v3 }
  0x33   :  { %726 = vmatpush.bf16.msrb.mxu3 %v1138_v11  ;;  %v999_v9 = vld [vmem:[#allocation2 + $0x178] sm:$0xf0]  ;;  %v826_v11 = vor.u32 %v1196_v61, %v823_v63  ;;  %v1287_v12 = vld [vmem:[#allocation2 + $0x2e4] sm:$0xf]  ;;  %v1190_v17 = vor.u32 %v1290_v7, %v1189_v5  ;;  %v1165_v21 = vld [vmem:[#allocation2 + $0x2b0] sm:$0xf] }
  0x34   :  { %685 = vmatpush.bf16.msrb.mxu0 %v918_v18  ;;  %v1191_v13 = vld [vmem:[#allocation2 + $0x2f8] sm:$0xf0]  ;;  %v1002_v18 = vor.u32 %v1239_v8, %v999_v9  ;;  %v1284_v23 = vld [vmem:[#allocation2 + $0x2c4] sm:$0xf0]  ;;  %v975_v25 = vld [vmem:[#allocation2 + $0x148] sm:$0xf0] }
  0x35   :  { %699 = vmatpush.bf16.msrb.mxu1 %v1110_v19  ;;  %v973_v19 = vld [vmem:[#allocation2 + $0x130] sm:$0xf]  ;;  %v1194_v22 = vor.u32 %v1287_v12, %v1191_v13  ;;  %v1281_v26 = vld [vmem:[#allocation2 + $0x2b4] sm:$0xf]  ;;  %v1167_v27 = vld [vmem:[#allocation2 + $0x2c8] sm:$0xf0]  ;;  %v1166_v29 = vor.u32 %v1284_v23, %v1165_v21 }
  0x36   :  { %713 = vmatpush.bf16.msrb.mxu2 %v922_v20  ;;  %v1236_v20 = vld [vmem:[#allocation2 + $0x144] sm:$0xf0]  ;;  %v1141_v33 = vld [vmem:[#allocation2 + $0x280] sm:$0xf]  ;;  %v1170_v34 = vor.u32 %v1281_v26, %v1167_v27  ;;  %v1278_v35 = vld [vmem:[#allocation2 + $0x294] sm:$0xf0] }
  0x37   :  { %727 = vmatpush.bf16.msrb.mxu3 %v1114_v24  ;;  %v1233_v24 = vld [vmem:[#allocation2 + $0x134] sm:$0xf]  ;;  %v974_v28 = vor.u32 %v1236_v20, %v973_v19  ;;  %v951_v37 = vld [vmem:[#allocation2 + $0x118] sm:$0xf0]  ;;  %v1275_v38 = vld [vmem:[#allocation2 + $0x284] sm:$0xf]  ;;  %v1142_v41 = vor.u32 %v1278_v35, %v1141_v33 }
  0x38   :  { %686 = vmatpush.bf16.msrb.mxu0 %v894_v30  ;;  %v978_v30 = vor.u32 %v1233_v24, %v975_v25  ;;  %v1143_v39 = vld [vmem:[#allocation2 + $0x298] sm:$0xf0]  ;;  %v1117_v45 = vld [vmem:[#allocation2 + $0x250] sm:$0xf]  ;;  %v1272_v47 = vld [vmem:[#allocation2 + $0x264] sm:$0xf0] }
  0x39   :  { %700 = vmatpush.bf16.msrb.mxu1 %v1086_v31  ;;  %v949_v31 = vld [vmem:[#allocation2 + $0x100] sm:$0xf]  ;;  %v1146_v46 = vor.u32 %v1275_v38, %v1143_v39  ;;  %v927_v49 = vld [vmem:[#allocation2 + $0xe8] sm:$0xf0]  ;;  %v1269_v50 = vld [vmem:[#allocation2 + $0x254] sm:$0xf]  ;;  %v1118_v53 = vor.u32 %v1272_v47, %v1117_v45 }
  0x3a   :  { %714 = vmatpush.bf16.msrb.mxu2 %v898_v32  ;;  %v1230_v32 = vld [vmem:[#allocation2 + $0x114] sm:$0xf0]  ;;  %v1119_v51 = vld [vmem:[#allocation2 + $0x268] sm:$0xf0]  ;;  %v901_v55 = vld [vmem:[#allocation2 + $0xa0] sm:$0xf] }
  0x3b   :  { %728 = vmatpush.bf16.msrb.mxu3 %v1090_v36  ;;  %v1227_v36 = vld [vmem:[#allocation2 + $0x104] sm:$0xf]  ;;  %v950_v40 = vor.u32 %v1230_v32, %v949_v31  ;;  %v1218_v56 = vld [vmem:[#allocation2 + $0xb4] sm:$0xf0]  ;;  %v903_v61 = vld [vmem:[#allocation2 + $0xb8] sm:$0xf0] }
  0x3c   :  { %687 = vmatpush.bf16.msrb.mxu0 %v870_v42  ;;  %v954_v42 = vor.u32 %v1227_v36, %v951_v37  ;;  %v1266_v59 = vld [vmem:[#allocation2 + $0x234] sm:$0xf0]  ;;  %v1215_v60 = vld [vmem:[#allocation2 + $0xa4] sm:$0xf]  ;;  %v1095_v63 = vld [vmem:[#allocation2 + $0x238] sm:$0xf0]  ;;  %v902_v0 = vor.u32 %v1218_v56, %v901_v55 }
  0x3d   :  { %701 = vmatpush.bf16.msrb.mxu1 %v1062_v43  ;;  %v925_v43 = vld [vmem:[#allocation2 + $0xd0] sm:$0xf]  ;;  %v906_v3 = vor.u32 %v1215_v60, %v903_v61  ;;  %v1212_v5 = vld [vmem:[#allocation2 + $0x84] sm:$0xf0]  ;;  %v1209_v9 = vld [vmem:[#allocation2 + $0x74] sm:$0xf] }
  0x3e   :  { %715 = vmatpush.bf16.msrb.mxu2 %v874_v44  ;;  %v1224_v44 = vld [vmem:[#allocation2 + $0xe4] sm:$0xf0]  ;;  %v877_v4 = vld [vmem:[#allocation2 + $0x70] sm:$0xf]  ;;  %v1071_v12 = vld [vmem:[#allocation2 + $0x208] sm:$0xf0] }
  0x3f   :  { %729 = vmatpush.bf16.msrb.mxu3 %v1066_v48  ;;  %v1221_v48 = vld [vmem:[#allocation2 + $0xd4] sm:$0xf]  ;;  %v926_v52 = vor.u32 %v1224_v44, %v925_v43  ;;  %v1260_v8 = vld [vmem:[#allocation2 + $0x204] sm:$0xf0]  ;;  %v878_v13 = vor.u32 %v1212_v5, %v877_v4  ;;  %v1045_v19 = vld [vmem:[#allocation2 + $0x1c0] sm:$0xf] }
  0x40   :  { %688 = vmatpush.bf16.msrb.mxu0 %v846_v54  ;;  %v930_v54 = vor.u32 %v1221_v48, %v927_v49  ;;  %v1254_v21 = vld [vmem:[#allocation2 + $0x1d4] sm:$0xf0]  ;;  %v855_v23 = vld [vmem:[#allocation2 + $0x58] sm:$0xf0]  ;;  %v1251_v24 = vld [vmem:[#allocation2 + $0x1c4] sm:$0xf] }
  0x41   :  { %702 = vmatpush.bf16.msrb.mxu1 %v1038_v57  ;;  %v1093_v57 = vld [vmem:[#allocation2 + $0x220] sm:$0xf]  ;;  %v1047_v25 = vld [vmem:[#allocation2 + $0x1d8] sm:$0xf0]  ;;  %v1046_v27 = vor.u32 %v1254_v21, %v1045_v19  ;;  %v1021_v31 = vld [vmem:[#allocation2 + $0x190] sm:$0xf] }
  0x42   :  { %716 = vmatpush.bf16.msrb.mxu2 %v850_v58  ;;  %v1122_v58 = vor.u32 %v1269_v50, %v1119_v51  ;;  %v1094_v1 = vor.u32 %v1266_v59, %v1093_v57  ;;  %v1050_v32 = vor.u32 %v1251_v24, %v1047_v25  ;;  %v1248_v33 = vld [vmem:[#allocation2 + $0x1a4] sm:$0xf0]  ;;  %v831_v35 = vld [vmem:[#allocation2 + $0x28] sm:$0xf0]  ;;  %v1245_v36 = vld [vmem:[#allocation2 + $0x194] sm:$0xf] }
  0x43   :  { %730 = vmatpush.bf16.msrb.mxu3 %v1042_v62  ;;  %v1263_v62 = vld [vmem:[#allocation2 + $0x224] sm:$0xf]  ;;  %v1023_v37 = vld [vmem:[#allocation2 + $0x1a8] sm:$0xf0]  ;;  %v1022_v39 = vor.u32 %v1248_v33, %v1021_v31 }
  0x44   :  { %689 = vmatpush.bf16.msrb.mxu0 %v822_v6  ;;  %v1069_v6 = vld [vmem:[#allocation2 + $0x1f0] sm:$0xf]  ;;  %v1098_v7 = vor.u32 %v1263_v62, %v1095_v63 }
  0x45   :  { %703 = vmatpush.bf16.msrb.mxu1 %v1014_v10  ;;  %v879_v10 = vld [vmem:[#allocation2 + $0x88] sm:$0xf0] }
  0x46   :  { %717 = vmatpush.bf16.msrb.mxu2 %v826_v11  ;;  %v1257_v11 = vld [vmem:[#allocation2 + $0x1f4] sm:$0xf] }
  0x47   :  { %731 = vmatpush.bf16.msrb.mxu3 %v1018_v14  ;;  %690 = vmatmul.bf16.vlgmr.msrb.gmra.mxu0 %v1352_v2  ;;  %v1070_v14 = vor.u32 %v1260_v8, %v1069_v6  ;;  %v1074_v20 = vor.u32 %v1257_v11, %v1071_v12 }
  0x48   :  { %738 = vmatpush.bf16.msra.mxu0 %v998_v16  ;;  %704 = vmatmul.bf16.vlgmr.msrb.gmra.mxu1 %v1361_v15  ;;  %v882_v16 = vor.u32 %v1209_v9, %v879_v10 }
  0x49   :  { %752 = vmatpush.bf16.msra.mxu1 %v1190_v17  ;;  %718 = vmatmul.bf16.vlgmr.msrb.gmra.mxu2 %v1352_v2  ;;  %v853_v17 = vld [vmem:[#allocation2 + $0x40] sm:$0xf] }
  0x4a   :  { %766 = vmatpush.bf16.msra.mxu2 %v1002_v18  ;;  %732 = vmatmul.bf16.vlgmr.msrb.gmra.mxu3 %v1361_v15  ;;  %v1206_v18 = vld [vmem:[#allocation2 + $0x54] sm:$0xf0] }
  0x4b   :  { %780 = vmatpush.bf16.msra.mxu3 %v1194_v22  ;;  %v1203_v22 = vld [vmem:[#allocation2 + $0x44] sm:$0xf]  ;;  %v854_v26 = vor.u32 %v1206_v18, %v853_v17 }
  0x4c   :  { %739 = vmatpush.bf16.msra.mxu0 %v974_v28  ;;  %v858_v28 = vor.u32 %v1203_v22, %v855_v23 }
  0x4d   :  { %753 = vmatpush.bf16.msra.mxu1 %v1166_v29  ;;  %v829_v29 = vld [vmem:[#allocation2 + $0x10] sm:$0xf] }
  0x4e   :  { %767 = vmatpush.bf16.msra.mxu2 %v978_v30  ;;  %v1200_v30 = vld [vmem:[#allocation2 + $0x24] sm:$0xf0] }
  0x4f   :  { %781 = vmatpush.bf16.msra.mxu3 %v1170_v34  ;;  %v1197_v34 = vld [vmem:[#allocation2 + $0x14] sm:$0xf]  ;;  %v830_v38 = vor.u32 %v1200_v30, %v829_v29 }
  0x50   :  { %740 = vmatpush.bf16.msra.mxu0 %v950_v40  ;;  %v834_v40 = vor.u32 %v1197_v34, %v831_v35 }
  0x51   :  { %754 = vmatpush.bf16.msra.mxu1 %v1142_v41  ;;  %v1026_v41 = vor.u32 %v1245_v36, %v1023_v37 }
  0x52   :  { %768 = vmatpush.bf16.msra.mxu2 %v954_v42  ;;  %v132_v42 = vld [vmem:[%s1397_s2] sm:$0x3f] }
  0x53   :  { %782 = vmatpush.bf16.msra.mxu3 %v1146_v46  ;;  %v134_v43 = vperm.slane %v132_v42, 0  ;;  %v135_v46 = vperm.slane %v132_v42, 1  ;;  %v136_v61 = vperm.slane %v132_v42, 2  ;;  %v138_v19 = vperm.slane %v132_v42, 4 }
  0x54   :  { %741 = vmatpush.bf16.msra.mxu0 %v926_v52  ;;  %v139_v22 = vperm.slane %v132_v42, 5 }
  0x55   :  { %755 = vmatpush.bf16.msra.mxu1 %v1118_v53 }
  0x56   :  { %769 = vmatpush.bf16.msra.mxu2 %v930_v54 }
  0x57   :  { %783 = vmatpush.bf16.msra.mxu3 %v1122_v58 }
  0x58   :  { %742 = vmatpush.bf16.msra.mxu0 %v902_v0 }
  0x59   :  { %756 = vmatpush.bf16.msra.mxu1 %v1094_v1  ;;  %v137_v1 = vperm.slane %v132_v42, 3 }
  0x5a   :  { %770 = vmatpush.bf16.msra.mxu2 %v906_v3 }
  0x5b   :  { %784 = vmatpush.bf16.msra.mxu3 %v1098_v7 }
  0x5c   :  { %743 = vmatpush.bf16.msra.mxu0 %v878_v13 }
  0x5d   :  { %757 = vmatpush.bf16.msra.mxu1 %v1070_v14 }
  0x5e   :  { %771 = vmatpush.bf16.msra.mxu2 %v882_v16 }
  0x5f   :  { %785 = vmatpush.bf16.msra.mxu3 %v1074_v20 }
  0x60   :  { %744 = vmatpush.bf16.msra.mxu0 %v854_v26 }
  0x61   :  { %758 = vmatpush.bf16.msra.mxu1 %v1046_v27 }
  0x62   :  { %772 = vmatpush.bf16.msra.mxu2 %v858_v28 }
  0x63   :  { %786 = vmatpush.bf16.msra.mxu3 %v1050_v32 }
  0x64   :  { %745 = vmatpush.bf16.msra.mxu0 %v830_v38 }
  0x65   :  { %759 = vmatpush.bf16.msra.mxu1 %v1022_v39 }
  0x66   :  { %773 = vmatpush.bf16.msra.mxu2 %v834_v40 }
  0x67   :  { %787 = vmatpush.bf16.msra.mxu3 %v1026_v41  ;;  %746 = vmatmul.bf16.vlgmr.msra.gmra.mxu0 %v1352_v2 }
  0x68   :  { %760 = vmatmul.bf16.vlgmr.msra.gmra.mxu1 %v1361_v15 }
  0x69   :  { %774 = vmatmul.bf16.vlgmr.msra.gmra.mxu2 %v1352_v2 }
  0x6a   :  { %788 = vmatmul.bf16.vlgmr.msra.gmra.mxu3 %v1361_v15 }
  0xa4   :  { %v635_v44 = vpop.f32.mrf.mxu0 }
  0xa5   :  { %v636_v45 = vadd.f32 %v635_v44, %v134_v43  ;;  %v649_v47 = vpop.f32.mrf.mxu1 }
  0xa7   :  { %v650_v50 = vadd.f32 %v649_v47, %v636_v45 }
  0xac   :  { %v663_v48 = vpop.f32.mrf.mxu2  ;;  %v637_v53 = vpop.f32.mrf.mxu0 }
  0xad   :  { %v664_v49 = vadd.f32 %v663_v48, %v135_v46  ;;  %v677_v51 = vpop.f32.mrf.mxu3  ;;  %v638_v55 = vadd.f32 %v637_v53, %v134_v43  ;;  %v651_v2 = vpop.f32.mrf.mxu1 }
  0xaf   :  { %v678_v52 = vadd.f32 %v677_v51, %v664_v49  ;;  %v652_v57 = vadd.f32 %v651_v2, %v638_v55 }
  0xb1   :  { %v794_v54 = vpack.c.bf16 %v678_v52, %v650_v50 }
  0xb3   :  { %800 = vst [vmem:[%s1398_s3] sm:$0xff] %v794_v54 }
  0xb4   :  { %v665_v15 = vpop.f32.mrf.mxu2 }
  0xb5   :  { %v666_v56 = vadd.f32 %v665_v15, %v135_v46  ;;  %v679_v58 = vpop.f32.mrf.mxu3 }
  0xb7   :  { %v680_v59 = vadd.f32 %v679_v58, %v666_v56 }
  0xb9   :  { %v797_v60 = vpack.c.bf16 %v680_v59, %v652_v57 }
  0xbb   :  { %803 = vst [vmem:[%s1398_s3 + $0x18] sm:$0xff] %v797_v60 }
  0xc4   :  { %v691_v62 = vpop.f32.mrf.mxu0 }
  0xc5   :  { %v705_v63 = vpop.f32.mrf.mxu1  ;;  %v692_v0 = vadd.f32 %v691_v62, %v136_v61 }
  0xc7   :  { %v706_v5 = vadd.f32 %v705_v63, %v692_v0 }
  0xcc   :  { %v719_v3 = vpop.f32.mrf.mxu2  ;;  %v693_v8 = vpop.f32.mrf.mxu0 }
  0xcd   :  { %v720_v4 = vadd.f32 %v719_v3, %v137_v1  ;;  %v733_v6 = vpop.f32.mrf.mxu3  ;;  %v694_v10 = vadd.f32 %v693_v8, %v136_v61  ;;  %v707_v11 = vpop.f32.mrf.mxu1 }
  0xcf   :  { %v734_v7 = vadd.f32 %v733_v6, %v720_v4  ;;  %v708_v14 = vadd.f32 %v707_v11, %v694_v10 }
  0xd1   :  { %v795_v9 = vpack.c.bf16 %v734_v7, %v706_v5 }
  0xd3   :  { %801 = vst [vmem:[%s1398_s3 + $0x8] sm:$0xff] %v795_v9 }
  0xd4   :  { %v721_v12 = vpop.f32.mrf.mxu2 }
  0xd5   :  { %v722_v13 = vadd.f32 %v721_v12, %v137_v1  ;;  %v735_v16 = vpop.f32.mrf.mxu3 }
  0xd7   :  { %v736_v17 = vadd.f32 %v735_v16, %v722_v13 }
  0xd9   :  { %v798_v18 = vpack.c.bf16 %v736_v17, %v708_v14 }
  0xdb   :  { %804 = vst [vmem:[%s1398_s3 + $0x20] sm:$0xff] %v798_v18 }
  0xe4   :  { %v747_v20 = vpop.f32.mrf.mxu0 }
  0xe5   :  { %v748_v21 = vadd.f32 %v747_v20, %v138_v19  ;;  %v761_v23 = vpop.f32.mrf.mxu1 }
  0xe7   :  { %v762_v25 = vadd.f32 %v761_v23, %v748_v21 }
  0xec   :  { %v775_v24 = vpop.f32.mrf.mxu2  ;;  %v749_v29 = vpop.f32.mrf.mxu0 }
  0xed   :  { %v776_v26 = vadd.f32 %v775_v24, %v139_v22  ;;  %v789_v27 = vpop.f32.mrf.mxu3  ;;  %v750_v31 = vadd.f32 %v749_v29, %v138_v19  ;;  %v763_v34 = vpop.f32.mrf.mxu1 }
  0xef   :  { %v790_v28 = vadd.f32 %v789_v27, %v776_v26  ;;  %v764_v36 = vadd.f32 %v763_v34, %v750_v31 }
  0xf1   :  { %v796_v30 = vpack.c.bf16 %v790_v28, %v762_v25 }
  0xf3   :  { %802 = vst [vmem:[%s1398_s3 + $0x10] sm:$0xff] %v796_v30 }
  0xf4   :  { %v777_v32 = vpop.f32.mrf.mxu2 }
  0xf5   :  { %v778_v33 = vadd.f32 %v777_v32, %v139_v22  ;;  %v791_v35 = vpop.f32.mrf.mxu3 }
  0xf7   :  { %v792_v37 = vadd.f32 %v791_v35, %v778_v33 }
  0xf9   :  { %v799_v38 = vpack.c.bf16 %v792_v37, %v764_v36 }
  0xfb   :  { %805 = vst [vmem:[%s1398_s3 + $0x28] sm:$0xff] %v799_v38 }
  0xfc   :  { %810 = vsyncpa [#allocation3], 1 }

// kernel: bert_lstm_forward.19
= control target key start
LH: loop header
LB: loop body
LE: loop exit
PB: predicated region body
PF: predicated region fallthrough
CT: control target
= control target key end

     0   :  { %11 = vsyncpa [#allocation3], 0  ;;  %s1035_s24 = smov [#allocation2]   ;;  %s1036_s26 = smov 128   ;;  %s1150_s0 = inlined_call_operand.vmem [shape: bf16[16,512], index: 0, kind: input, shape index: {}]   ;;  %s1151_s1 = inlined_call_operand.hbm [shape: bf16[512,256], index: 1, kind: input, shape index: {}]   ;;  %s1152_s2 = inlined_call_operand.vmem [shape: f32[1,256], index: 2, kind: input, shape index: {}]   ;;  %s1153_s3 = inlined_call_operand.vmem [shape: f32[16,256], index: 3, kind: input, shape index: {}]   ;;  %s1154_s4 = inlined_call_operand.vmem [shape: f32[1,256], index: 4, kind: input, shape index: {}]   ;;  %s1155_s5 = inlined_call_operand.vmem [shape: f32[1,256], index: 5, kind: input, shape index: {}]   ;;  %s1156_s6 = inlined_call_operand.vmem [shape: f32[16,256], index: 6, kind: output, shape index: {}]  }
   0x1   :  { %s18_s23 = sshll.u32 %s1151_s1, 4  ;;  %s20_s25 = sshll.u32 %s1035_s24, 4  ;;  %s19_s23 = int_to_ptr.hbm [resolvable:$true] %s18_s23  ;;  %s21_s25 = int_to_ptr.vmem [resolvable:$true] %s20_s25 }
   0x2   :  { %s1037_s27 = smov 8  }
   0x3   :  { %26 = dma.hbm_to_vmem [thread:$0]  %s19_s23, 8192, %s21_s25, [#allocation3], %s1036_s26, %s1036_s26, %s1037_s27  }
   0x4   :  { %1033 = dma.done.wait [#allocation3], 8192  }
   0x5   :  { %1034 = vsyncadd [#allocation3], 4294959104  ;;  %v733_v0 = vld [vmem:[#allocation2 + $0x70] sm:$0xf]  ;;  %v950_v1 = vld [vmem:[#allocation2 + $0x74] sm:$0xf0] }
   0x6   :  { %v797_v2 = vld [vmem:[#allocation2 + $0xf0] sm:$0xf]  ;;  %v734_v3 = vor.u32 %v950_v1, %v733_v0  ;;  %v966_v4 = vld [vmem:[#allocation2 + $0xf4] sm:$0xf0]  ;;  %v725_v11 = vld [vmem:[#allocation2 + $0x60] sm:$0xf] }
   0x7   :  { %v861_v5 = vld [vmem:[#allocation2 + $0x170] sm:$0xf]  ;;  %v982_v6 = vld [vmem:[#allocation2 + $0x174] sm:$0xf0]  ;;  %v798_v7 = vor.u32 %v966_v4, %v797_v2  ;;  %v948_v13 = vld [vmem:[#allocation2 + $0x64] sm:$0xf0] }
   0x8   :  { %v862_v8 = vor.u32 %v982_v6, %v861_v5  ;;  %v925_v9 = vld [vmem:[#allocation2 + $0x1f0] sm:$0xf]  ;;  %v998_v10 = vld [vmem:[#allocation2 + $0x1f4] sm:$0xf0]  ;;  %453 = vmatpush.bf16.msra.mxu0 %v734_v3  ;;  %v789_v14 = vld [vmem:[#allocation2 + $0xe0] sm:$0xf]  ;;  %v726_v16 = vor.u32 %v948_v13, %v725_v11 }
   0x9   :  { %v926_v12 = vor.u32 %v998_v10, %v925_v9  ;;  %v964_v15 = vld [vmem:[#allocation2 + $0xe4] sm:$0xf0]  ;;  %467 = vmatpush.bf16.msra.mxu1 %v798_v7  ;;  %v853_v18 = vld [vmem:[#allocation2 + $0x160] sm:$0xf]  ;;  %v717_v23 = vld [vmem:[#allocation2 + $0x50] sm:$0xf] }
   0xa   :  { %481 = vmatpush.bf16.msra.mxu2 %v862_v8  ;;  %v790_v17 = vor.u32 %v964_v15, %v789_v14  ;;  %v980_v19 = vld [vmem:[#allocation2 + $0x164] sm:$0xf0]  ;;  %v917_v20 = vld [vmem:[#allocation2 + $0x1e0] sm:$0xf]  ;;  %v946_v24 = vld [vmem:[#allocation2 + $0x54] sm:$0xf0] }
   0xb   :  { %495 = vmatpush.bf16.msra.mxu3 %v926_v12  ;;  %v854_v21 = vor.u32 %v980_v19, %v853_v18  ;;  %v996_v22 = vld [vmem:[#allocation2 + $0x1e4] sm:$0xf0]  ;;  %v781_v26 = vld [vmem:[#allocation2 + $0xd0] sm:$0xf]  ;;  %v962_v27 = vld [vmem:[#allocation2 + $0xd4] sm:$0xf0]  ;;  %v718_v29 = vor.u32 %v946_v24, %v717_v23 }
   0xc   :  { %v918_v25 = vor.u32 %v996_v22, %v917_v20  ;;  %v845_v28 = vld [vmem:[#allocation2 + $0x150] sm:$0xf]  ;;  %454 = vmatpush.bf16.msra.mxu0 %v726_v16  ;;  %v978_v30 = vld [vmem:[#allocation2 + $0x154] sm:$0xf0]  ;;  %v782_v33 = vor.u32 %v962_v27, %v781_v26  ;;  %v709_v35 = vld [vmem:[#allocation2 + $0x40] sm:$0xf] }
   0xd   :  { %v909_v31 = vld [vmem:[#allocation2 + $0x1d0] sm:$0xf]  ;;  %v994_v32 = vld [vmem:[#allocation2 + $0x1d4] sm:$0xf0]  ;;  %468 = vmatpush.bf16.msra.mxu1 %v790_v17  ;;  %v846_v34 = vor.u32 %v978_v30, %v845_v28  ;;  %v944_v36 = vld [vmem:[#allocation2 + $0x44] sm:$0xf0] }
   0xe   :  { %482 = vmatpush.bf16.msra.mxu2 %v854_v21  ;;  %v773_v37 = vld [vmem:[#allocation2 + $0xc0] sm:$0xf]  ;;  %v910_v38 = vor.u32 %v994_v32, %v909_v31  ;;  %v960_v39 = vld [vmem:[#allocation2 + $0xc4] sm:$0xf0]  ;;  %v710_v44 = vor.u32 %v944_v36, %v709_v35  ;;  %v701_v47 = vld [vmem:[#allocation2 + $0x30] sm:$0xf] }
   0xf   :  { %496 = vmatpush.bf16.msra.mxu3 %v918_v25  ;;  %v837_v40 = vld [vmem:[#allocation2 + $0x140] sm:$0xf]  ;;  %v976_v41 = vld [vmem:[#allocation2 + $0x144] sm:$0xf0]  ;;  %v774_v45 = vor.u32 %v960_v39, %v773_v37  ;;  %v942_v48 = vld [vmem:[#allocation2 + $0x34] sm:$0xf0] }
  0x10   :  { %v901_v42 = vld [vmem:[#allocation2 + $0x1c0] sm:$0xf]  ;;  %v992_v43 = vld [vmem:[#allocation2 + $0x1c4] sm:$0xf0]  ;;  %455 = vmatpush.bf16.msra.mxu0 %v718_v29  ;;  %v838_v46 = vor.u32 %v976_v41, %v837_v40  ;;  %v765_v49 = vld [vmem:[#allocation2 + $0xb0] sm:$0xf]  ;;  %v702_v56 = vor.u32 %v942_v48, %v701_v47 }
  0x11   :  { %469 = vmatpush.bf16.msra.mxu1 %v782_v33  ;;  %v902_v50 = vor.u32 %v992_v43, %v901_v42  ;;  %v958_v51 = vld [vmem:[#allocation2 + $0xb4] sm:$0xf0]  ;;  %v829_v52 = vld [vmem:[#allocation2 + $0x130] sm:$0xf]  ;;  %v693_v59 = vld [vmem:[#allocation2 + $0x20] sm:$0xf] }
  0x12   :  { %483 = vmatpush.bf16.msra.mxu2 %v846_v34  ;;  %v974_v53 = vld [vmem:[#allocation2 + $0x134] sm:$0xf0]  ;;  %v893_v54 = vld [vmem:[#allocation2 + $0x1b0] sm:$0xf]  ;;  %v766_v57 = vor.u32 %v958_v51, %v765_v49  ;;  %v940_v60 = vld [vmem:[#allocation2 + $0x24] sm:$0xf0] }
  0x13   :  { %497 = vmatpush.bf16.msra.mxu3 %v910_v38  ;;  %v990_v55 = vld [vmem:[#allocation2 + $0x1b4] sm:$0xf0]  ;;  %v830_v58 = vor.u32 %v974_v53, %v829_v52  ;;  %v757_v61 = vld [vmem:[#allocation2 + $0xa0] sm:$0xf]  ;;  %v956_v63 = vld [vmem:[#allocation2 + $0xa4] sm:$0xf0]  ;;  %v694_v4 = vor.u32 %v940_v60, %v693_v59 }
  0x14   :  { %456 = vmatpush.bf16.msra.mxu0 %v710_v44  ;;  %v894_v62 = vor.u32 %v990_v55, %v893_v54  ;;  %v821_v0 = vld [vmem:[#allocation2 + $0x120] sm:$0xf]  ;;  %v972_v1 = vld [vmem:[#allocation2 + $0x124] sm:$0xf0]  ;;  %v758_v5 = vor.u32 %v956_v63, %v757_v61  ;;  %v685_v7 = vld [vmem:[#allocation2 + $0x10] sm:$0xf] }
  0x15   :  { %470 = vmatpush.bf16.msra.mxu1 %v774_v45  ;;  %v885_v2 = vld [vmem:[#allocation2 + $0x1a0] sm:$0xf]  ;;  %v988_v3 = vld [vmem:[#allocation2 + $0x1a4] sm:$0xf0]  ;;  %v822_v6 = vor.u32 %v972_v1, %v821_v0  ;;  %v938_v8 = vld [vmem:[#allocation2 + $0x14] sm:$0xf0] }
  0x16   :  { %484 = vmatpush.bf16.msra.mxu2 %v838_v46  ;;  %v749_v9 = vld [vmem:[#allocation2 + $0x90] sm:$0xf]  ;;  %v886_v10 = vor.u32 %v988_v3, %v885_v2  ;;  %v954_v11 = vld [vmem:[#allocation2 + $0x94] sm:$0xf0]  ;;  %v677_v16 = vld [vmem:[#allocation2] sm:$0xf]  ;;  %v686_v17 = vor.u32 %v938_v8, %v685_v7 }
  0x17   :  { %498 = vmatpush.bf16.msra.mxu3 %v902_v50  ;;  %v813_v12 = vld [vmem:[#allocation2 + $0x110] sm:$0xf]  ;;  %v970_v13 = vld [vmem:[#allocation2 + $0x114] sm:$0xf0]  ;;  %v936_v18 = vld [vmem:[#allocation2 + $0x4] sm:$0xf0]  ;;  %v750_v21 = vor.u32 %v954_v11, %v749_v9 }
  0x18   :  { %457 = vmatpush.bf16.msra.mxu0 %v702_v56  ;;  %v877_v14 = vld [vmem:[#allocation2 + $0x190] sm:$0xf]  ;;  %v986_v15 = vld [vmem:[#allocation2 + $0x194] sm:$0xf0]  ;;  %v741_v19 = vld [vmem:[#allocation2 + $0x80] sm:$0xf]  ;;  %v814_v22 = vor.u32 %v970_v13, %v813_v12  ;;  %v678_v33 = vor.u32 %v936_v18, %v677_v16 }
  0x19   :  { %471 = vmatpush.bf16.msra.mxu1 %v766_v57  ;;  %v952_v20 = vld [vmem:[#allocation2 + $0x84] sm:$0xf0]  ;;  %v805_v23 = vld [vmem:[#allocation2 + $0x100] sm:$0xf]  ;;  %v878_v26 = vor.u32 %v986_v15, %v877_v14  ;;  %v949_v28 = vld [vmem:[#allocation2 + $0x74] sm:$0xf] }
  0x1a   :  { %485 = vmatpush.bf16.msra.mxu2 %v830_v58  ;;  %v968_v24 = vld [vmem:[#allocation2 + $0x104] sm:$0xf0]  ;;  %v869_v25 = vld [vmem:[#allocation2 + $0x180] sm:$0xf]  ;;  %v735_v29 = vld [vmem:[#allocation2 + $0x78] sm:$0xf0]  ;;  %v742_v37 = vor.u32 %v952_v20, %v741_v19 }
  0x1b   :  { %499 = vmatpush.bf16.msra.mxu3 %v894_v62  ;;  %v984_v27 = vld [vmem:[#allocation2 + $0x184] sm:$0xf0]  ;;  %v965_v30 = vld [vmem:[#allocation2 + $0xf4] sm:$0xf]  ;;  %v799_v31 = vld [vmem:[#allocation2 + $0xf8] sm:$0xf0]  ;;  %v806_v38 = vor.u32 %v968_v24, %v805_v23  ;;  %v738_v44 = vor.u32 %v949_v28, %v735_v29 }
  0x1c   :  { %458 = vmatpush.bf16.msra.mxu0 %v694_v4  ;;  %v981_v32 = vld [vmem:[#allocation2 + $0x174] sm:$0xf]  ;;  %v863_v34 = vld [vmem:[#allocation2 + $0x178] sm:$0xf0]  ;;  %v947_v39 = vld [vmem:[#allocation2 + $0x64] sm:$0xf]  ;;  %v870_v43 = vor.u32 %v984_v27, %v869_v25  ;;  %v802_v49 = vor.u32 %v965_v30, %v799_v31 }
  0x1d   :  { %472 = vmatpush.bf16.msra.mxu1 %v758_v5  ;;  %v997_v35 = vld [vmem:[#allocation2 + $0x1f4] sm:$0xf]  ;;  %v927_v36 = vld [vmem:[#allocation2 + $0x1f8] sm:$0xf0]  ;;  %v727_v40 = vld [vmem:[#allocation2 + $0x68] sm:$0xf0]  ;;  %v866_v50 = vor.u32 %v981_v32, %v863_v34 }
  0x1e   :  { %486 = vmatpush.bf16.msra.mxu2 %v822_v6  ;;  %v669_v41 = vld [vmem:[%s1150_s0 + $0x8] sm:$0xf]  ;;  %v934_v42 = vld [vmem:[%s1150_s0 + $0x14] sm:$0xf0]  ;;  %v963_v45 = vld [vmem:[#allocation2 + $0xe4] sm:$0xf]  ;;  %v930_v54 = vor.u32 %v997_v35, %v927_v36  ;;  %v730_v63 = vor.u32 %v947_v39, %v727_v40 }
  0x1f   :  { %500 = vmatpush.bf16.msra.mxu3 %v886_v10  ;;  %v791_v46 = vld [vmem:[#allocation2 + $0xe8] sm:$0xf0]  ;;  %v979_v47 = vld [vmem:[#allocation2 + $0x164] sm:$0xf]  ;;  %v661_v51 = vld [vmem:[%s1150_s0] sm:$0xf]  ;;  %v1092_v55 = vor.u32 %v934_v42, %v669_v41 }
  0x20   :  { %459 = vmatpush.bf16.msra.mxu0 %v686_v17  ;;  %v855_v48 = vld [vmem:[#allocation2 + $0x168] sm:$0xf0]  ;;  %v933_v52 = vld [vmem:[%s1150_s0 + $0xc] sm:$0xf0]  ;;  %v671_v56 = vld [vmem:[%s1150_s0 + $0x18] sm:$0xf0]  ;;  %v794_v1 = vor.u32 %v963_v45, %v791_v46 }
  0x21   :  { %473 = vmatpush.bf16.msra.mxu1 %v750_v21  ;;  %v932_v53 = vld [vmem:[%s1150_s0 + $0xc] sm:$0xf]  ;;  %v931_v57 = vld [vmem:[%s1150_s0 + $0x4] sm:$0xf]  ;;  %v663_v58 = vld [vmem:[%s1150_s0 + $0x10] sm:$0xf0]  ;;  %v1103_v61 = vor.u32 %v933_v52, %v661_v51  ;;  %v858_v2 = vor.u32 %v979_v47, %v855_v48 }
  0x22   :  { %487 = vmatpush.bf16.msra.mxu2 %v814_v22  ;;  %v995_v59 = vld [vmem:[#allocation2 + $0x1e4] sm:$0xf]  ;;  %v919_v60 = vld [vmem:[#allocation2 + $0x1e8] sm:$0xf0]  ;;  %v1105_v62 = vor.u32 %v932_v53, %v671_v56  ;;  %v1107_v0 = vor.u32 %v931_v57, %v663_v58  ;;  %v945_v3 = vld [vmem:[#allocation2 + $0x54] sm:$0xf] }
  0x23   :  { %501 = vmatpush.bf16.msra.mxu3 %v878_v26  ;;  %v719_v4 = vld [vmem:[#allocation2 + $0x58] sm:$0xf0]  ;;  %v961_v5 = vld [vmem:[#allocation2 + $0xd4] sm:$0xf]  ;;  %v922_v6 = vor.u32 %v995_v59, %v919_v60  ;;  %v943_v15 = vld [vmem:[#allocation2 + $0x44] sm:$0xf] }
  0x24   :  { %460 = vmatpush.bf16.msra.mxu0 %v678_v33  ;;  %v783_v7 = vld [vmem:[#allocation2 + $0xd8] sm:$0xf0]  ;;  %v977_v8 = vld [vmem:[#allocation2 + $0x154] sm:$0xf]  ;;  %v722_v12 = vor.u32 %v945_v3, %v719_v4  ;;  %v711_v16 = vld [vmem:[#allocation2 + $0x48] sm:$0xf0] }
  0x25   :  { %474 = vmatpush.bf16.msra.mxu1 %v742_v37  ;;  %v847_v9 = vld [vmem:[#allocation2 + $0x158] sm:$0xf0]  ;;  %v993_v10 = vld [vmem:[#allocation2 + $0x1d4] sm:$0xf]  ;;  %v786_v13 = vor.u32 %v961_v5, %v783_v7  ;;  %v959_v17 = vld [vmem:[#allocation2 + $0xc4] sm:$0xf]  ;;  %v714_v24 = vor.u32 %v943_v15, %v711_v16 }
  0x26   :  { %488 = vmatpush.bf16.msra.mxu2 %v806_v38  ;;  %v911_v11 = vld [vmem:[#allocation2 + $0x1d8] sm:$0xf0]  ;;  %v850_v14 = vor.u32 %v977_v8, %v847_v9  ;;  %v775_v19 = vld [vmem:[#allocation2 + $0xc8] sm:$0xf0]  ;;  %v975_v20 = vld [vmem:[#allocation2 + $0x144] sm:$0xf] }
  0x27   :  { %502 = vmatpush.bf16.msra.mxu3 %v870_v43  ;;  %461 = vmatmul.bf16.vlgmr.msra.gmra.mxu0 %v1103_v61  ;;  %v914_v18 = vor.u32 %v993_v10, %v911_v11  ;;  %v839_v21 = vld [vmem:[#allocation2 + $0x148] sm:$0xf0]  ;;  %v991_v22 = vld [vmem:[#allocation2 + $0x1c4] sm:$0xf]  ;;  %v778_v25 = vor.u32 %v959_v17, %v775_v19  ;;  %v941_v27 = vld [vmem:[#allocation2 + $0x34] sm:$0xf] }
  0x28   :  { %509 = vmatpush.bf16.msrb.mxu0 %v738_v44  ;;  %475 = vmatmul.bf16.vlgmr.msra.gmra.mxu1 %v1107_v0  ;;  %v903_v23 = vld [vmem:[#allocation2 + $0x1c8] sm:$0xf0]  ;;  %v842_v26 = vor.u32 %v975_v20, %v839_v21  ;;  %v703_v28 = vld [vmem:[#allocation2 + $0x38] sm:$0xf0]  ;;  %v957_v29 = vld [vmem:[#allocation2 + $0xb4] sm:$0xf] }
  0x29   :  { %523 = vmatpush.bf16.msrb.mxu1 %v802_v49  ;;  %489 = vmatmul.bf16.vlgmr.msra.gmra.mxu2 %v1092_v55  ;;  %v906_v30 = vor.u32 %v991_v22, %v903_v23  ;;  %v767_v31 = vld [vmem:[#allocation2 + $0xb8] sm:$0xf0]  ;;  %v973_v32 = vld [vmem:[#allocation2 + $0x134] sm:$0xf]  ;;  %v706_v36 = vor.u32 %v941_v27, %v703_v28  ;;  %v939_v39 = vld [vmem:[#allocation2 + $0x24] sm:$0xf] }
  0x2a   :  { %537 = vmatpush.bf16.msrb.mxu2 %v866_v50  ;;  %503 = vmatmul.bf16.vlgmr.msra.gmra.mxu3 %v1105_v62  ;;  %v831_v33 = vld [vmem:[#allocation2 + $0x138] sm:$0xf0]  ;;  %v989_v34 = vld [vmem:[#allocation2 + $0x1b4] sm:$0xf]  ;;  %v770_v37 = vor.u32 %v957_v29, %v767_v31  ;;  %v695_v40 = vld [vmem:[#allocation2 + $0x28] sm:$0xf0] }
  0x2b   :  { %551 = vmatpush.bf16.msrb.mxu3 %v930_v54  ;;  %v895_v35 = vld [vmem:[#allocation2 + $0x1b8] sm:$0xf0]  ;;  %v834_v38 = vor.u32 %v973_v32, %v831_v33  ;;  %v955_v41 = vld [vmem:[#allocation2 + $0xa4] sm:$0xf]  ;;  %v759_v43 = vld [vmem:[#allocation2 + $0xa8] sm:$0xf0]  ;;  %v698_v48 = vor.u32 %v939_v39, %v695_v40 }
  0x2c   :  { %510 = vmatpush.bf16.msrb.mxu0 %v730_v63  ;;  %v898_v42 = vor.u32 %v989_v34, %v895_v35  ;;  %v971_v44 = vld [vmem:[#allocation2 + $0x124] sm:$0xf]  ;;  %v823_v45 = vld [vmem:[#allocation2 + $0x128] sm:$0xf0]  ;;  %v762_v49 = vor.u32 %v955_v41, %v759_v43  ;;  %v937_v51 = vld [vmem:[#allocation2 + $0x14] sm:$0xf] }
  0x2d   :  { %524 = vmatpush.bf16.msrb.mxu1 %v794_v1  ;;  %v987_v46 = vld [vmem:[#allocation2 + $0x1a4] sm:$0xf]  ;;  %v887_v47 = vld [vmem:[#allocation2 + $0x1a8] sm:$0xf0]  ;;  %v826_v50 = vor.u32 %v971_v44, %v823_v45  ;;  %v687_v52 = vld [vmem:[#allocation2 + $0x18] sm:$0xf0] }
  0x2e   :  { %538 = vmatpush.bf16.msrb.mxu2 %v858_v2  ;;  %v953_v53 = vld [vmem:[#allocation2 + $0x94] sm:$0xf]  ;;  %v890_v54 = vor.u32 %v987_v46, %v887_v47  ;;  %v751_v56 = vld [vmem:[#allocation2 + $0x98] sm:$0xf0]  ;;  %v690_v63 = vor.u32 %v937_v51, %v687_v52  ;;  %v935_v3 = vld [vmem:[#allocation2 + $0x4] sm:$0xf] }
  0x2f   :  { %552 = vmatpush.bf16.msrb.mxu3 %v922_v6  ;;  %v969_v57 = vld [vmem:[#allocation2 + $0x114] sm:$0xf]  ;;  %v815_v58 = vld [vmem:[#allocation2 + $0x118] sm:$0xf0]  ;;  %v754_v1 = vor.u32 %v953_v53, %v751_v56  ;;  %v679_v4 = vld [vmem:[#allocation2 + $0x8] sm:$0xf0] }
  0x30   :  { %511 = vmatpush.bf16.msrb.mxu0 %v722_v12  ;;  %v985_v59 = vld [vmem:[#allocation2 + $0x194] sm:$0xf]  ;;  %v879_v60 = vld [vmem:[#allocation2 + $0x198] sm:$0xf0]  ;;  %v818_v2 = vor.u32 %v969_v57, %v815_v58  ;;  %v951_v5 = vld [vmem:[#allocation2 + $0x84] sm:$0xf]  ;;  %v682_v12 = vor.u32 %v935_v3, %v679_v4 }
  0x31   :  { %525 = vmatpush.bf16.msrb.mxu1 %v786_v13  ;;  %v882_v6 = vor.u32 %v985_v59, %v879_v60  ;;  %v743_v7 = vld [vmem:[#allocation2 + $0x88] sm:$0xf0]  ;;  %v967_v8 = vld [vmem:[#allocation2 + $0x104] sm:$0xf]  ;;  %v568_v52 = vld [vmem:[%s1153_s3 + $0x18] sm:$0xff]  ;;  %v1038_v58 = vmov 256.0  }
  0x32   :  { %539 = vmatpush.bf16.msrb.mxu2 %v850_v14  ;;  %v807_v9 = vld [vmem:[#allocation2 + $0x108] sm:$0xf0]  ;;  %v983_v10 = vld [vmem:[#allocation2 + $0x184] sm:$0xf]  ;;  %v746_v13 = vor.u32 %v951_v5, %v743_v7  ;;  %1003 = vrcp.f32 %v1038_v58 }
  0x33   :  { %553 = vmatpush.bf16.msrb.mxu3 %v914_v18  ;;  %v871_v11 = vld [vmem:[#allocation2 + $0x188] sm:$0xf0]  ;;  %v810_v14 = vor.u32 %v967_v8, %v807_v9  ;;  %v107_v18 = vld [vmem:[%s1152_s2] sm:$0x3] }
  0x34   :  { %512 = vmatpush.bf16.msrb.mxu0 %v714_v24  ;;  %v874_v15 = vor.u32 %v983_v10, %v871_v11  ;;  %v109_v21 = vperm.slane %v107_v18, 0 }
  0x35   :  { %526 = vmatpush.bf16.msrb.mxu1 %v778_v25  ;;  %v110_v25 = vperm.slane %v107_v18, 1 }
  0x36   :  { %540 = vmatpush.bf16.msrb.mxu2 %v842_v26 }
  0x37   :  { %554 = vmatpush.bf16.msrb.mxu3 %v906_v30 }
  0x38   :  { %513 = vmatpush.bf16.msrb.mxu0 %v706_v36  ;;  %v1004_v59 = vpop.eup %1003 }
  0x39   :  { %527 = vmatpush.bf16.msrb.mxu1 %v770_v37  ;;  %v565_v37 = vld [vmem:[%s1153_s3] sm:$0xff]  ;;  %v580_v60 = vmul.f32 256.0, %v1004_v59  ;;  %vm584_vm0 = vweird.f32 %v1004_v59 }
  0x3a   :  { %541 = vmatpush.bf16.msrb.mxu2 %v834_v38  ;;  %v566_v38 = vld [vmem:[%s1153_s3 + $0x8] sm:$0xff] }
  0x3b   :  { %555 = vmatpush.bf16.msrb.mxu3 %v898_v42 }
  0x3c   :  { %514 = vmatpush.bf16.msrb.mxu0 %v698_v48 }
  0x3d   :  { %528 = vmatpush.bf16.msrb.mxu1 %v762_v49 }
  0x3e   :  { %542 = vmatpush.bf16.msrb.mxu2 %v826_v50  ;;  %v567_v50 = vld [vmem:[%s1153_s3 + $0x10] sm:$0xff] }
  0x3f   :  { %556 = vmatpush.bf16.msrb.mxu3 %v890_v54 }
  0x40   :  { %515 = vmatpush.bf16.msrb.mxu0 %v690_v63  ;;  %v581_v63 = vsub.f32 1.0, %v580_v60 }
  0x41   :  { %529 = vmatpush.bf16.msrb.mxu1 %v754_v1 }
  0x42   :  { %543 = vmatpush.bf16.msrb.mxu2 %v818_v2  ;;  %v582_v1 = vmul.f32 %v1004_v59, %v581_v63 }
  0x43   :  { %557 = vmatpush.bf16.msrb.mxu3 %v882_v6 }
  0x44   :  { %516 = vmatpush.bf16.msrb.mxu0 %v682_v12  ;;  %v583_v2 = vadd.f32 %v1004_v59, %v582_v1 }
  0x45   :  { %530 = vmatpush.bf16.msrb.mxu1 %v746_v13 }
  0x46   :  { %544 = vmatpush.bf16.msrb.mxu2 %v810_v14  ;;  %v585_v3 = vsel %vm584_vm0, %v1004_v59, %v583_v2 }
  0x47   :  { %558 = vmatpush.bf16.msrb.mxu3 %v874_v15  ;;  %517 = vmatmul.bf16.vlgmr.msrb.gmra.mxu0 %v1103_v61 }
  0x48   :  { %531 = vmatmul.bf16.vlgmr.msrb.gmra.mxu1 %v1107_v0 }
  0x49   :  { %545 = vmatmul.bf16.vlgmr.msrb.gmra.mxu2 %v1092_v55 }
  0x4a   :  { %559 = vmatmul.bf16.vlgmr.msrb.gmra.mxu3 %v1105_v62 }
  0xa4   :  { %v462_v16 = vpop.f32.mrf.mxu0 }
  0xa5   :  { %v476_v17 = vpop.f32.mrf.mxu1  ;;  %v463_v24 = vadd.f32 %v462_v16, %v109_v21 }
  0xa7   :  { %v477_v26 = vadd.f32 %v476_v17, %v463_v24 }
  0xac   :  { %v490_v19 = vpop.f32.mrf.mxu2  ;;  %v464_v22 = vpop.f32.mrf.mxu0 }
  0xad   :  { %v504_v20 = vpop.f32.mrf.mxu3  ;;  %v478_v23 = vpop.f32.mrf.mxu1  ;;  %v491_v62 = vadd.f32 %v490_v19, %v477_v26  ;;  %v465_v29 = vadd.f32 %v464_v22, %v109_v21 }
  0xaf   :  { %v505_v32 = vadd.f32 %v504_v20, %v491_v62  ;;  %v479_v33 = vadd.f32 %v478_v23, %v465_v29 }
  0xb1   :  { %v569_v42 = vadd.f32 %v565_v37, %v505_v32 }
  0xb4   :  { %v492_v61 = vpop.f32.mrf.mxu2 }
  0xb5   :  { %v506_v0 = vpop.f32.mrf.mxu3  ;;  %v493_v41 = vadd.f32 %v492_v61, %v479_v33 }
  0xb7   :  { %v507_v48 = vadd.f32 %v506_v0, %v493_v41  ;;  %v630_v0 = vld [vmem:[%s1154_s4] sm:$0x3] }
  0xb9   :  { %v571_v54 = vadd.f32 %v567_v50, %v507_v48 }
  0xc4   :  { %v518_v27 = vpop.f32.mrf.mxu0 }
  0xc5   :  { %v519_v55 = vadd.f32 %v518_v27, %v110_v25  ;;  %v532_v28 = vpop.f32.mrf.mxu1 }
  0xc7   :  { %v533_v30 = vadd.f32 %v532_v28, %v519_v55  ;;  %v640_v28 = vld [vmem:[%s1155_s5] sm:$0x3] }
  0xcc   :  { %v546_v31 = vpop.f32.mrf.mxu2  ;;  %v520_v36 = vpop.f32.mrf.mxu0 }
  0xcd   :  { %v547_v34 = vadd.f32 %v546_v31, %v533_v30  ;;  %v560_v35 = vpop.f32.mrf.mxu3  ;;  %v521_v40 = vadd.f32 %v520_v36, %v110_v25  ;;  %v534_v44 = vpop.f32.mrf.mxu1  ;;  %v632_v30 = vperm.slane %v630_v0, 0  ;;  %v633_v31 = vperm.slane %v630_v0, 1 }
  0xcf   :  { %v561_v39 = vadd.f32 %v560_v35, %v547_v34  ;;  %v535_v45 = vadd.f32 %v534_v44, %v521_v40  ;;  %v642_v34 = vperm.slane %v640_v28, 0  ;;  %v643_v35 = vperm.slane %v640_v28, 1 }
  0xd1   :  { %v570_v43 = vadd.f32 %v566_v38, %v561_v39 }
  0xd3   :  { %v573_v46 = vadd.f32 %v570_v43, %v569_v42 }
  0xd4   :  { %v548_v47 = vpop.f32.mrf.mxu2 }
  0xd5   :  { %v549_v49 = vadd.f32 %v548_v47, %v535_v45  ;;  %574 = vadd.xlane.f32.xlu0 %v573_v46  ;;  %v562_v51 = vpop.f32.mrf.mxu3 }
  0xd7   :  { %v563_v53 = vadd.f32 %v562_v51, %v549_v49 }
  0xd9   :  { %v572_v56 = vadd.f32 %v568_v52, %v563_v53 }
  0xdb   :  { %v576_v57 = vadd.f32 %v572_v56, %v571_v54 }
  0xdd   :  { %577 = vadd.xlane.f32.xlu0 %v576_v57 }
 0x148   :  { %v575_v4 = vpop.xlane.xlu0 %574 }
 0x149   :  { %v586_v5 = vmul.f32 %v585_v3, %v575_v4 }
 0x14b   :  { %v588_v6 = vsub.f32 %v569_v42, %v586_v5  ;;  %v589_v7 = vsub.f32 %v570_v43, %v586_v5 }
 0x14d   :  { %v592_v8 = vmul.f32 %v588_v6, %v588_v6  ;;  %v593_v9 = vmul.f32 %v589_v7, %v589_v7 }
 0x14f   :  { %v596_v10 = vadd.f32 %v593_v9, %v592_v8 }
 0x150   :  { %v578_v11 = vpop.xlane.xlu0 %577 }
 0x151   :  { %v587_v12 = vmul.f32 %v585_v3, %v578_v11  ;;  %597 = vadd.xlane.f32.xlu1 %v596_v10 }
 0x153   :  { %v590_v13 = vsub.f32 %v571_v54, %v587_v12  ;;  %v591_v14 = vsub.f32 %v572_v56, %v587_v12 }
 0x155   :  { %v594_v15 = vmul.f32 %v590_v13, %v590_v13  ;;  %v595_v16 = vmul.f32 %v591_v14, %v591_v14 }
 0x157   :  { %v599_v17 = vadd.f32 %v595_v16, %v594_v15 }
 0x159   :  { %600 = vadd.xlane.f32.xlu1 %v599_v17 }
 0x1c4   :  { %v598_v18 = vpop.xlane.xlu1 %597 }
 0x1c5   :  { %v602_v19 = vmul.f32 %v598_v18, %v585_v3 }
 0x1c7   :  { %v604_v20 = vadd.f32 1e-12, %v602_v19 }
 0x1c9   :  { %1005 = vrsqrt.f32 %v604_v20  ;;  %vm612_vm2 = vweird.f32 %v604_v20 }
 0x1cc   :  { %v601_v21 = vpop.xlane.xlu1 %600 }
 0x1cd   :  { %v603_v22 = vmul.f32 %v601_v21, %v585_v3 }
 0x1cf   :  { %v1006_v23 = vpop.eup %1005  ;;  %v605_v24 = vadd.f32 1e-12, %v603_v22 }
 0x1d0   :  { %v607_v25 = vmul.f32 %v1006_v23, %v604_v20  ;;  %vm613_vm1 = vweird.f32 %v1006_v23 }
 0x1d1   :  { %1007 = vrsqrt.f32 %v605_v24  ;;  %vm614_vm3 = vmor %vm612_vm2, %vm613_vm1  ;;  %vm622_vm5 = vweird.f32 %v605_v24 }
 0x1d2   :  { %v608_v61 = vmul.f32 %v1006_v23, %v607_v25 }
 0x1d4   :  { %v609_v26 = vmul.f32 0.5, %v608_v61 }
 0x1d6   :  { %v610_v27 = vsub.f32 1.5, %v609_v26 }
 0x1d7   :  { %v1008_v55 = vpop.eup %1007 }
 0x1d8   :  { %v611_v62 = vmul.f32 %v1006_v23, %v610_v27  ;;  %v617_v29 = vmul.f32 %v1008_v55, %v605_v24  ;;  %vm623_vm4 = vweird.f32 %v1008_v55 }
 0x1d9   :  { %vm624_vm6 = vmor %vm622_vm5, %vm623_vm4 }
 0x1da   :  { %v615_v32 = vsel %vm614_vm3, %v1006_v23, %v611_v62  ;;  %v618_v33 = vmul.f32 %v1008_v55, %v617_v29 }
 0x1db   :  { %v626_v36 = vmul.f32 %v615_v32, %v588_v6  ;;  %v627_v37 = vmul.f32 %v615_v32, %v589_v7 }
 0x1dc   :  { %v619_v38 = vmul.f32 0.5, %v618_v33 }
 0x1dd   :  { %v636_v39 = vmul.f32 %v632_v30, %v626_v36  ;;  %v637_v40 = vmul.f32 %v633_v31, %v627_v37 }
 0x1de   :  { %v620_v41 = vsub.f32 1.5, %v619_v38 }
 0x1df   :  { %v646_v42 = vadd.f32 %v642_v34, %v636_v39  ;;  %v647_v43 = vadd.f32 %v643_v35, %v637_v40 }
 0x1e0   :  { %v621_v44 = vmul.f32 %v1008_v55, %v620_v41 }
 0x1e1   :  { %650 = vst [vmem:[%s1156_s6] sm:$0xff] %v646_v42 }
 0x1e2   :  { %651 = vst [vmem:[%s1156_s6 + $0x8] sm:$0xff] %v647_v43  ;;  %v625_v45 = vsel %vm624_vm6, %v1008_v55, %v621_v44 }
 0x1e3   :  { %v628_v46 = vmul.f32 %v625_v45, %v590_v13  ;;  %v629_v47 = vmul.f32 %v625_v45, %v591_v14 }
 0x1e5   :  { %v638_v48 = vmul.f32 %v632_v30, %v628_v46  ;;  %v639_v49 = vmul.f32 %v633_v31, %v629_v47 }
 0x1e7   :  { %v648_v50 = vadd.f32 %v642_v34, %v638_v48  ;;  %v649_v51 = vadd.f32 %v643_v35, %v639_v49 }
 0x1e9   :  { %652 = vst [vmem:[%s1156_s6 + $0x10] sm:$0xff] %v648_v50 }
 0x1ea   :  { %653 = vst [vmem:[%s1156_s6 + $0x18] sm:$0xff] %v649_v51 }
 0x1eb   :  { %658 = vsyncpa [#allocation3], 1 }

// kernel: bert_lstm_forward.22
= control target key start
LH: loop header
LB: loop body
LE: loop exit
PB: predicated region body
PF: predicated region fallthrough
CT: control target
= control target key end

     0   :  { %11 = vsyncpa [#allocation3], 0  ;;  %s605_s24 = smov [#allocation2]   ;;  %s606_s26 = smov 128   ;;  %s692_s0 = inlined_call_operand.vmem [shape: bf16[16,256], index: 0, kind: input, shape index: {}]   ;;  %s693_s1 = inlined_call_operand.hbm [shape: bf16[256,256], index: 1, kind: input, shape index: {}]   ;;  %s694_s2 = inlined_call_operand.vmem [shape: f32[1,256], index: 2, kind: input, shape index: {}]   ;;  %s695_s3 = inlined_call_operand.vmem [shape: f32[16,256], index: 3, kind: input, shape index: {}]   ;;  %s696_s4 = inlined_call_operand.vmem [shape: f32[1,256], index: 4, kind: input, shape index: {}]   ;;  %s697_s5 = inlined_call_operand.vmem [shape: f32[1,256], index: 5, kind: input, shape index: {}]   ;;  %s698_s6 = inlined_call_operand.vmem [shape: f32[16,256], index: 6, kind: output, shape index: {}]  }
   0x1   :  { %s18_s23 = sshll.u32 %s693_s1, 4  ;;  %s20_s25 = sshll.u32 %s605_s24, 4  ;;  %s19_s23 = int_to_ptr.hbm [resolvable:$true] %s18_s23  ;;  %s21_s25 = int_to_ptr.vmem [resolvable:$true] %s20_s25 }
   0x2   :  { %s607_s27 = smov 8  }
   0x3   :  { %26 = dma.hbm_to_vmem [thread:$0]  %s19_s23, 4096, %s21_s25, [#allocation3], %s606_s26, %s606_s26, %s607_s27  }
   0x4   :  { %603 = dma.done.wait [#allocation3], 4096  }
   0x5   :  { %604 = vsyncadd [#allocation3], 4294963200  ;;  %v465_v0 = vld [vmem:[#allocation2 + $0x70] sm:$0xf]  ;;  %v552_v1 = vld [vmem:[#allocation2 + $0x74] sm:$0xf0] }
   0x6   :  { %v529_v2 = vld [vmem:[#allocation2 + $0xf0] sm:$0xf]  ;;  %v466_v3 = vor.u32 %v552_v1, %v465_v0  ;;  %v568_v4 = vld [vmem:[#allocation2 + $0xf4] sm:$0xf0]  ;;  %v551_v5 = vld [vmem:[#allocation2 + $0x74] sm:$0xf] }
   0x7   :  { %v467_v6 = vld [vmem:[#allocation2 + $0x78] sm:$0xf0]  ;;  %v530_v7 = vor.u32 %v568_v4, %v529_v2  ;;  %v567_v9 = vld [vmem:[#allocation2 + $0xf4] sm:$0xf]  ;;  %v457_v11 = vld [vmem:[#allocation2 + $0x60] sm:$0xf] }
   0x8   :  { %v470_v8 = vor.u32 %v551_v5, %v467_v6  ;;  %v531_v10 = vld [vmem:[#allocation2 + $0xf8] sm:$0xf0]  ;;  %249 = vmatpush.bf16.msra.mxu0 %v466_v3  ;;  %v550_v13 = vld [vmem:[#allocation2 + $0x64] sm:$0xf0]  ;;  %v521_v14 = vld [vmem:[#allocation2 + $0xe0] sm:$0xf] }
   0x9   :  { %v534_v12 = vor.u32 %v567_v9, %v531_v10  ;;  %v566_v15 = vld [vmem:[#allocation2 + $0xe4] sm:$0xf0]  ;;  %263 = vmatpush.bf16.msra.mxu1 %v530_v7  ;;  %v458_v16 = vor.u32 %v550_v13, %v457_v11  ;;  %v549_v18 = vld [vmem:[#allocation2 + $0x64] sm:$0xf]  ;;  %v459_v19 = vld [vmem:[#allocation2 + $0x68] sm:$0xf0] }
   0xa   :  { %277 = vmatpush.bf16.msra.mxu2 %v470_v8  ;;  %v522_v17 = vor.u32 %v566_v15, %v521_v14  ;;  %v565_v20 = vld [vmem:[#allocation2 + $0xe4] sm:$0xf]  ;;  %v462_v21 = vor.u32 %v549_v18, %v459_v19  ;;  %v523_v22 = vld [vmem:[#allocation2 + $0xe8] sm:$0xf0]  ;;  %v449_v23 = vld [vmem:[#allocation2 + $0x50] sm:$0xf] }
   0xb   :  { %291 = vmatpush.bf16.msra.mxu3 %v534_v12  ;;  %v548_v24 = vld [vmem:[#allocation2 + $0x54] sm:$0xf0]  ;;  %v526_v25 = vor.u32 %v565_v20, %v523_v22  ;;  %v513_v26 = vld [vmem:[#allocation2 + $0xd0] sm:$0xf]  ;;  %v547_v28 = vld [vmem:[#allocation2 + $0x54] sm:$0xf] }
   0xc   :  { %v564_v27 = vld [vmem:[#allocation2 + $0xd4] sm:$0xf0]  ;;  %250 = vmatpush.bf16.msra.mxu0 %v458_v16  ;;  %v450_v29 = vor.u32 %v548_v24, %v449_v23  ;;  %v451_v30 = vld [vmem:[#allocation2 + $0x58] sm:$0xf0]  ;;  %v563_v31 = vld [vmem:[#allocation2 + $0xd4] sm:$0xf] }
   0xd   :  { %v515_v32 = vld [vmem:[#allocation2 + $0xd8] sm:$0xf0]  ;;  %264 = vmatpush.bf16.msra.mxu1 %v522_v17  ;;  %v514_v33 = vor.u32 %v564_v27, %v513_v26  ;;  %v454_v34 = vor.u32 %v547_v28, %v451_v30  ;;  %v441_v35 = vld [vmem:[#allocation2 + $0x40] sm:$0xf]  ;;  %v546_v36 = vld [vmem:[#allocation2 + $0x44] sm:$0xf0] }
   0xe   :  { %278 = vmatpush.bf16.msra.mxu2 %v462_v21  ;;  %v505_v37 = vld [vmem:[#allocation2 + $0xc0] sm:$0xf]  ;;  %v518_v38 = vor.u32 %v563_v31, %v515_v32  ;;  %v562_v39 = vld [vmem:[#allocation2 + $0xc4] sm:$0xf0]  ;;  %v545_v40 = vld [vmem:[#allocation2 + $0x44] sm:$0xf]  ;;  %v442_v44 = vor.u32 %v546_v36, %v441_v35 }
   0xf   :  { %292 = vmatpush.bf16.msra.mxu3 %v526_v25  ;;  %v443_v41 = vld [vmem:[#allocation2 + $0x48] sm:$0xf0]  ;;  %v561_v42 = vld [vmem:[#allocation2 + $0xc4] sm:$0xf]  ;;  %v506_v45 = vor.u32 %v562_v39, %v505_v37  ;;  %v433_v47 = vld [vmem:[#allocation2 + $0x30] sm:$0xf] }
  0x10   :  { %v507_v43 = vld [vmem:[#allocation2 + $0xc8] sm:$0xf0]  ;;  %251 = vmatpush.bf16.msra.mxu0 %v450_v29  ;;  %v446_v46 = vor.u32 %v545_v40, %v443_v41  ;;  %v544_v48 = vld [vmem:[#allocation2 + $0x34] sm:$0xf0]  ;;  %v497_v49 = vld [vmem:[#allocation2 + $0xb0] sm:$0xf] }
  0x11   :  { %265 = vmatpush.bf16.msra.mxu1 %v514_v33  ;;  %v510_v50 = vor.u32 %v561_v42, %v507_v43  ;;  %v560_v51 = vld [vmem:[#allocation2 + $0xb4] sm:$0xf0]  ;;  %v543_v52 = vld [vmem:[#allocation2 + $0x34] sm:$0xf]  ;;  %v435_v53 = vld [vmem:[#allocation2 + $0x38] sm:$0xf0]  ;;  %v434_v56 = vor.u32 %v544_v48, %v433_v47 }
  0x12   :  { %279 = vmatpush.bf16.msra.mxu2 %v454_v34  ;;  %v559_v54 = vld [vmem:[#allocation2 + $0xb4] sm:$0xf]  ;;  %v499_v55 = vld [vmem:[#allocation2 + $0xb8] sm:$0xf0]  ;;  %v498_v57 = vor.u32 %v560_v51, %v497_v49  ;;  %v438_v58 = vor.u32 %v543_v52, %v435_v53  ;;  %v425_v59 = vld [vmem:[#allocation2 + $0x20] sm:$0xf] }
  0x13   :  { %293 = vmatpush.bf16.msra.mxu3 %v518_v38  ;;  %v542_v60 = vld [vmem:[#allocation2 + $0x24] sm:$0xf0]  ;;  %v489_v61 = vld [vmem:[#allocation2 + $0xa0] sm:$0xf]  ;;  %v502_v62 = vor.u32 %v559_v54, %v499_v55  ;;  %v541_v0 = vld [vmem:[#allocation2 + $0x24] sm:$0xf] }
  0x14   :  { %252 = vmatpush.bf16.msra.mxu0 %v442_v44  ;;  %v558_v63 = vld [vmem:[#allocation2 + $0xa4] sm:$0xf0]  ;;  %v427_v1 = vld [vmem:[#allocation2 + $0x28] sm:$0xf0]  ;;  %v557_v2 = vld [vmem:[#allocation2 + $0xa4] sm:$0xf]  ;;  %v426_v4 = vor.u32 %v542_v60, %v425_v59 }
  0x15   :  { %266 = vmatpush.bf16.msra.mxu1 %v506_v45  ;;  %v491_v3 = vld [vmem:[#allocation2 + $0xa8] sm:$0xf0]  ;;  %v490_v5 = vor.u32 %v558_v63, %v489_v61  ;;  %v430_v6 = vor.u32 %v541_v0, %v427_v1  ;;  %v417_v7 = vld [vmem:[#allocation2 + $0x10] sm:$0xf]  ;;  %v540_v8 = vld [vmem:[#allocation2 + $0x14] sm:$0xf0] }
  0x16   :  { %280 = vmatpush.bf16.msra.mxu2 %v446_v46  ;;  %v481_v9 = vld [vmem:[#allocation2 + $0x90] sm:$0xf]  ;;  %v494_v10 = vor.u32 %v557_v2, %v491_v3  ;;  %v556_v11 = vld [vmem:[#allocation2 + $0x94] sm:$0xf0]  ;;  %v539_v12 = vld [vmem:[#allocation2 + $0x14] sm:$0xf]  ;;  %v418_v16 = vor.u32 %v540_v8, %v417_v7 }
  0x17   :  { %294 = vmatpush.bf16.msra.mxu3 %v510_v50  ;;  %v419_v13 = vld [vmem:[#allocation2 + $0x18] sm:$0xf0]  ;;  %v555_v14 = vld [vmem:[#allocation2 + $0x94] sm:$0xf]  ;;  %v482_v17 = vor.u32 %v556_v11, %v481_v9  ;;  %v409_v19 = vld [vmem:[#allocation2] sm:$0xf] }
  0x18   :  { %253 = vmatpush.bf16.msra.mxu0 %v434_v56  ;;  %v483_v15 = vld [vmem:[#allocation2 + $0x98] sm:$0xf0]  ;;  %v422_v18 = vor.u32 %v539_v12, %v419_v13  ;;  %v538_v20 = vld [vmem:[#allocation2 + $0x4] sm:$0xf0]  ;;  %v473_v21 = vld [vmem:[#allocation2 + $0x80] sm:$0xf] }
  0x19   :  { %267 = vmatpush.bf16.msra.mxu1 %v498_v57  ;;  %v486_v22 = vor.u32 %v555_v14, %v483_v15  ;;  %v554_v23 = vld [vmem:[#allocation2 + $0x84] sm:$0xf0]  ;;  %v537_v24 = vld [vmem:[#allocation2 + $0x4] sm:$0xf]  ;;  %v411_v25 = vld [vmem:[#allocation2 + $0x8] sm:$0xf0]  ;;  %v410_v28 = vor.u32 %v538_v20, %v409_v19 }
  0x1a   :  { %281 = vmatpush.bf16.msra.mxu2 %v438_v58  ;;  %v553_v26 = vld [vmem:[#allocation2 + $0x84] sm:$0xf]  ;;  %v475_v27 = vld [vmem:[#allocation2 + $0x88] sm:$0xf0]  ;;  %v401_v29 = vld [vmem:[%s692_s0] sm:$0xf]  ;;  %v474_v31 = vor.u32 %v554_v23, %v473_v21  ;;  %v414_v32 = vor.u32 %v537_v24, %v411_v25 }
  0x1b   :  { %295 = vmatpush.bf16.msra.mxu3 %v502_v62  ;;  %v536_v30 = vld [vmem:[%s692_s0 + $0x4] sm:$0xf0]  ;;  %v535_v33 = vld [vmem:[%s692_s0 + $0x4] sm:$0xf]  ;;  %v403_v34 = vld [vmem:[%s692_s0 + $0x8] sm:$0xf0]  ;;  %v478_v35 = vor.u32 %v553_v26, %v475_v27 }
  0x1c   :  { %254 = vmatpush.bf16.msra.mxu0 %v426_v4  ;;  %v402_v36 = vor.u32 %v536_v30, %v401_v29  ;;  %v406_v37 = vor.u32 %v535_v33, %v403_v34  ;;  %v73_v38 = vld [vmem:[%s694_s2] sm:$0x3]  ;;  %v306_v50 = vld [vmem:[%s695_s3 + $0x8] sm:$0xff]  ;;  %v307_v60 = vld [vmem:[%s695_s3 + $0x10] sm:$0xff]  ;;  %v608_v3 = vmov 256.0  }
  0x1d   :  { %268 = vmatpush.bf16.msra.mxu1 %v490_v5  ;;  %v75_v39 = vperm.slane %v73_v38, 0  ;;  %v76_v42 = vperm.slane %v73_v38, 1  ;;  %v305_v46 = vld [vmem:[%s695_s3] sm:$0xff]  ;;  %v308_v62 = vld [vmem:[%s695_s3 + $0x18] sm:$0xff]  ;;  %573 = vrcp.f32 %v608_v3 }
  0x1e   :  { %282 = vmatpush.bf16.msra.mxu2 %v430_v6  ;;  %v370_v34 = vld [vmem:[%s696_s4] sm:$0x3] }
  0x1f   :  { %296 = vmatpush.bf16.msra.mxu3 %v494_v10 }
  0x20   :  { %255 = vmatpush.bf16.msra.mxu0 %v418_v16 }
  0x21   :  { %269 = vmatpush.bf16.msra.mxu1 %v482_v17 }
  0x22   :  { %283 = vmatpush.bf16.msra.mxu2 %v422_v18 }
  0x23   :  { %297 = vmatpush.bf16.msra.mxu3 %v486_v22  ;;  %v574_v4 = vpop.eup %573 }
  0x24   :  { %256 = vmatpush.bf16.msra.mxu0 %v410_v28  ;;  %v320_v5 = vmul.f32 256.0, %v574_v4  ;;  %vm324_vm0 = vweird.f32 %v574_v4 }
  0x25   :  { %270 = vmatpush.bf16.msra.mxu1 %v474_v31 }
  0x26   :  { %284 = vmatpush.bf16.msra.mxu2 %v414_v32  ;;  %v321_v6 = vsub.f32 1.0, %v320_v5 }
  0x27   :  { %298 = vmatpush.bf16.msra.mxu3 %v478_v35  ;;  %257 = vmatmul.bf16.vlgmr.msra.gmra.mxu0 %v402_v36 }
  0x28   :  { %271 = vmatmul.bf16.vlgmr.msra.gmra.mxu1 %v406_v37  ;;  %v322_v7 = vmul.f32 %v574_v4, %v321_v6 }
  0x29   :  { %285 = vmatmul.bf16.vlgmr.msra.gmra.mxu2 %v402_v36 }
  0x2a   :  { %299 = vmatmul.bf16.vlgmr.msra.gmra.mxu3 %v406_v37  ;;  %v323_v8 = vadd.f32 %v574_v4, %v322_v7  ;;  %v380_v37 = vld [vmem:[%s697_s5] sm:$0x3] }
  0x2c   :  { %v325_v9 = vsel %vm324_vm0, %v574_v4, %v323_v8 }
  0xa4   :  { %v258_v40 = vpop.f32.mrf.mxu0 }
  0xa5   :  { %v259_v41 = vadd.f32 %v258_v40, %v75_v39  ;;  %v272_v43 = vpop.f32.mrf.mxu1  ;;  %v372_v40 = vperm.slane %v370_v34, 0 }
  0xa7   :  { %v273_v44 = vadd.f32 %v272_v43, %v259_v41  ;;  %v373_v41 = vperm.slane %v370_v34, 1 }
  0xa9   :  { %v309_v52 = vadd.f32 %v305_v46, %v273_v44  ;;  %v382_v44 = vperm.slane %v380_v37, 0 }
  0xac   :  { %v286_v45 = vpop.f32.mrf.mxu2  ;;  %v260_v49 = vpop.f32.mrf.mxu0 }
  0xad   :  { %v287_v47 = vadd.f32 %v286_v45, %v76_v42  ;;  %v300_v48 = vpop.f32.mrf.mxu3  ;;  %v261_v53 = vadd.f32 %v260_v49, %v75_v39  ;;  %v274_v56 = vpop.f32.mrf.mxu1  ;;  %v383_v45 = vperm.slane %v380_v37, 1 }
  0xaf   :  { %v301_v51 = vadd.f32 %v300_v48, %v287_v47  ;;  %v275_v58 = vadd.f32 %v274_v56, %v261_v53 }
  0xb1   :  { %v310_v54 = vadd.f32 %v306_v50, %v301_v51  ;;  %v311_v0 = vadd.f32 %v307_v60, %v275_v58 }
  0xb3   :  { %v313_v55 = vadd.f32 %v310_v54, %v309_v52 }
  0xb4   :  { %v288_v57 = vpop.f32.mrf.mxu2 }
  0xb5   :  { %v289_v59 = vadd.f32 %v288_v57, %v76_v42  ;;  %314 = vadd.xlane.f32.xlu0 %v313_v55  ;;  %v302_v61 = vpop.f32.mrf.mxu3 }
  0xb7   :  { %v303_v63 = vadd.f32 %v302_v61, %v289_v59 }
  0xb9   :  { %v312_v1 = vadd.f32 %v308_v62, %v303_v63 }
  0xbb   :  { %v316_v2 = vadd.f32 %v312_v1, %v311_v0 }
  0xbd   :  { %317 = vadd.xlane.f32.xlu0 %v316_v2 }
 0x128   :  { %v315_v10 = vpop.xlane.xlu0 %314 }
 0x129   :  { %v326_v11 = vmul.f32 %v325_v9, %v315_v10 }
 0x12b   :  { %v328_v12 = vsub.f32 %v309_v52, %v326_v11  ;;  %v329_v13 = vsub.f32 %v310_v54, %v326_v11 }
 0x12d   :  { %v332_v14 = vmul.f32 %v328_v12, %v328_v12  ;;  %v333_v15 = vmul.f32 %v329_v13, %v329_v13 }
 0x12f   :  { %v336_v16 = vadd.f32 %v333_v15, %v332_v14 }
 0x130   :  { %v318_v17 = vpop.xlane.xlu0 %317 }
 0x131   :  { %v327_v18 = vmul.f32 %v325_v9, %v318_v17  ;;  %337 = vadd.xlane.f32.xlu1 %v336_v16 }
 0x133   :  { %v330_v19 = vsub.f32 %v311_v0, %v327_v18  ;;  %v331_v20 = vsub.f32 %v312_v1, %v327_v18 }
 0x135   :  { %v334_v21 = vmul.f32 %v330_v19, %v330_v19  ;;  %v335_v22 = vmul.f32 %v331_v20, %v331_v20 }
 0x137   :  { %v339_v23 = vadd.f32 %v335_v22, %v334_v21 }
 0x139   :  { %340 = vadd.xlane.f32.xlu1 %v339_v23 }
 0x1a4   :  { %v338_v24 = vpop.xlane.xlu1 %337 }
 0x1a5   :  { %v342_v25 = vmul.f32 %v338_v24, %v325_v9 }
 0x1a7   :  { %v344_v26 = vadd.f32 1e-12, %v342_v25 }
 0x1a9   :  { %575 = vrsqrt.f32 %v344_v26  ;;  %vm352_vm2 = vweird.f32 %v344_v26 }
 0x1ac   :  { %v341_v27 = vpop.xlane.xlu1 %340 }
 0x1ad   :  { %v343_v28 = vmul.f32 %v341_v27, %v325_v9 }
 0x1af   :  { %v576_v29 = vpop.eup %575  ;;  %v345_v30 = vadd.f32 1e-12, %v343_v28 }
 0x1b0   :  { %v347_v31 = vmul.f32 %v576_v29, %v344_v26  ;;  %vm353_vm1 = vweird.f32 %v576_v29 }
 0x1b1   :  { %577 = vrsqrt.f32 %v345_v30  ;;  %vm354_vm3 = vmor %vm352_vm2, %vm353_vm1  ;;  %vm362_vm5 = vweird.f32 %v345_v30 }
 0x1b2   :  { %v348_v32 = vmul.f32 %v576_v29, %v347_v31 }
 0x1b4   :  { %v349_v33 = vmul.f32 0.5, %v348_v32 }
 0x1b6   :  { %v350_v35 = vsub.f32 1.5, %v349_v33 }
 0x1b7   :  { %v578_v36 = vpop.eup %577 }
 0x1b8   :  { %v351_v38 = vmul.f32 %v576_v29, %v350_v35  ;;  %v357_v39 = vmul.f32 %v578_v36, %v345_v30  ;;  %vm363_vm4 = vweird.f32 %v578_v36 }
 0x1b9   :  { %vm364_vm6 = vmor %vm362_vm5, %vm363_vm4 }
 0x1ba   :  { %v355_v42 = vsel %vm354_vm3, %v576_v29, %v351_v38  ;;  %v358_v43 = vmul.f32 %v578_v36, %v357_v39 }
 0x1bb   :  { %v366_v46 = vmul.f32 %v355_v42, %v328_v12  ;;  %v367_v47 = vmul.f32 %v355_v42, %v329_v13 }
 0x1bc   :  { %v359_v48 = vmul.f32 0.5, %v358_v43 }
 0x1bd   :  { %v376_v49 = vmul.f32 %v372_v40, %v366_v46  ;;  %v377_v50 = vmul.f32 %v373_v41, %v367_v47 }
 0x1be   :  { %v360_v51 = vsub.f32 1.5, %v359_v48 }
 0x1bf   :  { %v386_v52 = vadd.f32 %v382_v44, %v376_v49  ;;  %v387_v53 = vadd.f32 %v383_v45, %v377_v50 }
 0x1c0   :  { %v361_v54 = vmul.f32 %v578_v36, %v360_v51 }
 0x1c1   :  { %390 = vst [vmem:[%s698_s6] sm:$0xff] %v386_v52 }
 0x1c2   :  { %391 = vst [vmem:[%s698_s6 + $0x8] sm:$0xff] %v387_v53  ;;  %v365_v55 = vsel %vm364_vm6, %v578_v36, %v361_v54 }
 0x1c3   :  { %v368_v56 = vmul.f32 %v365_v55, %v330_v19  ;;  %v369_v57 = vmul.f32 %v365_v55, %v331_v20 }
 0x1c5   :  { %v378_v58 = vmul.f32 %v372_v40, %v368_v56  ;;  %v379_v59 = vmul.f32 %v373_v41, %v369_v57 }
 0x1c7   :  { %v388_v60 = vadd.f32 %v382_v44, %v378_v58  ;;  %v389_v61 = vadd.f32 %v383_v45, %v379_v59 }
 0x1c9   :  { %392 = vst [vmem:[%s698_s6 + $0x10] sm:$0xff] %v388_v60 }
 0x1ca   :  { %393 = vst [vmem:[%s698_s6 + $0x18] sm:$0xff] %v389_v61 }
 0x1cb   :  { %398 = vsyncpa [#allocation3], 1 }

// kernel: bert_lstm_forward.27
= control target key start
LH: loop header
LB: loop body
LE: loop exit
PB: predicated region body
PF: predicated region fallthrough
CT: control target
= control target key end

     0   :  { %s392_s1 = inlined_call_operand.vmem [shape: bf16[2,128,128], index: 1, kind: input, shape index: {}]   ;;  %s393_s0 = inlined_call_operand.vmem [shape: bf16[2,16,128], index: 0, kind: input, shape index: {}]   ;;  %s394_s2 = inlined_call_operand.vmem [shape: f32[1,128], index: 2, kind: input, shape index: {}]   ;;  %s395_s3 = inlined_call_operand.vmem [shape: f32[16,128], index: 3, kind: output, shape index: {}]  }
   0x1   :  { %v307_v0 = vld [vmem:[%s392_s1 + $0x78] sm:$0xff]  ;;  %v306_v2 = vld [vmem:[%s392_s1 + $0x70] sm:$0xff]  ;;  %v305_v4 = vld [vmem:[%s392_s1 + $0x68] sm:$0xff] }
   0x2   :  { %v298_v1 = vld [vmem:[%s392_s1 + $0x38] sm:$0xff]  ;;  %106 = vmatpush.bf16.msra.mxu0 %v307_v0  ;;  %v297_v3 = vld [vmem:[%s392_s1 + $0x30] sm:$0xff]  ;;  %v296_v5 = vld [vmem:[%s392_s1 + $0x28] sm:$0xff] }
   0x3   :  { %174 = vmatpush.bf16.msra.mxu1 %v298_v1  ;;  %v304_v6 = vld [vmem:[%s392_s1 + $0x60] sm:$0xff]  ;;  %v303_v8 = vld [vmem:[%s392_s1 + $0x58] sm:$0xff]  ;;  %v302_v10 = vld [vmem:[%s392_s1 + $0x50] sm:$0xff] }
   0x4   :  { %v295_v7 = vld [vmem:[%s392_s1 + $0x20] sm:$0xff]  ;;  %v294_v9 = vld [vmem:[%s392_s1 + $0x18] sm:$0xff]  ;;  %v293_v11 = vld [vmem:[%s392_s1 + $0x10] sm:$0xff] }
   0x5   :  { %v301_v12 = vld [vmem:[%s392_s1 + $0x48] sm:$0xff]  ;;  %v300_v14 = vld [vmem:[%s392_s1 + $0x40] sm:$0xff] }
   0x6   :  { %107 = vmatpush.bf16.msra.mxu0 %v306_v2  ;;  %v292_v13 = vld [vmem:[%s392_s1 + $0x8] sm:$0xff]  ;;  %v291_v15 = vld [vmem:[%s392_s1] sm:$0xff] }
   0x7   :  { %175 = vmatpush.bf16.msra.mxu1 %v297_v3  ;;  %v299_v16 = vld [vmem:[%s393_s0 + $0x8] sm:$0xff]  ;;  %v290_v17 = vld [vmem:[%s393_s0] sm:$0xff] }
   0x8   :  { %v308_v18 = vld [vmem:[%s394_s2] ss:$0 sm:$0xff] }
   0xa   :  { %108 = vmatpush.bf16.msra.mxu0 %v305_v4 }
   0xb   :  { %176 = vmatpush.bf16.msra.mxu1 %v296_v5 }
   0xe   :  { %109 = vmatpush.bf16.msra.mxu0 %v304_v6 }
   0xf   :  { %177 = vmatpush.bf16.msra.mxu1 %v295_v7 }
  0x12   :  { %110 = vmatpush.bf16.msra.mxu0 %v303_v8 }
  0x13   :  { %178 = vmatpush.bf16.msra.mxu1 %v294_v9 }
  0x16   :  { %111 = vmatpush.bf16.msra.mxu0 %v302_v10 }
  0x17   :  { %179 = vmatpush.bf16.msra.mxu1 %v293_v11 }
  0x1a   :  { %112 = vmatpush.bf16.msra.mxu0 %v301_v12 }
  0x1b   :  { %180 = vmatpush.bf16.msra.mxu1 %v292_v13 }
  0x1e   :  { %113 = vmatpush.bf16.msra.mxu0 %v300_v14 }
  0x1f   :  { %181 = vmatpush.bf16.msra.mxu1 %v291_v15 }
  0x21   :  { %114 = vmatmul.bf16.vlgmr.msra.gmra.mxu0 %v299_v16 }
  0x22   :  { %182 = vmatmul.bf16.vlgmr.msra.gmra.mxu1 %v290_v17 }
  0x9e   :  { %v115_v19 = vpop.f32.mrf.mxu0 }
  0x9f   :  { %v183_v20 = vpop.f32.mrf.mxu1 }
  0xa0   :  { %v184_v21 = vadd.f32 %v183_v20, %v115_v19 }
  0xa2   :  { %v192_v22 = vadd.f32 %v308_v18, %v184_v21 }
  0xa4   :  { %194 = vst [vmem:[%s395_s3] sm:$0xff] %v192_v22 }
  0xa6   :  { %v117_v23 = vpop.f32.mrf.mxu0 }
  0xa7   :  { %v185_v24 = vpop.f32.mrf.mxu1 }
  0xa8   :  { %v186_v25 = vadd.f32 %v185_v24, %v117_v23 }
  0xaa   :  { %v193_v26 = vadd.f32 %v308_v18, %v186_v25 }
  0xac   :  { %195 = vst [vmem:[%s395_s3 + $0x8] sm:$0xff] %v193_v26 }

// kernel: bert_lstm_forward.25
= control target key start
LH: loop header
LB: loop body
LE: loop exit
PB: predicated region body
PF: predicated region fallthrough
CT: control target
= control target key end

     0   :  { %8 = vsyncpa [#allocation3], 0  ;;  %s1654_s0 = inlined_call_operand.vmem [shape: f32[16,256], index: 0, kind: input, shape index: {}]   ;;  %s1655_s1 = inlined_call_operand.hbm [shape: bf16[2,256,512], index: 1, kind: input, shape index: {}]   ;;  %s1656_s2 = inlined_call_operand.vmem [shape: f32[2,1,512], index: 2, kind: input, shape index: {}]   ;;  %s1657_s3 = inlined_call_operand.vmem [shape: bf16[2,16,512], index: 3, kind: output, shape index: {}]  }
   0x1   :  { %10 = vsyncpa [#allocation3 + $0x1], 0  ;;  %s1403_s12 = smov 0   ;;  %s1405_s13 = smov 0  }
   0x2   :  { %s1407_s14 = smov 0   ;;  %s1409_s15 = smov 0  }
   0x3   :  { %s1411_s16 = smov 0   ;;  %s1413_s17 = smov 0  }
   0x4 LB: > { %s905_s18 = sadd.s32 4294967295, %s1379_s17   ;;  %s28_s19 = sadd.s32 1, %s1375_s16  ;;  %s1379_s17 = sphi %s1413_s17, %s16_s17   ;;  %s1375_s16 = sphi %s1411_s16, %s1664_s16   ;;  %s1371_s15 = sphi %s1409_s15, %s1663_s15   ;;  %s1367_s14 = sphi %s1407_s14, %s1662_s14   ;;  %s1363_s13 = sphi %s1405_s13, %s1661_s13   ;;  %s1359_s12 = sphi %s1403_s12, %s1660_s12  }
   0x5   : > { %p30_p0 = scmp.ge.s32.totalorder %s28_s19, 2  ;;  %s61_s20 = sadd.s32 1, %s1367_s14 }
   0x6   : > { %p68_p1 = scmp.ne.s32.totalorder %s1367_s14, %s1363_s13  ;;  %p69_p2 = scmp.eq.s32.totalorder %s1379_s17, 0 }
   0x7   : > { %s1666_s19 = smov (%p30_p0, %s28_s19), 0  ;;  %p74_p4 = scmp.ne.s32.totalorder %s1363_s13, %s1359_s12 }
   0x8   : > { %p1439_p3 = por %p69_p2, %p68_p1  ;;  %s58_s22 = ssub.s32 %s1375_s16, %s1666_s19 }
   0x9   : > { %p75_p5 = scmp.eq.s32.totalorder %s905_s18, 0  ;;  %p59_p6 = scmp.eq.s32.totalorder %s58_s22, 0 }
   0xa   : > { %p1248_p8 = scmp.lt.s32.totalorder %s1379_s17, 2  ;;  %s162_s25 = sand.u32 1, %s1367_s14  }
   0xb   : > { %p1446_p7 = por %p75_p5, %p74_p4  ;;  %s1176_s26 = sshll.u32 %s1375_s16, 9 }
   0xc   : > { %s1452_s24 = scalar_select %p59_p6, %s1367_s14, %s61_s20  }
   0xd   : > { %s910_s27 = sshll.u32 %s162_s25, 9  ;;  %s171_s30 = scalar_lea.hbm %s1655_s1, %s1176_s26 }
   0xe   : > { %s172_s4 = sshll.u32 %s171_s30, 4  ;;  %s166_s5 = scalar_lea.vmem [#allocation2], %s910_s27  ;;  %s173_s4 = int_to_ptr.hbm [resolvable:$true] %s172_s4 }
   0xf   : > { %s174_s6 = sshll.u32 %s166_s5, 4  ;;  %p1245_p9 = pnand %p1248_p8, %p1439_p3  ;;  %s175_s6 = int_to_ptr.vmem [resolvable:$true] %s174_s6 }
  0x10   : > { %p913_p10 = scmp.ge.s32.totalorder %s1379_s17, 1  ;;  %p189_p11 = scmp.lt.s32.totalorder %s1379_s17, 3 }
  0x11   : > { %s163_s7 = scalar_lea.sflag [#allocation3], %s162_s25  ;;  %s1381_s8 = smov 256  }
  0x12   : > { %s1382_s9 = smov 16   ;;  %p190_p12 = pnand %p913_p10, %p189_p11 }
  0x13   : > { %1247 = dma.hbm_to_vmem [thread:$0]  (!%p1245_p9), %s173_s4, 8192, %s175_s6, %s163_s7, %s1381_s8, %s1381_s8, %s1382_s9  }
  0x14   : > { %193 = sbr.rel (%p190_p12) target bundleno = 241 (0xf1), region = 32  ;;  %s195_s10 = sand.u32 (!%p190_p12), 1, %s1363_s13  }
  0x15   : > { %s914_s11 = sshll.u32 (!%p190_p12), %s195_s10, 9  ;;  %s196_s12 = scalar_lea.sflag (!%p190_p12), [#allocation3], %s195_s10 }
  0x16   : > { %s1464_s18 = scalar_lea.vmem (!%p190_p12), [#allocation2], %s914_s11 }
  0x19   : > { %1354 = dma.done.wait (%p1446_p7), %s196_s12, 8192  }
  0x1a   : > { %1356 = vsyncadd (%p1446_p7), %s196_s12, 4294959104  ;;  %v1032_v0 = vld [vmem:[%s1464_s18 + $0xe0] sm:$0xf]  ;;  %v1208_v1 = vld [vmem:[%s1464_s18 + $0xec] sm:$0xf0]  ;;  %p245_p13 = scmp.lt.s32.totalorder %s1371_s15, 1 }
  0x1b   : > { %v1160_v2 = vld [vmem:[%s1464_s18 + $0x1e0] sm:$0xf]  ;;  %v1033_v3 = vor.u32 %v1208_v1, %v1032_v0  ;;  %v1240_v4 = vld [vmem:[%s1464_s18 + $0x1ec] sm:$0xf0]  ;;  %v1206_v5 = vld [vmem:[%s1464_s18 + $0xe4] sm:$0xf] }
  0x1c   : > { %v1034_v6 = vld [vmem:[%s1464_s18 + $0xf0] sm:$0xf0]  ;;  %v1161_v7 = vor.u32 %v1240_v4, %v1160_v2  ;;  %v1238_v9 = vld [vmem:[%s1464_s18 + $0x1e4] sm:$0xf]  ;;  %v1016_v11 = vld [vmem:[%s1464_s18 + $0xc0] sm:$0xf] }
  0x1d   : > { %v1037_v8 = vor.u32 %v1206_v5, %v1034_v6  ;;  %v1162_v10 = vld [vmem:[%s1464_s18 + $0x1f0] sm:$0xf0]  ;;  %660 = vmatpush.bf16.msra.mxu0 %v1033_v3  ;;  %v1204_v13 = vld [vmem:[%s1464_s18 + $0xcc] sm:$0xf0]  ;;  %v1144_v14 = vld [vmem:[%s1464_s18 + $0x1c0] sm:$0xf] }
  0x1e   : > { %v1165_v12 = vor.u32 %v1238_v9, %v1162_v10  ;;  %v1236_v15 = vld [vmem:[%s1464_s18 + $0x1cc] sm:$0xf0]  ;;  %674 = vmatpush.bf16.msra.mxu1 %v1161_v7  ;;  %v1017_v16 = vor.u32 %v1204_v13, %v1016_v11  ;;  %v1202_v18 = vld [vmem:[%s1464_s18 + $0xc4] sm:$0xf]  ;;  %v1018_v19 = vld [vmem:[%s1464_s18 + $0xd0] sm:$0xf0] }
  0x1f   : > { %688 = vmatpush.bf16.msra.mxu2 %v1037_v8  ;;  %v1145_v17 = vor.u32 %v1236_v15, %v1144_v14  ;;  %v1234_v20 = vld [vmem:[%s1464_s18 + $0x1c4] sm:$0xf]  ;;  %v1021_v21 = vor.u32 %v1202_v18, %v1018_v19  ;;  %v1146_v22 = vld [vmem:[%s1464_s18 + $0x1d0] sm:$0xf0]  ;;  %v1000_v23 = vld [vmem:[%s1464_s18 + $0xa0] sm:$0xf] }
  0x20   : > { %702 = vmatpush.bf16.msra.mxu3 %v1165_v12  ;;  %v1200_v24 = vld [vmem:[%s1464_s18 + $0xac] sm:$0xf0]  ;;  %v1149_v25 = vor.u32 %v1234_v20, %v1146_v22  ;;  %v1128_v26 = vld [vmem:[%s1464_s18 + $0x1a0] sm:$0xf]  ;;  %v1198_v28 = vld [vmem:[%s1464_s18 + $0xa4] sm:$0xf] }
  0x21   : > { %v1232_v27 = vld [vmem:[%s1464_s18 + $0x1ac] sm:$0xf0]  ;;  %661 = vmatpush.bf16.msra.mxu0 %v1017_v16  ;;  %v1001_v29 = vor.u32 %v1200_v24, %v1000_v23  ;;  %v1002_v30 = vld [vmem:[%s1464_s18 + $0xb0] sm:$0xf0]  ;;  %v1230_v31 = vld [vmem:[%s1464_s18 + $0x1a4] sm:$0xf] }
  0x22   : > { %v1130_v32 = vld [vmem:[%s1464_s18 + $0x1b0] sm:$0xf0]  ;;  %675 = vmatpush.bf16.msra.mxu1 %v1145_v17  ;;  %v1129_v33 = vor.u32 %v1232_v27, %v1128_v26  ;;  %v1005_v34 = vor.u32 %v1198_v28, %v1002_v30  ;;  %v984_v35 = vld [vmem:[%s1464_s18 + $0x80] sm:$0xf]  ;;  %v1196_v36 = vld [vmem:[%s1464_s18 + $0x8c] sm:$0xf0] }
  0x23   : > { %689 = vmatpush.bf16.msra.mxu2 %v1021_v21  ;;  %v1112_v37 = vld [vmem:[%s1464_s18 + $0x180] sm:$0xf]  ;;  %v1133_v38 = vor.u32 %v1230_v31, %v1130_v32  ;;  %v1228_v39 = vld [vmem:[%s1464_s18 + $0x18c] sm:$0xf0]  ;;  %v1194_v40 = vld [vmem:[%s1464_s18 + $0x84] sm:$0xf]  ;;  %v985_v44 = vor.u32 %v1196_v36, %v984_v35 }
  0x24   : > { %703 = vmatpush.bf16.msra.mxu3 %v1149_v25  ;;  %v986_v41 = vld [vmem:[%s1464_s18 + $0x90] sm:$0xf0]  ;;  %v1226_v42 = vld [vmem:[%s1464_s18 + $0x184] sm:$0xf]  ;;  %v1113_v45 = vor.u32 %v1228_v39, %v1112_v37  ;;  %v968_v47 = vld [vmem:[%s1464_s18 + $0x60] sm:$0xf] }
  0x25   : > { %v1114_v43 = vld [vmem:[%s1464_s18 + $0x190] sm:$0xf0]  ;;  %662 = vmatpush.bf16.msra.mxu0 %v1001_v29  ;;  %v989_v46 = vor.u32 %v1194_v40, %v986_v41  ;;  %v1192_v48 = vld [vmem:[%s1464_s18 + $0x6c] sm:$0xf0]  ;;  %v1096_v49 = vld [vmem:[%s1464_s18 + $0x160] sm:$0xf] }
  0x26   : > { %676 = vmatpush.bf16.msra.mxu1 %v1129_v33  ;;  %v1117_v50 = vor.u32 %v1226_v42, %v1114_v43  ;;  %v1224_v51 = vld [vmem:[%s1464_s18 + $0x16c] sm:$0xf0]  ;;  %v1190_v52 = vld [vmem:[%s1464_s18 + $0x64] sm:$0xf]  ;;  %v970_v53 = vld [vmem:[%s1464_s18 + $0x70] sm:$0xf0]  ;;  %v969_v56 = vor.u32 %v1192_v48, %v968_v47 }
  0x27   : > { %690 = vmatpush.bf16.msra.mxu2 %v1005_v34  ;;  %v1222_v54 = vld [vmem:[%s1464_s18 + $0x164] sm:$0xf]  ;;  %v1098_v55 = vld [vmem:[%s1464_s18 + $0x170] sm:$0xf0]  ;;  %v1097_v57 = vor.u32 %v1224_v51, %v1096_v49  ;;  %v973_v58 = vor.u32 %v1190_v52, %v970_v53  ;;  %v952_v59 = vld [vmem:[%s1464_s18 + $0x40] sm:$0xf] }
  0x28   : > { %704 = vmatpush.bf16.msra.mxu3 %v1133_v38  ;;  %v1188_v60 = vld [vmem:[%s1464_s18 + $0x4c] sm:$0xf0]  ;;  %v1080_v61 = vld [vmem:[%s1464_s18 + $0x140] sm:$0xf]  ;;  %v1101_v62 = vor.u32 %v1222_v54, %v1098_v55  ;;  %v1186_v0 = vld [vmem:[%s1464_s18 + $0x44] sm:$0xf] }
  0x29   : > { %663 = vmatpush.bf16.msra.mxu0 %v985_v44  ;;  %v1220_v63 = vld [vmem:[%s1464_s18 + $0x14c] sm:$0xf0]  ;;  %v954_v1 = vld [vmem:[%s1464_s18 + $0x50] sm:$0xf0]  ;;  %v1218_v2 = vld [vmem:[%s1464_s18 + $0x144] sm:$0xf]  ;;  %v953_v4 = vor.u32 %v1188_v60, %v952_v59 }
  0x2a   : > { %677 = vmatpush.bf16.msra.mxu1 %v1113_v45  ;;  %v1082_v3 = vld [vmem:[%s1464_s18 + $0x150] sm:$0xf0]  ;;  %v1081_v5 = vor.u32 %v1220_v63, %v1080_v61  ;;  %v957_v6 = vor.u32 %v1186_v0, %v954_v1  ;;  %v936_v7 = vld [vmem:[%s1464_s18 + $0x20] sm:$0xf]  ;;  %v1184_v8 = vld [vmem:[%s1464_s18 + $0x2c] sm:$0xf0] }
  0x2b   : > { %691 = vmatpush.bf16.msra.mxu2 %v989_v46  ;;  %v1064_v9 = vld [vmem:[%s1464_s18 + $0x120] sm:$0xf]  ;;  %v1085_v10 = vor.u32 %v1218_v2, %v1082_v3  ;;  %v1216_v11 = vld [vmem:[%s1464_s18 + $0x12c] sm:$0xf0]  ;;  %v1182_v12 = vld [vmem:[%s1464_s18 + $0x24] sm:$0xf]  ;;  %v937_v16 = vor.u32 %v1184_v8, %v936_v7 }
  0x2c   : > { %705 = vmatpush.bf16.msra.mxu3 %v1117_v50  ;;  %v938_v13 = vld [vmem:[%s1464_s18 + $0x30] sm:$0xf0]  ;;  %v1214_v14 = vld [vmem:[%s1464_s18 + $0x124] sm:$0xf]  ;;  %v920_v17 = vld [vmem:[%s1464_s18] sm:$0xf]  ;;  %v1065_v20 = vor.u32 %v1216_v11, %v1064_v9 }
  0x2d   : > { %664 = vmatpush.bf16.msra.mxu0 %v969_v56  ;;  %v1066_v15 = vld [vmem:[%s1464_s18 + $0x130] sm:$0xf0]  ;;  %v1180_v18 = vld [vmem:[%s1464_s18 + $0xc] sm:$0xf0]  ;;  %v1048_v19 = vld [vmem:[%s1464_s18 + $0x100] sm:$0xf]  ;;  %v941_v21 = vor.u32 %v1182_v12, %v938_v13 }
  0x2e   : > { %678 = vmatpush.bf16.msra.mxu1 %v1097_v57  ;;  %v1212_v22 = vld [vmem:[%s1464_s18 + $0x10c] sm:$0xf0]  ;;  %v1178_v23 = vld [vmem:[%s1464_s18 + $0x4] sm:$0xf]  ;;  %v922_v24 = vld [vmem:[%s1464_s18 + $0x10] sm:$0xf0]  ;;  %v1069_v25 = vor.u32 %v1214_v14, %v1066_v15  ;;  %v921_v32 = vor.u32 %v1180_v18, %v920_v17 }
  0x2f   : > { %692 = vmatpush.bf16.msra.mxu2 %v973_v58  ;;  %v1210_v26 = vld [vmem:[%s1464_s18 + $0x104] sm:$0xf]  ;;  %v1050_v27 = vld [vmem:[%s1464_s18 + $0x110] sm:$0xf0]  ;;  %v1040_v28 = vld [vmem:[%s1464_s18 + $0xe8] sm:$0xf]  ;;  %v1049_v36 = vor.u32 %v1212_v22, %v1048_v19  ;;  %v925_v37 = vor.u32 %v1178_v23, %v922_v24 }
  0x30   : > { %706 = vmatpush.bf16.msra.mxu3 %v1101_v62  ;;  %v1209_v29 = vld [vmem:[%s1464_s18 + $0xf4] sm:$0xf0]  ;;  %v1168_v30 = vld [vmem:[%s1464_s18 + $0x1e8] sm:$0xf]  ;;  %v1207_v33 = vld [vmem:[%s1464_s18 + $0xec] sm:$0xf]  ;;  %v1053_v41 = vor.u32 %v1210_v26, %v1050_v27 }
  0x31   : > { %665 = vmatpush.bf16.msra.mxu0 %v953_v4  ;;  %v1241_v31 = vld [vmem:[%s1464_s18 + $0x1f4] sm:$0xf0]  ;;  %v1042_v34 = vld [vmem:[%s1464_s18 + $0xf8] sm:$0xf0]  ;;  %v1239_v35 = vld [vmem:[%s1464_s18 + $0x1ec] sm:$0xf]  ;;  %v1041_v42 = vor.u32 %v1209_v29, %v1040_v28 }
  0x32   : > { %679 = vmatpush.bf16.msra.mxu1 %v1081_v5  ;;  %v1170_v38 = vld [vmem:[%s1464_s18 + $0x1f8] sm:$0xf0]  ;;  %v260_v39 = vld [vmem:[%s1654_s0] sm:$0xff]  ;;  %v262_v40 = vld [vmem:[%s1654_s0 + $0x10] sm:$0xff]  ;;  %v1169_v45 = vor.u32 %v1241_v31, %v1168_v30  ;;  %v1045_v46 = vor.u32 %v1207_v33, %v1042_v34  ;;  %s1668_s15 = smov (!%p245_p13, %s1371_s15), 1 }
  0x33   : > { %693 = vmatpush.bf16.msra.mxu2 %v957_v6  ;;  %v1024_v43 = vld [vmem:[%s1464_s18 + $0xc8] sm:$0xf]  ;;  %v1205_v44 = vld [vmem:[%s1464_s18 + $0xd4] sm:$0xf0]  ;;  %v1173_v50 = vor.u32 %v1239_v35, %v1170_v38  ;;  %v1203_v52 = vld [vmem:[%s1464_s18 + $0xcc] sm:$0xf]  ;;  %v1560_v54 = vpack.c.bf16 %v262_v40, %v260_v39 }
  0x34   : > { %707 = vmatpush.bf16.msra.mxu3 %v1085_v10  ;;  %v1152_v47 = vld [vmem:[%s1464_s18 + $0x1c8] sm:$0xf]  ;;  %v263_v49 = vld [vmem:[%s1654_s0 + $0x18] sm:$0xff]  ;;  %v1235_v55 = vld [vmem:[%s1464_s18 + $0x1cc] sm:$0xf]  ;;  %v1025_v58 = vor.u32 %v1205_v44, %v1024_v43  ;;  %s915_s29 = sshll.u32 %s1668_s15, 2 }
  0x35   : > { %666 = vmatpush.bf16.msra.mxu0 %v937_v16  ;;  %v261_v48 = vld [vmem:[%s1654_s0 + $0x8] sm:$0xff]  ;;  %v1237_v51 = vld [vmem:[%s1464_s18 + $0x1d4] sm:$0xf0]  ;;  %v1026_v53 = vld [vmem:[%s1464_s18 + $0xd8] sm:$0xf0]  ;;  %s248_s5 = scalar_lea.vmem %s1656_s2, %s915_s29  ;;  %s1177_s6 = sshll.u32 %s1668_s15, 5 }
  0x36   : > { %680 = vmatpush.bf16.msra.mxu1 %v1065_v20  ;;  %v1154_v56 = vld [vmem:[%s1464_s18 + $0x1d8] sm:$0xf0]  ;;  %v1564_v57 = vpack.c.bf16 %v263_v49, %v261_v48  ;;  %v1153_v59 = vor.u32 %v1237_v51, %v1152_v47  ;;  %v1029_v60 = vor.u32 %v1203_v52, %v1026_v53  ;;  %v1008_v61 = vld [vmem:[%s1464_s18 + $0xa8] sm:$0xf]  ;;  %v1201_v62 = vld [vmem:[%s1464_s18 + $0xb4] sm:$0xf0]  ;;  %s1630_s9 = scalar_lea.vmem %s1657_s3, %s1177_s6 }
  0x37   : > { %694 = vmatpush.bf16.msra.mxu2 %v941_v21  ;;  %v1136_v63 = vld [vmem:[%s1464_s18 + $0x1a8] sm:$0xf]  ;;  %v1157_v0 = vor.u32 %v1235_v55, %v1154_v56  ;;  %v1233_v1 = vld [vmem:[%s1464_s18 + $0x1b4] sm:$0xf0]  ;;  %v1199_v2 = vld [vmem:[%s1464_s18 + $0xac] sm:$0xf]  ;;  %v1009_v6 = vor.u32 %v1201_v62, %v1008_v61 }
  0x38   : > { %708 = vmatpush.bf16.msra.mxu3 %v1069_v25  ;;  %v1010_v3 = vld [vmem:[%s1464_s18 + $0xb8] sm:$0xf0]  ;;  %v1231_v4 = vld [vmem:[%s1464_s18 + $0x1ac] sm:$0xf]  ;;  %v1137_v7 = vor.u32 %v1233_v1, %v1136_v63  ;;  %v992_v9 = vld [vmem:[%s1464_s18 + $0x88] sm:$0xf] }
  0x39   : > { %667 = vmatpush.bf16.msra.mxu0 %v921_v32  ;;  %v1138_v5 = vld [vmem:[%s1464_s18 + $0x1b8] sm:$0xf0]  ;;  %v1013_v8 = vor.u32 %v1199_v2, %v1010_v3  ;;  %v1197_v10 = vld [vmem:[%s1464_s18 + $0x94] sm:$0xf0]  ;;  %v1120_v11 = vld [vmem:[%s1464_s18 + $0x188] sm:$0xf] }
  0x3a   : > { %681 = vmatpush.bf16.msra.mxu1 %v1049_v36  ;;  %v1141_v12 = vor.u32 %v1231_v4, %v1138_v5  ;;  %v1229_v13 = vld [vmem:[%s1464_s18 + $0x194] sm:$0xf0]  ;;  %v1195_v14 = vld [vmem:[%s1464_s18 + $0x8c] sm:$0xf]  ;;  %v994_v15 = vld [vmem:[%s1464_s18 + $0x98] sm:$0xf0]  ;;  %v993_v18 = vor.u32 %v1197_v10, %v992_v9 }
  0x3b   : > { %695 = vmatpush.bf16.msra.mxu2 %v925_v37  ;;  %v1227_v16 = vld [vmem:[%s1464_s18 + $0x18c] sm:$0xf]  ;;  %v1122_v17 = vld [vmem:[%s1464_s18 + $0x198] sm:$0xf0]  ;;  %v1121_v19 = vor.u32 %v1229_v13, %v1120_v11  ;;  %v997_v20 = vor.u32 %v1195_v14, %v994_v15  ;;  %v976_v21 = vld [vmem:[%s1464_s18 + $0x68] sm:$0xf] }
  0x3c   : > { %709 = vmatpush.bf16.msra.mxu3 %v1053_v41  ;;  %668 = vmatmul.bf16.vlgmr.msra.gmra.mxu0 %v1560_v54  ;;  %v1193_v22 = vld [vmem:[%s1464_s18 + $0x74] sm:$0xf0]  ;;  %v1104_v23 = vld [vmem:[%s1464_s18 + $0x168] sm:$0xf]  ;;  %v1125_v24 = vor.u32 %v1227_v16, %v1122_v17  ;;  %v1191_v26 = vld [vmem:[%s1464_s18 + $0x6c] sm:$0xf] }
  0x3d   : > { %716 = vmatpush.bf16.msrb.mxu0 %v1041_v42  ;;  %682 = vmatmul.bf16.vlgmr.msra.gmra.mxu1 %v1564_v57  ;;  %v1225_v25 = vld [vmem:[%s1464_s18 + $0x174] sm:$0xf0]  ;;  %v978_v27 = vld [vmem:[%s1464_s18 + $0x78] sm:$0xf0]  ;;  %v1223_v28 = vld [vmem:[%s1464_s18 + $0x16c] sm:$0xf]  ;;  %v977_v30 = vor.u32 %v1193_v22, %v976_v21 }
  0x3e   : > { %730 = vmatpush.bf16.msrb.mxu1 %v1169_v45  ;;  %696 = vmatmul.bf16.vlgmr.msra.gmra.mxu2 %v1560_v54  ;;  %v1106_v29 = vld [vmem:[%s1464_s18 + $0x178] sm:$0xf0]  ;;  %v1105_v31 = vor.u32 %v1225_v25, %v1104_v23  ;;  %v981_v32 = vor.u32 %v1191_v26, %v978_v27  ;;  %v960_v33 = vld [vmem:[%s1464_s18 + $0x48] sm:$0xf]  ;;  %v1189_v34 = vld [vmem:[%s1464_s18 + $0x54] sm:$0xf0] }
  0x3f   : > { %744 = vmatpush.bf16.msrb.mxu2 %v1045_v46  ;;  %710 = vmatmul.bf16.vlgmr.msra.gmra.mxu3 %v1564_v57  ;;  %v1088_v35 = vld [vmem:[%s1464_s18 + $0x148] sm:$0xf]  ;;  %v1109_v36 = vor.u32 %v1223_v28, %v1106_v29  ;;  %v1221_v37 = vld [vmem:[%s1464_s18 + $0x154] sm:$0xf0]  ;;  %v1187_v38 = vld [vmem:[%s1464_s18 + $0x4c] sm:$0xf]  ;;  %v961_v42 = vor.u32 %v1189_v34, %v960_v33 }
  0x40   : > { %758 = vmatpush.bf16.msrb.mxu3 %v1173_v50  ;;  %v962_v39 = vld [vmem:[%s1464_s18 + $0x58] sm:$0xf0]  ;;  %v1219_v40 = vld [vmem:[%s1464_s18 + $0x14c] sm:$0xf]  ;;  %v1089_v43 = vor.u32 %v1221_v37, %v1088_v35  ;;  %v944_v45 = vld [vmem:[%s1464_s18 + $0x28] sm:$0xf] }
  0x41   : > { %717 = vmatpush.bf16.msrb.mxu0 %v1025_v58  ;;  %v1090_v41 = vld [vmem:[%s1464_s18 + $0x158] sm:$0xf0]  ;;  %v965_v44 = vor.u32 %v1187_v38, %v962_v39  ;;  %v1185_v46 = vld [vmem:[%s1464_s18 + $0x34] sm:$0xf0]  ;;  %v1072_v47 = vld [vmem:[%s1464_s18 + $0x128] sm:$0xf] }
  0x42   : > { %731 = vmatpush.bf16.msrb.mxu1 %v1153_v59  ;;  %v1093_v48 = vor.u32 %v1219_v40, %v1090_v41  ;;  %v1217_v49 = vld [vmem:[%s1464_s18 + $0x134] sm:$0xf0]  ;;  %v1183_v50 = vld [vmem:[%s1464_s18 + $0x2c] sm:$0xf]  ;;  %v946_v51 = vld [vmem:[%s1464_s18 + $0x38] sm:$0xf0]  ;;  %v945_v55 = vor.u32 %v1185_v46, %v944_v45 }
  0x43   : > { %745 = vmatpush.bf16.msrb.mxu2 %v1029_v60  ;;  %v1215_v52 = vld [vmem:[%s1464_s18 + $0x12c] sm:$0xf]  ;;  %v1074_v53 = vld [vmem:[%s1464_s18 + $0x138] sm:$0xf0]  ;;  %v1073_v56 = vor.u32 %v1217_v49, %v1072_v47  ;;  %v949_v58 = vor.u32 %v1183_v50, %v946_v51  ;;  %v928_v59 = vld [vmem:[%s1464_s18 + $0x8] sm:$0xf] }
  0x44   : > { %759 = vmatpush.bf16.msrb.mxu3 %v1157_v0  ;;  %v1181_v60 = vld [vmem:[%s1464_s18 + $0x14] sm:$0xf0]  ;;  %v1056_v61 = vld [vmem:[%s1464_s18 + $0x108] sm:$0xf]  ;;  %v1077_v62 = vor.u32 %v1215_v52, %v1074_v53  ;;  %v1179_v0 = vld [vmem:[%s1464_s18 + $0xc] sm:$0xf] }
  0x45   : > { %718 = vmatpush.bf16.msrb.mxu0 %v1009_v6  ;;  %v1213_v63 = vld [vmem:[%s1464_s18 + $0x114] sm:$0xf0]  ;;  %v930_v1 = vld [vmem:[%s1464_s18 + $0x18] sm:$0xf0]  ;;  %v1211_v2 = vld [vmem:[%s1464_s18 + $0x10c] sm:$0xf]  ;;  %v929_v4 = vor.u32 %v1181_v60, %v928_v59 }
  0x46   : > { %732 = vmatpush.bf16.msrb.mxu1 %v1137_v7  ;;  %v1058_v3 = vld [vmem:[%s1464_s18 + $0x118] sm:$0xf0]  ;;  %v1057_v5 = vor.u32 %v1213_v63, %v1056_v61  ;;  %v933_v6 = vor.u32 %v1179_v0, %v930_v1 }
  0x47   : > { %746 = vmatpush.bf16.msrb.mxu2 %v1013_v8  ;;  %v1061_v7 = vor.u32 %v1211_v2, %v1058_v3  ;;  %v330_v8 = vld [vmem:[%s248_s5] sm:$0xf] }
  0x48   : > { %760 = vmatpush.bf16.msrb.mxu3 %v1141_v12  ;;  %v332_v9 = vperm.slane %v330_v8, 0  ;;  %v333_v13 = vperm.slane %v330_v8, 1  ;;  %v334_v27 = vperm.slane %v330_v8, 2 }
  0x49   : > { %719 = vmatpush.bf16.msrb.mxu0 %v993_v18 }
  0x4a   : > { %733 = vmatpush.bf16.msrb.mxu1 %v1121_v19 }
  0x4b   : > { %747 = vmatpush.bf16.msrb.mxu2 %v997_v20 }
  0x4c   : > { %761 = vmatpush.bf16.msrb.mxu3 %v1125_v24 }
  0x4d   : > { %720 = vmatpush.bf16.msrb.mxu0 %v977_v30  ;;  %v335_v30 = vperm.slane %v330_v8, 3 }
  0x4e   : > { %734 = vmatpush.bf16.msrb.mxu1 %v1105_v31 }
  0x4f   : > { %748 = vmatpush.bf16.msrb.mxu2 %v981_v32 }
  0x50   : > { %762 = vmatpush.bf16.msrb.mxu3 %v1109_v36 }
  0x51   : > { %721 = vmatpush.bf16.msrb.mxu0 %v961_v42 }
  0x52   : > { %735 = vmatpush.bf16.msrb.mxu1 %v1089_v43 }
  0x53   : > { %749 = vmatpush.bf16.msrb.mxu2 %v965_v44 }
  0x54   : > { %763 = vmatpush.bf16.msrb.mxu3 %v1093_v48 }
  0x55   : > { %722 = vmatpush.bf16.msrb.mxu0 %v945_v55 }
  0x56   : > { %736 = vmatpush.bf16.msrb.mxu1 %v1073_v56 }
  0x57   : > { %750 = vmatpush.bf16.msrb.mxu2 %v949_v58 }
  0x58   : > { %764 = vmatpush.bf16.msrb.mxu3 %v1077_v62 }
  0x59   : > { %723 = vmatpush.bf16.msrb.mxu0 %v929_v4 }
  0x5a   : > { %737 = vmatpush.bf16.msrb.mxu1 %v1057_v5 }
  0x5b   : > { %751 = vmatpush.bf16.msrb.mxu2 %v933_v6 }
  0x5c   : > { %765 = vmatpush.bf16.msrb.mxu3 %v1061_v7  ;;  %724 = vmatmul.bf16.vlgmr.msrb.gmra.mxu0 %v1560_v54 }
  0x5d   : > { %738 = vmatmul.bf16.vlgmr.msrb.gmra.mxu1 %v1564_v57 }
  0x5e   : > { %752 = vmatmul.bf16.vlgmr.msrb.gmra.mxu2 %v1560_v54 }
  0x5f   : > { %766 = vmatmul.bf16.vlgmr.msrb.gmra.mxu3 %v1564_v57 }
  0xb9   : > { %v669_v10 = vpop.f32.mrf.mxu0 }
  0xba   : > { %v683_v11 = vpop.f32.mrf.mxu1  ;;  %v670_v12 = vadd.f32 %v669_v10, %v332_v9 }
  0xbc   : > { %v684_v16 = vadd.f32 %v683_v11, %v670_v12 }
  0xc1   : > { %v697_v14 = vpop.f32.mrf.mxu2  ;;  %v671_v57 = vpop.f32.mrf.mxu0 }
  0xc2   : > { %v698_v15 = vadd.f32 %v697_v14, %v333_v13  ;;  %v711_v54 = vpop.f32.mrf.mxu3  ;;  %v672_v19 = vadd.f32 %v671_v57, %v332_v9  ;;  %v685_v20 = vpop.f32.mrf.mxu1 }
  0xc4   : > { %v712_v17 = vadd.f32 %v711_v54, %v698_v15  ;;  %v686_v23 = vadd.f32 %v685_v20, %v672_v19 }
  0xc6   : > { %v772_v18 = vpack.c.bf16 %v712_v17, %v684_v16 }
  0xc8   : > { %776 = vst [vmem:[%s1630_s9] sm:$0xff] %v772_v18 }
  0xc9   : > { %v699_v21 = vpop.f32.mrf.mxu2 }
  0xca   : > { %v700_v22 = vadd.f32 %v699_v21, %v333_v13  ;;  %v713_v24 = vpop.f32.mrf.mxu3 }
  0xcc   : > { %v714_v25 = vadd.f32 %v713_v24, %v700_v22 }
  0xce   : > { %v774_v26 = vpack.c.bf16 %v714_v25, %v686_v23 }
  0xd0   : > { %778 = vst [vmem:[%s1630_s9 + $0x10] sm:$0xff] %v774_v26 }
  0xd9   : > { %v725_v28 = vpop.f32.mrf.mxu0 }
  0xda   : > { %v726_v29 = vadd.f32 %v725_v28, %v334_v27  ;;  %v739_v31 = vpop.f32.mrf.mxu1 }
  0xdc   : > { %v740_v33 = vadd.f32 %v739_v31, %v726_v29 }
  0xe1   : > { %v753_v32 = vpop.f32.mrf.mxu2  ;;  %v727_v37 = vpop.f32.mrf.mxu0 }
  0xe2   : > { %v754_v34 = vadd.f32 %v753_v32, %v335_v30  ;;  %v767_v35 = vpop.f32.mrf.mxu3  ;;  %v728_v39 = vadd.f32 %v727_v37, %v334_v27  ;;  %v741_v42 = vpop.f32.mrf.mxu1 }
  0xe4   : > { %v768_v36 = vadd.f32 %v767_v35, %v754_v34  ;;  %v742_v44 = vadd.f32 %v741_v42, %v728_v39 }
  0xe6   : > { %v773_v38 = vpack.c.bf16 %v768_v36, %v740_v33 }
  0xe8   : > { %777 = vst [vmem:[%s1630_s9 + $0x8] sm:$0xff] %v773_v38 }
  0xe9   : > { %v755_v40 = vpop.f32.mrf.mxu2 }
  0xea   : > { %v756_v41 = vadd.f32 %v755_v40, %v335_v30  ;;  %v769_v43 = vpop.f32.mrf.mxu3 }
  0xec   : > { %v770_v45 = vadd.f32 %v769_v43, %v756_v41 }
  0xee   : > { %v775_v46 = vpack.c.bf16 %v770_v45, %v742_v44 }
  0xf0   : > { %779 = vst [vmem:[%s1630_s9 + $0x18] sm:$0xff] %v775_v46 }
  0xf1 PF: > { %s16_s17 = sadd.s32 1, %s1379_s17   ;;  %s1660_s12 = smov %s1363_s13 }
  0xf2   : > { %p13_p0 = scmp.ge.s32.totalorder %s16_s17, 4   ;;  %s1661_s13 = smov %s1367_s14 }
  0xf3   : > { %s1662_s14 = smov %s1452_s24  ;;  %s1663_s15 = smov %s1375_s16 }
  0xf4   : > { %s1664_s16 = smov %s1666_s19  ;;  %15 = sbr.rel (!%p13_p0) target bundleno = 4 (0x4), region = 78 }
  0xf9   :  { %812 = vsyncpa [#allocation3], 1 }
  0xfa   :  { %814 = vsyncpa [#allocation3 + $0x1], 1 }

// kernel: bert_lstm_forward.26
= control target key start
LH: loop header
LB: loop body
LE: loop exit
PB: predicated region body
PF: predicated region fallthrough
CT: control target
= control target key end

     0   :  { %8 = vsyncpa [#allocation5], 0  ;;  %s1609_s0 = inlined_call_operand.vmem [shape: bf16[2,8,2,512], index: 0, kind: input, shape index: {}]   ;;  %s1610_s1 = inlined_call_operand.hbm [shape: bf16[2,128,512], index: 1, kind: input, shape index: {}]   ;;  %s1611_s2 = inlined_call_operand.vmem [shape: f32[8,2,1], index: 2, kind: input, shape index: {}]   ;;  %s1612_s3 = inlined_call_operand.vmem [shape: bf16[2,8,2,128], index: 3, kind: output, shape index: {}]  }
   0x1   :  { %10 = vsyncpa [#allocation5 + $0x1], 0  ;;  %s1235_s12 = smov 0   ;;  %s1237_s13 = smov 0  }
   0x2   :  { %s1239_s14 = smov 0   ;;  %s1241_s15 = smov 0  }
   0x3   :  { %s1243_s16 = smov 0   ;;  %s1245_s17 = smov 0  }
   0x4 LB: > { %s856_s18 = sadd.s32 4294967295, %s1205_s17   ;;  %s28_s19 = sadd.s32 1, %s1201_s16  ;;  %s1205_s17 = sphi %s1245_s17, %s16_s17   ;;  %s1201_s16 = sphi %s1243_s16, %s1675_s16   ;;  %s1197_s15 = sphi %s1241_s15, %s1674_s15   ;;  %s1193_s14 = sphi %s1239_s14, %s1673_s14   ;;  %s1189_s13 = sphi %s1237_s13, %s1672_s13   ;;  %s1185_s12 = sphi %s1235_s12, %s1671_s12  }
   0x5   : > { %p30_p0 = scmp.ge.s32.totalorder %s28_s19, 2  ;;  %s71_s20 = sadd.s32 1, %s1193_s14 }
   0x6   : > { %p78_p1 = scmp.ne.s32.totalorder %s1193_s14, %s1189_s13  ;;  %p79_p2 = scmp.eq.s32.totalorder %s1205_s17, 0 }
   0x7   : > { %s1677_s19 = smov (%p30_p0, %s28_s19), 0  ;;  %p84_p4 = scmp.ne.s32.totalorder %s1189_s13, %s1185_s12 }
   0x8   : > { %p1271_p3 = por %p79_p2, %p78_p1  ;;  %s68_s22 = ssub.s32 %s1201_s16, %s1677_s19 }
   0x9   : > { %p85_p5 = scmp.eq.s32.totalorder %s856_s18, 0  ;;  %p69_p6 = scmp.eq.s32.totalorder %s68_s22, 0 }
   0xa   : > { %p1043_p8 = scmp.lt.s32.totalorder %s1205_s17, 2  ;;  %s199_s25 = sand.u32 1, %s1193_s14  }
   0xb   : > { %p1278_p7 = por %p85_p5, %p84_p4  ;;  %s1004_s26 = sshll.u32 %s1201_s16, 8 }
   0xc   : > { %s1284_s24 = scalar_select %p69_p6, %s1193_s14, %s71_s20  }
   0xd   : > { %s860_s27 = sshll.u32 %s199_s25, 8  ;;  %s208_s30 = scalar_lea.hbm %s1610_s1, %s1004_s26 }
   0xe   : > { %s209_s4 = sshll.u32 %s208_s30, 4  ;;  %s203_s5 = scalar_lea.vmem [#allocation4], %s860_s27  ;;  %s210_s4 = int_to_ptr.hbm [resolvable:$true] %s209_s4 }
   0xf   : > { %s211_s6 = sshll.u32 %s203_s5, 4  ;;  %p1040_p9 = pnand %p1043_p8, %p1271_p3  ;;  %s212_s6 = int_to_ptr.vmem [resolvable:$true] %s211_s6 }
  0x10   : > { %p864_p10 = scmp.ge.s32.totalorder %s1205_s17, 1  ;;  %p236_p11 = scmp.lt.s32.totalorder %s1205_s17, 3 }
  0x11   : > { %s200_s7 = scalar_lea.sflag [#allocation5], %s199_s25  ;;  %s1211_s8 = smov 256  }
  0x12   : > { %s1212_s9 = smov 16   ;;  %p237_p12 = pnand %p864_p10, %p236_p11 }
  0x13   : > { %1042 = dma.hbm_to_vmem [thread:$0]  (!%p1040_p9), %s210_s4, 4096, %s212_s6, %s200_s7, %s1211_s8, %s1211_s8, %s1212_s9  }
  0x14   : > { %240 = sbr.rel (%p237_p12) target bundleno = 288 (0x120), region = 32  ;;  %s242_s10 = sand.u32 (!%p237_p12), 1, %s1189_s13  }
  0x15   : > { %s865_s11 = sshll.u32 (!%p237_p12), %s242_s10, 8  ;;  %s243_s12 = scalar_lea.sflag (!%p237_p12), [#allocation5], %s242_s10 }
  0x16   : > { %s1296_s18 = scalar_lea.vmem (!%p237_p12), [#allocation4], %s865_s11 }
  0x19   : > { %1180 = dma.done.wait (%p1278_p7), %s243_s12, 4096  }
  0x1a   : > { %1182 = vsyncadd (%p1278_p7), %s243_s12, 4294963200  ;;  %p304_p13 = scmp.lt.s32.totalorder %s1197_s15, 1  ;;  %v1213_v0 = vmov 0.0   ;;  %v1315_v1 = vld [vmem:[%s1296_s18 + $0x4] sm:$0xf]  ;;  %s1506_s30 = smov 0  }
  0x1b   : > { %352 = vst [vmem:[#allocation2] sm:$0x3] %v1213_v0  ;;  %v1318_v2 = vld [vmem:[%s1296_s18] sm:$0xf]  ;;  %v1321_v3 = vld [vmem:[%s1296_s18 + $0xc] sm:$0xf] }
  0x1c   : > { %s305_s20 = scalar_select %p304_p13, %s1197_s15, 1  ;;  %353 = vst [vmem:[#allocation3] sm:$0x3] %v1213_v0  ;;  %v1324_v4 = vld [vmem:[%s1296_s18 + $0x8] sm:$0xf] }
  0x1d   : > { %1615 = vst [vmem:[#allocation7_spill] sm:$0xff] %v1315_v1  ;;  %v1327_v5 = vld [vmem:[%s1296_s18 + $0x10] sm:$0xf0]  ;;  %v1330_v6 = vld [vmem:[%s1296_s18 + $0xc] sm:$0xf0] }
  0x1e   : > { %s866_s21 = sshll.u32 %s305_s20, 5  ;;  %s867_s22 = sshll.u32 %s305_s20, 3  ;;  %1616 = vst [vmem:[#allocation8_spill] sm:$0xff] %v1318_v2  ;;  %v1333_v7 = vld [vmem:[%s1296_s18 + $0x18] sm:$0xf0] }
  0x1f   : > { %s1307_s26 = scalar_lea.vmem %s1609_s0, %s866_s21  ;;  %s1312_s29 = scalar_lea.vmem %s1612_s3, %s867_s22  ;;  %1617 = vst [vmem:[#allocation9_spill] sm:$0xff] %v1321_v3  ;;  %v1336_v8 = vld [vmem:[%s1296_s18 + $0x14] sm:$0xf0]  ;;  %v1339_v9 = vld [vmem:[%s1296_s18 + $0x24] sm:$0xf] }
  0x20   : > { %1618 = vst [vmem:[#allocation10_spill] sm:$0xff] %v1324_v4  ;;  %v1342_v10 = vld [vmem:[%s1296_s18 + $0x20] sm:$0xf]  ;;  %v1345_v11 = vld [vmem:[%s1296_s18 + $0x2c] sm:$0xf] }
  0x21   : > { %1619 = vst [vmem:[#allocation11_spill] sm:$0xff] %v1327_v5  ;;  %v1348_v12 = vld [vmem:[%s1296_s18 + $0x28] sm:$0xf]  ;;  %v1351_v13 = vld [vmem:[%s1296_s18 + $0x30] sm:$0xf0] }
  0x22   : > { %1620 = vst [vmem:[#allocation12_spill] sm:$0xff] %v1330_v6  ;;  %v1354_v14 = vld [vmem:[%s1296_s18 + $0x2c] sm:$0xf0]  ;;  %v1357_v15 = vld [vmem:[%s1296_s18 + $0x38] sm:$0xf0] }
  0x23   : > { %1621 = vst [vmem:[#allocation13_spill] sm:$0xff] %v1333_v7  ;;  %v1360_v16 = vld [vmem:[%s1296_s18 + $0x34] sm:$0xf0]  ;;  %v1363_v17 = vld [vmem:[%s1296_s18 + $0x44] sm:$0xf] }
  0x24   : > { %1622 = vst [vmem:[#allocation14_spill] sm:$0xff] %v1336_v8  ;;  %v1366_v18 = vld [vmem:[%s1296_s18 + $0x40] sm:$0xf]  ;;  %v1369_v19 = vld [vmem:[%s1296_s18 + $0x4c] sm:$0xf] }
  0x25   : > { %1623 = vst [vmem:[#allocation15_spill] sm:$0xff] %v1339_v9  ;;  %v1372_v20 = vld [vmem:[%s1296_s18 + $0x48] sm:$0xf]  ;;  %v1375_v21 = vld [vmem:[%s1296_s18 + $0x50] sm:$0xf0] }
  0x26   : > { %1624 = vst [vmem:[#allocation16_spill] sm:$0xff] %v1342_v10  ;;  %v1378_v22 = vld [vmem:[%s1296_s18 + $0x4c] sm:$0xf0]  ;;  %v1381_v23 = vld [vmem:[%s1296_s18 + $0x58] sm:$0xf0] }
  0x27   : > { %1625 = vst [vmem:[#allocation17_spill] sm:$0xff] %v1345_v11  ;;  %v1384_v24 = vld [vmem:[%s1296_s18 + $0x54] sm:$0xf0]  ;;  %v1387_v25 = vld [vmem:[%s1296_s18 + $0x64] sm:$0xf] }
  0x28   : > { %1626 = vst [vmem:[#allocation18_spill] sm:$0xff] %v1348_v12  ;;  %v1390_v26 = vld [vmem:[%s1296_s18 + $0x60] sm:$0xf]  ;;  %v1393_v27 = vld [vmem:[%s1296_s18 + $0x6c] sm:$0xf] }
  0x29   : > { %1627 = vst [vmem:[#allocation19_spill] sm:$0xff] %v1351_v13  ;;  %v1396_v28 = vld [vmem:[%s1296_s18 + $0x68] sm:$0xf]  ;;  %v1399_v29 = vld [vmem:[%s1296_s18 + $0x70] sm:$0xf0] }
  0x2a   : > { %1628 = vst [vmem:[#allocation20_spill] sm:$0xff] %v1354_v14  ;;  %v1402_v30 = vld [vmem:[%s1296_s18 + $0x6c] sm:$0xf0]  ;;  %v1405_v31 = vld [vmem:[%s1296_s18 + $0x78] sm:$0xf0] }
  0x2b   : > { %1629 = vst [vmem:[#allocation21_spill] sm:$0xff] %v1357_v15  ;;  %v1408_v32 = vld [vmem:[%s1296_s18 + $0x74] sm:$0xf0]  ;;  %v1411_v33 = vld [vmem:[%s1296_s18 + $0x84] sm:$0xf] }
  0x2c   : > { %1630 = vst [vmem:[#allocation22_spill] sm:$0xff] %v1360_v16  ;;  %v1414_v34 = vld [vmem:[%s1296_s18 + $0x80] sm:$0xf]  ;;  %v1417_v35 = vld [vmem:[%s1296_s18 + $0x8c] sm:$0xf] }
  0x2d   : > { %1631 = vst [vmem:[#allocation23_spill] sm:$0xff] %v1363_v17  ;;  %v1420_v36 = vld [vmem:[%s1296_s18 + $0x88] sm:$0xf]  ;;  %v1423_v37 = vld [vmem:[%s1296_s18 + $0x90] sm:$0xf0] }
  0x2e   : > { %1632 = vst [vmem:[#allocation24_spill] sm:$0xff] %v1366_v18  ;;  %v1426_v38 = vld [vmem:[%s1296_s18 + $0x8c] sm:$0xf0]  ;;  %v1429_v39 = vld [vmem:[%s1296_s18 + $0x98] sm:$0xf0] }
  0x2f   : > { %1633 = vst [vmem:[#allocation25_spill] sm:$0xff] %v1369_v19  ;;  %v1432_v40 = vld [vmem:[%s1296_s18 + $0x94] sm:$0xf0]  ;;  %v1435_v41 = vld [vmem:[%s1296_s18 + $0xa4] sm:$0xf] }
  0x30   : > { %1634 = vst [vmem:[#allocation26_spill] sm:$0xff] %v1372_v20  ;;  %v1438_v42 = vld [vmem:[%s1296_s18 + $0xa0] sm:$0xf]  ;;  %v1441_v43 = vld [vmem:[%s1296_s18 + $0xac] sm:$0xf] }
  0x31   : > { %1635 = vst [vmem:[#allocation27_spill] sm:$0xff] %v1375_v21  ;;  %v1444_v44 = vld [vmem:[%s1296_s18 + $0xa8] sm:$0xf]  ;;  %v1447_v45 = vld [vmem:[%s1296_s18 + $0xb0] sm:$0xf0] }
  0x32   : > { %1636 = vst [vmem:[#allocation28_spill] sm:$0xff] %v1378_v22  ;;  %v1450_v46 = vld [vmem:[%s1296_s18 + $0xac] sm:$0xf0]  ;;  %v1453_v47 = vld [vmem:[%s1296_s18 + $0xb8] sm:$0xf0] }
  0x33   : > { %1637 = vst [vmem:[#allocation29_spill] sm:$0xff] %v1381_v23  ;;  %v1456_v48 = vld [vmem:[%s1296_s18 + $0xb4] sm:$0xf0]  ;;  %v1459_v49 = vld [vmem:[%s1296_s18 + $0xc4] sm:$0xf] }
  0x34   : > { %1638 = vst [vmem:[#allocation30_spill] sm:$0xff] %v1384_v24  ;;  %v1462_v50 = vld [vmem:[%s1296_s18 + $0xc0] sm:$0xf]  ;;  %v1465_v51 = vld [vmem:[%s1296_s18 + $0xcc] sm:$0xf] }
  0x35   : > { %1639 = vst [vmem:[#allocation31_spill] sm:$0xff] %v1387_v25  ;;  %v1468_v52 = vld [vmem:[%s1296_s18 + $0xc8] sm:$0xf]  ;;  %v1471_v53 = vld [vmem:[%s1296_s18 + $0xd0] sm:$0xf0] }
  0x36   : > { %v1474_v54 = vld [vmem:[%s1296_s18 + $0xcc] sm:$0xf0]  ;;  %v1477_v55 = vld [vmem:[%s1296_s18 + $0xd8] sm:$0xf0]  ;;  %v1480_v56 = vld [vmem:[%s1296_s18 + $0xd4] sm:$0xf0] }
  0x37   : > { %v1483_v57 = vld [vmem:[%s1296_s18 + $0xe4] sm:$0xf]  ;;  %v1486_v58 = vld [vmem:[%s1296_s18 + $0xe0] sm:$0xf]  ;;  %v1489_v59 = vld [vmem:[%s1296_s18 + $0xec] sm:$0xf] }
  0x38   : > { %1640 = vst [vmem:[#allocation32_spill] sm:$0xff] %v1483_v57  ;;  %v1492_v60 = vld [vmem:[%s1296_s18 + $0xe8] sm:$0xf]  ;;  %v1495_v61 = vld [vmem:[%s1296_s18 + $0xf0] sm:$0xf0] }
  0x39   : > { %1641 = vst [vmem:[#allocation33_spill] sm:$0xff] %v1486_v58  ;;  %v1498_v62 = vld [vmem:[%s1296_s18 + $0xec] sm:$0xf0]  ;;  %v1501_v63 = vld [vmem:[%s1296_s18 + $0xf8] sm:$0xf0] }
  0x3a   : > { %v1504_v0 = vld [vmem:[%s1296_s18 + $0xf4] sm:$0xf0] }
  0x3b   : > { %1642 = vst [vmem:[#allocation34_spill] sm:$0xff] %v1504_v0 }
  0x3c LB: >> { %v997_v4 = vor.u32 %v1489_v59, %v1501_v63  ;;  %v969_v1 = vor.u32 %v1474_v54, %v1462_v50  ;;  %v973_v5 = vor.u32 %v1459_v49, %v1471_v53  ;;  %s868_s4 = sshll.u32 %s1209_s30, 1  ;;  %v1646_v25 = vld [vmem:[#allocation31_spill] sm:$0xff]  ;;  %v1647_v18 = vld [vmem:[#allocation24_spill] sm:$0xff]  ;;  %v1651_v20 = vld [vmem:[#allocation26_spill] sm:$0xff]  ;;  %vm621_vm0 = vcmask 1041408   ;;  %s1209_s30 = sphi %s1506_s30, %s391_s30  }
  0x3d   : >> { %s393_s5 = ssub.s32 7, %s868_s4  ;;  %v1648_v22 = vld [vmem:[#allocation28_spill] sm:$0xff]  ;;  %v1649_v21 = vld [vmem:[#allocation27_spill] sm:$0xff]  ;;  %v1652_v24 = vld [vmem:[#allocation30_spill] sm:$0xff]  ;;  %vm623_vm1 = vcmask 1045508   ;;  %vm625_vm2 = vcmask 1043456  }
  0x3e   : >> { %601 = vmatpush.bf16.msra.mxu3 %v997_v4  ;;  %s394_s6 = smul.u32 %s1197_s15, %s393_s5  ;;  %v961_v4 = vor.u32 %v1456_v48, %v1444_v44  ;;  %v1650_v17 = vld [vmem:[#allocation23_spill] sm:$0xff]  ;;  %v1653_v23 = vld [vmem:[#allocation29_spill] sm:$0xff]  ;;  %v1655_v10 = vld [vmem:[#allocation16_spill] sm:$0xff] }
  0x3f   : >> { %v1644_v57 = vld [vmem:[#allocation32_spill] sm:$0xff]  ;;  %v1654_v19 = vld [vmem:[#allocation25_spill] sm:$0xff]  ;;  %v1657_v13 = vld [vmem:[#allocation19_spill] sm:$0xff] }
  0x40   : >> { %v1643_v58 = vld [vmem:[#allocation33_spill] sm:$0xff]  ;;  %v989_v7 = vor.u32 %v1644_v57, %v1495_v61  ;;  %v977_v57 = vor.u32 %v1480_v56, %v1468_v52  ;;  %s1534_s7 = sadd.s32 %s1209_s30, %s394_s6  ;;  %v1656_v14 = vld [vmem:[#allocation20_spill] sm:$0xff]  ;;  %v1658_v9 = vld [vmem:[#allocation15_spill] sm:$0xff]  ;;  %s391_s30 = sadd.s32 1, %s1209_s30  }
  0x41   : >> { %v985_v3 = vor.u32 %v1498_v62, %v1643_v58  ;;  %v1214_v58 = vmov 0   ;;  %s1001_s8 = sshll.u32 %s1534_s7, 1  ;;  %v1659_v12 = vld [vmem:[#allocation18_spill] sm:$0xff]  ;;  %v1661_v15 = vld [vmem:[#allocation21_spill] sm:$0xff]  ;;  %v1663_v2 = vld [vmem:[#allocation8_spill] sm:$0xff]  ;;  %s869_s12 = sshll.u32 %s1534_s7, 2 }
  0x42   : >> { %v1645_v0 = vld [vmem:[#allocation34_spill] sm:$0xff]  ;;  %575 = vmatpush.bf16.msra.mxu1 %v989_v7  ;;  %1104 = vset.pattern.permute.xlu0 %v1214_v58  ;;  %v957_v7 = vor.u32 %v1435_v41, %v1447_v45  ;;  %s695_s11 = scalar_lea.vmem %s1611_s2, %s1001_s8  ;;  %v945_v58 = vor.u32 %v1432_v40, %v1420_v36  ;;  %v1662_v11 = vld [vmem:[#allocation17_spill] sm:$0xff]  ;;  %v1664_v6 = vld [vmem:[#allocation12_spill] sm:$0xff]  ;;  %s397_s18 = scalar_lea.vmem %s1307_s26, %s869_s12 }
  0x43   : >> { %v993_v8 = vor.u32 %v1645_v0, %v1492_v60  ;;  %562 = vmatpush.bf16.msra.mxu0 %v985_v3  ;;  %v981_v0 = vor.u32 %v1465_v51, %v1477_v55  ;;  %v953_v3 = vor.u32 %v1450_v46, %v1438_v42  ;;  %v1660_v16 = vld [vmem:[#allocation22_spill] sm:$0xff]  ;;  %s713_s20 = scalar_lea.vmem %s1312_s29, %s1534_s7  ;;  %p388_p0 = scmp.ge.s32.totalorder %s391_s30, 8  }
  0x45   : >> { %588 = vmatpush.bf16.msra.mxu2 %v993_v8  ;;  %602 = vmatpush.bf16.msra.mxu3 %v981_v0  ;;  %v965_v8 = vor.u32 %v1441_v43, %v1453_v47  ;;  %v949_v0 = vor.u32 %v1417_v35, %v1429_v39 }
  0x46   : >> { %576 = vmatpush.bf16.msra.mxu1 %v973_v5  ;;  %v937_v5 = vor.u32 %v1426_v38, %v1414_v34 }
  0x47   : >> { %563 = vmatpush.bf16.msra.mxu0 %v969_v1  ;;  %v696_v1 = vld [vmem:[%s695_s11] sm:$0x3] }
  0x48   : >> { %703 = vperm.xlu0 %1104, %v696_v1   ;;  %v905_v1 = vor.u32 %v1648_v22, %v1647_v18 }
  0x49   : >> { %589 = vmatpush.bf16.msra.mxu2 %v977_v57  ;;  %v941_v57 = vor.u32 %v1411_v33, %v1423_v37  ;;  %603 = vmatpush.bf16.msra.mxu3 %v965_v8  ;;  %v933_v8 = vor.u32 %v1393_v27, %v1405_v31 }
  0x4a   : >> { %577 = vmatpush.bf16.msra.mxu1 %v957_v7  ;;  %v925_v7 = vor.u32 %v1646_v25, %v1399_v29 }
  0x4b   : >> { %564 = vmatpush.bf16.msra.mxu0 %v953_v3  ;;  %v921_v3 = vor.u32 %v1402_v30, %v1390_v26 }
  0x4d   : >> { %590 = vmatpush.bf16.msra.mxu2 %v961_v4  ;;  %604 = vmatpush.bf16.msra.mxu3 %v949_v0  ;;  %v929_v4 = vor.u32 %v1408_v32, %v1396_v28  ;;  %v889_v0 = vor.u32 %v1656_v14, %v1655_v10  ;;  %v400_v14 = vld [vmem:[#allocation2] sm:$0x3] }
  0x4e   : >> { %578 = vmatpush.bf16.msra.mxu1 %v941_v57  ;;  %v913_v57 = vor.u32 %v1652_v24, %v1651_v20 }
  0x4f   : >> { %565 = vmatpush.bf16.msra.mxu0 %v937_v5  ;;  %v909_v5 = vor.u32 %v1650_v17, %v1649_v21 }
  0x51   : >> { %591 = vmatpush.bf16.msra.mxu2 %v945_v58  ;;  %605 = vmatpush.bf16.msra.mxu3 %v933_v8  ;;  %v917_v58 = vor.u32 %v1654_v19, %v1653_v23  ;;  %v873_v8 = vor.u32 %v1664_v6, %v1663_v2 }
  0x52   : >> { %579 = vmatpush.bf16.msra.mxu1 %v925_v7  ;;  %v897_v7 = vor.u32 %v1660_v16, %v1659_v12  ;;  %v1669_v12 = vld [vmem:[#allocation13_spill] sm:$0xff] }
  0x53   : >> { %566 = vmatpush.bf16.msra.mxu0 %v921_v3  ;;  %v893_v3 = vor.u32 %v1658_v9, %v1657_v13  ;;  %v1670_v13 = vld [vmem:[#allocation9_spill] sm:$0xff] }
  0x54   : >> { %v885_v16 = vor.u32 %v1670_v13, %v1669_v12 }
  0x55   : >> { %592 = vmatpush.bf16.msra.mxu2 %v929_v4  ;;  %606 = vmatpush.bf16.msra.mxu3 %v917_v58  ;;  %v901_v4 = vor.u32 %v1662_v11, %v1661_v15  ;;  %v1668_v58 = vld [vmem:[#allocation14_spill] sm:$0xff]  ;;  %v401_v11 = vpack.c.bf16 %v400_v14, %v400_v14 }
  0x56   : >> { %580 = vmatpush.bf16.msra.mxu1 %v909_v5  ;;  %v1666_v5 = vld [vmem:[#allocation7_spill] sm:$0xff] }
  0x57   : >> { %567 = vmatpush.bf16.msra.mxu0 %v905_v1  ;;  %v1665_v1 = vld [vmem:[#allocation11_spill] sm:$0xff] }
  0x58   : >> { %v877_v10 = vor.u32 %v1666_v5, %v1665_v1 }
  0x59   : >> { %593 = vmatpush.bf16.msra.mxu2 %v913_v57  ;;  %607 = vmatpush.bf16.msra.mxu3 %v901_v4  ;;  %v1667_v57 = vld [vmem:[#allocation10_spill] sm:$0xff] }
  0x5a   : >> { %581 = vmatpush.bf16.msra.mxu1 %v893_v3  ;;  %v881_v9 = vor.u32 %v1668_v58, %v1667_v57 }
  0x5b   : >> { %568 = vmatpush.bf16.msra.mxu0 %v889_v0 }
  0x5d   : >> { %594 = vmatpush.bf16.msra.mxu2 %v897_v7  ;;  %608 = vmatpush.bf16.msra.mxu3 %v885_v16  ;;  %v398_v7 = vld [vmem:[%s397_s18] sm:$0xf] }
  0x5e   : >> { %582 = vmatpush.bf16.msra.mxu1 %v877_v10  ;;  %v399_v1 = vunpack.c.l.bf16 %v398_v7 }
  0x5f   : >> { %569 = vmatpush.bf16.msra.mxu0 %v873_v8 }
  0x60   : >> { %609 = vmatmul.bf16.vlgmr.msra.gmra.mxu3 %v401_v11 }
  0x61   : >> { %595 = vmatpush.bf16.msra.mxu2 %v881_v9  ;;  %583 = vmatmul.bf16.vlgmr.msra.gmra.mxu1 %v401_v11 }
  0x62   : >> { %570 = vmatmul.bf16.vlgmr.msra.gmra.mxu0 %v401_v11 }
  0x64   : >> { %596 = vmatmul.bf16.vlgmr.msra.gmra.mxu2 %v401_v11 }
  0xde   : >> { %v584_v3 = vpop.f32.mrf.mxu1 }
  0xdf   : >> { %v571_v0 = vpop.f32.mrf.mxu0  ;;  %v618_v4 = vrot.slane %v584_v3, 6 }
  0xe1   : >> { %v622_v12 = vsel %vm621_vm0, %v571_v0, %v618_v4 }
  0xe3   : >> { %v610_v57 = vpop.f32.mrf.mxu3 }
  0xe4   : >> { %v620_v10 = vrot.slane %v610_v57, 2 }
  0xe6   : >> { %v586_v14 = vpop.f32.mrf.mxu1 }
  0xe7   : >> { %v597_v5 = vpop.f32.mrf.mxu2  ;;  %v573_v9 = vpop.f32.mrf.mxu0 }
  0xe8   : >> { %v619_v13 = vrot.slane %v597_v5, 4 }
  0xea   : >> { %v624_v16 = vsel %vm623_vm1, %v619_v13, %v620_v10 }
  0xeb   : >> { %v626_v8 = vsel %vm625_vm2, %v622_v12, %v624_v16  ;;  %v612_v17 = vpop.f32.mrf.mxu3 }
  0xec   : >> { %v628_v11 = vadd.f32 %v626_v8, %v399_v1 }
  0xee   : >> { %v998_v58 = vmul.f32 -1.442695, %v628_v11  ;;  %v649_v2 = vrot.slane %v628_v11, 2  ;;  %v673_v6 = vrot.slane %v628_v11, 6  ;;  %v670_v10 = vrot.slane %v628_v11, 4 }
  0xef   : >> { %v599_v15 = vpop.f32.mrf.mxu2 }
  0xf0   : >> { %1105 = vpow2.f32 %v998_v58  ;;  %v999_v3 = vmul.f32 -1.442695, %v649_v2  ;;  %v1000_v7 = vmul.f32 -1.442695, %v673_v6 }
  0xf2   : >> { %1107 = vpow2.f32 %v999_v3 }
  0xf3   : >> { %1109 = vpow2.f32 %v1000_v7 }
  0xf6   : >> { %v1106_v18 = vpop.eup %1105 }
  0xf7   : >> { %v632_v0 = vadd.f32 1.0, %v1106_v18 }
  0xf8   : >> { %v1108_v4 = vpop.eup %1107 }
  0xf9   : >> { %v1110_v5 = vpop.eup %1109  ;;  %1111 = vrcp.f32 %v632_v0  ;;  %v654_v57 = vadd.f32 1.0, %v1108_v4  ;;  %v644_v2 = vand.u32 2147483648, %v632_v0  ;;  %v642_v16 = vand.u32 2147483647, %v632_v0 }
  0xfa   : >> { %v678_v9 = vadd.f32 1.0, %v1110_v5  ;;  %vm638_vm4 = vweird.f32 %v632_v0 }
  0xfb   : >> { %1113 = vrcp.f32 %v654_v57  ;;  %v666_v18 = vand.u32 2147483648, %v654_v57  ;;  %v664_v4 = vand.u32 2147483647, %v654_v57  ;;  %v645_v5 = vor.u32 1.1754944e-38, %v644_v2 }
  0xfc   : >> { %1115 = vrcp.f32 %v678_v9  ;;  %vm643_vm7 = vcmp.eq.f32.partialorder %v642_v16, 8.507059e+37  ;;  %vm660_vm8 = vweird.f32 %v654_v57  ;;  %vm684_vm12 = vweird.f32 %v678_v9 }
  0xfd   : >> { %1117 = vtanh.f32 %v670_v10  ;;  %vm665_vm10 = vcmp.eq.f32.partialorder %v664_v4, 8.507059e+37 }
  0xff   : >> { %v1112_v1 = vpop.eup %1111 }
 0x100   : >> { %v634_v12 = vmul.f32 %v1112_v1, %v632_v0  ;;  %vm639_vm3 = vweird.f32 %v1112_v1 }
 0x101   : >> { %v1114_v13 = vpop.eup %1113  ;;  %vm640_vm6 = vmor %vm638_vm4, %vm639_vm3 }
 0x102   : >> { %v1116_v15 = vpop.eup %1115  ;;  %v635_v17 = vsub.f32 1.0, %v634_v12  ;;  %v656_v14 = vmul.f32 %v1114_v13, %v654_v57  ;;  %vm661_vm5 = vweird.f32 %v1114_v13  ;;  %v697_v12 = vld [vmem:[#allocation3] sm:$0x3]  ;;  %v690_v57 = vand.u32 2147483648, %v678_v9 }
 0x103   : >> { %v680_v58 = vmul.f32 %v1116_v15, %v678_v9  ;;  %vm662_vm9 = vmor %vm660_vm8, %vm661_vm5  ;;  %v1118_v0 = vpop.eup %1117  ;;  %vm685_vm11 = vweird.f32 %v1116_v15 }
 0x104   : >> { %v636_v6 = vmul.f32 %v1112_v1, %v635_v17  ;;  %v657_v8 = vsub.f32 1.0, %v656_v14  ;;  %v667_v17 = vor.u32 1.1754944e-38, %v666_v18  ;;  %vm686_vm13 = vmor %vm684_vm12, %vm685_vm11  ;;  %v691_v2 = vor.u32 1.1754944e-38, %v690_v57 }
 0x105   : >> { %v681_v21 = vsub.f32 1.0, %v680_v58 }
 0x106   : >> { %v637_v3 = vadd.f32 %v1112_v1, %v636_v6  ;;  %v658_v7 = vmul.f32 %v1114_v13, %v657_v8  ;;  %v704_v8 = vpop.permute.xlu0 %703 }
 0x107   : >> { %v682_v23 = vmul.f32 %v1116_v15, %v681_v21 }
 0x108   : >> { %v641_v19 = vsel %vm640_vm6, %v1112_v1, %v637_v3  ;;  %v659_v11 = vadd.f32 %v1114_v13, %v658_v7 }
 0x109   : >> { %v646_v20 = vsel %vm643_vm7, %v645_v5, %v641_v19  ;;  %v683_v1 = vadd.f32 %v1116_v15, %v682_v23  ;;  %v688_v19 = vand.u32 2147483647, %v678_v9 }
 0x10a   : >> { %v663_v14 = vsel %vm662_vm9, %v1114_v13, %v659_v11  ;;  %v699_v6 = vmul.f32 %v1118_v0, %v646_v20 }
 0x10b   : >> { %v668_v10 = vsel %vm665_vm10, %v667_v17, %v663_v14  ;;  %v687_v13 = vsel %vm686_vm13, %v1116_v15, %v683_v1  ;;  %vm689_vm14 = vcmp.eq.f32.partialorder %v688_v19, 8.507059e+37 }
 0x10c   : >> { %v698_v22 = vmul.f32 %v697_v12, %v668_v10  ;;  %v692_v18 = vsel %vm689_vm14, %v691_v2, %v687_v13 }
 0x10e   : >> { %v700_v24 = vadd.f32 %v699_v6, %v698_v22 }
 0x110   : >> { %v706_v25 = vmul.f32 %v704_v8, %v700_v24 }
 0x112   : >> { %1119 = vtanh.f32 %v706_v25  ;;  %710 = vst [vmem:[#allocation3] sm:$0x3] %v706_v25 }
 0x118   : >> { %v1120_v16 = vpop.eup %1119 }
 0x119   : >> { %v708_v20 = vmul.f32 %v1120_v16, %v692_v18 }
 0x11b   : >> { %v709_v58 = vmul.f32 %v708_v20, %v704_v8  ;;  %390 = sbr.rel (!%p388_p0) target bundleno = 60 (0x3c), region = 92 }
 0x11d   : >> { %711 = vst [vmem:[#allocation2] sm:$0x3] %v709_v58  ;;  %v712_v21 = vpack.c.bf16 %v709_v58, %v709_v58 }
 0x11f   : >> { %714 = vst [vmem:[%s713_s20] sm:$0x1] %v712_v21 }
 0x120 PF: > { %s16_s17 = sadd.s32 1, %s1205_s17   ;;  %s1671_s12 = smov %s1189_s13 }
 0x121   : > { %p13_p1 = scmp.ge.s32.totalorder %s16_s17, 4   ;;  %s1672_s13 = smov %s1193_s14 }
 0x122   : > { %s1673_s14 = smov %s1284_s24  ;;  %s1674_s15 = smov %s1201_s16 }
 0x123   : > { %s1675_s16 = smov %s1677_s19  ;;  %15 = sbr.rel (!%p13_p1) target bundleno = 4 (0x4), region = 103 }
 0x128   :  { %755 = vsyncpa [#allocation5], 1 }
 0x129   :  { %757 = vsyncpa [#allocation5 + $0x1], 1 }

</bundles_post_ra>
